<compile_context>
chip_gen: v5e
topology: v5e:2x2
jax: 0.10.0
libtpu: 0.0.40
codegen_flags: <defaults>
</compile_context>

<pallas_src>
import jax
import jax.numpy as jnp
from jax.experimental import pallas as pl
from jax.experimental.pallas import tpu as pltpu

# ----- model dims (scaled-down, consistent with the module's structure) -----
B = 2              # batch
S = 80             # main sequence length
S_SEQ = 32         # "seq_*" branch sequence length
H = 64             # hidden size (stands in for BERT/ViT 768)
N_HEADS = 4        # stands in for 12 heads   (H == N_HEADS * HEAD_DIM)
HEAD_DIM = 16      # stands in for 64
N_LAYERS = 12      # number of ViT blocks / prompt gates (12 as in the module)
LAYERS_PER_BLOCK = 6   # grid=(2,) "parallel": both v7x TCs; ~free extra step on v5e/v6e
P = 16             # ViT tokens per image (stands in for 50)
NUM_LABELS = 8     # len(ROLE_label_list)
FC_PAD = 128       # ME_fc output padded to a full lane tile
VOCAB = 128
IMG = 16
NEG_SLOPE = 0.01   # F.leaky_relu default negative_slope


# ============================ Pallas kernels ============================

def _prompt_kernel(text_ref, x_ref, w_ref, b_ref, o_ref):
    """Visual-prompt block: LAYERS_PER_BLOCK gate layers + key_val assembly.

    text_ref: (B, S_SEQ, 2H) f32   -- precomputed text_key_val (same every layer)
    x_ref:    (LPB, B, P, 4H) bf16 -- stacked ViT features for this block
    w_ref:    (LPB, 4H, 2H) bf16, b_ref: (LPB, 1, 2H) f32
    o_ref:    (LPB, B, S_SEQ + P, 2H) f32 -- combined key_val written in place
    """
    lpb, nb, p, d_in = x_ref.shape
    s_seq = text_ref.shape[1]
    d_out = w_ref.shape[-1]
    text = text_ref[...]                                        # (B, S_SEQ, 2H) f32
    for l in range(lpb):                                        # static unroll (6)
        # text portion of key_val: written directly, no HBM concat round-trip
        o_ref[l, :, :s_seq, :] = text
        # gate: softmax(leaky_relu(x @ W + b), dim=0)  (batch axis, as in torch)
        x2d = x_ref[l].reshape(nb * p, d_in)                    # bf16 MXU operand
        y = jnp.dot(x2d, w_ref[l], preferred_element_type=jnp.float32)
        y = y.reshape(nb, p, d_out) + b_ref[l]                  # bias in f32
        y = jnp.maximum(y, NEG_SLOPE * y)                       # leaky_relu (1 vmax)
        m = jnp.max(y, axis=0, keepdims=True)                   # softmax over batch
        e = jnp.exp(y - m)
        o_ref[l, :, s_seq:, :] = e / jnp.sum(e, axis=0, keepdims=True)  # exact divide


def prompt_gates_forward(text_kv, img_feats, gates_w, gates_b):
    """All 12 gates + key_val assembly in one pallas_call, grid over layer blocks.

    text_kv: (B, S_SEQ, 2H) f32, img_feats: (12, B, P, 4H) bf16,
    gates_w: (12, 4H, 2H) bf16, gates_b: (12, 1, 2H) f32
    -> key_val: (12, B, S_SEQ + P, 2H) f32
    """
    n, bx, p, d_in = img_feats.shape
    d_out = gates_w.shape[-1]
    s_seq = text_kv.shape[1]
    lpb = LAYERS_PER_BLOCK
    assert n % lpb == 0
    return pl.pallas_call(
        _prompt_kernel,
        out_shape=jax.ShapeDtypeStruct((n, bx, s_seq + p, d_out), jnp.float32),
        grid=(n // lpb,),
        in_specs=[
            pl.BlockSpec((bx, s_seq, d_out), lambda i: (0, 0, 0)),
            pl.BlockSpec((lpb, bx, p, d_in), lambda i: (i, 0, 0, 0)),
            pl.BlockSpec((lpb, d_in, d_out), lambda i: (i, 0, 0)),
            pl.BlockSpec((lpb, 1, d_out), lambda i: (i, 0, 0)),
        ],
        out_specs=pl.BlockSpec((lpb, bx, s_seq + p, d_out), lambda i: (i, 0, 0, 0)),
        compiler_params=pltpu.CompilerParams(
            dimension_semantics=("parallel",)),     # shard layer blocks across v7x TCs
    )(text_kv, img_feats, gates_w, gates_b)


def _attn_fc_kernel(x_ref, lab_ref, wa_ref, ba_ref, v_ref, wf_ref, bf_ref, o_ref):
    """Fused ArgumentAttention + ME_fc for ONE batch element (grid over batch).

    x_ref: (S, H) f32, lab_ref: (S, 1) f32,
    wa_ref: (H, H) bf16, ba_ref: (1, H) f32, v_ref: (1, H) f32,
    wf_ref: (H, FC_PAD) bf16, bf_ref: (1, FC_PAD) f32, o_ref: (S, FC_PAD) f32.
    """
    x = x_ref[...]                                              # (S, H) f32
    masked = x * lab_ref[...] + 1e-09                           # entity mask (f32)
    hid = jnp.tanh(jnp.dot(masked.astype(jnp.bfloat16), wa_ref[...],
                           preferred_element_type=jnp.float32) + ba_ref[...])
    # v: Linear(H, 1, bias=False) == lane reduction against the v row.
    energies = jnp.sum(hid * v_ref[...], axis=-1, keepdims=True)    # (S, 1)
    weights = 1.0 / (1.0 + jnp.exp(-energies))                      # exact sigmoid
    weighted = (x * weights).astype(jnp.bfloat16)                   # re-weight (f32->bf16)
    o_ref[...] = jnp.dot(weighted, wf_ref[...],
                         preferred_element_type=jnp.float32) + bf_ref[...]  # lane-dense


def attn_emissions_forward(x, ner_labels, params):
    """ArgumentAttention(x, NER_labels) followed by ME_fc -> (B, S, NUM_LABELS)."""
    bx, s, h = x.shape
    lab = ner_labels.reshape(bx, s, 1).astype(jnp.float32)
    out_pad = pl.pallas_call(
        _attn_fc_kernel,
        out_shape=jax.ShapeDtypeStruct((bx, s, FC_PAD), jnp.float32),
        grid=(bx,),
        in_specs=[
            pl.BlockSpec((None, s, h), lambda b: (b, 0, 0)),
            pl.BlockSpec((None, s, 1), lambda b: (b, 0, 0)),
            pl.BlockSpec((h, h), lambda b: (0, 0)),
            pl.BlockSpec((1, h), lambda b: (0, 0)),
            pl.BlockSpec((1, h), lambda b: (0, 0)),
            pl.BlockSpec((h, FC_PAD), lambda b: (0, 0)),
            pl.BlockSpec((1, FC_PAD), lambda b: (0, 0)),
        ],
        out_specs=pl.BlockSpec((None, s, FC_PAD), lambda b: (b, 0, 0)),
        compiler_params=pltpu.CompilerParams(
            dimension_semantics=("parallel",)),     # use both v7x TensorCores
    )(x.astype(jnp.float32), lab,
      params["attn_w"], params["attn_b"], params["attn_v"],
      params["fc_w_pad"], params["fc_b_pad"])
    return out_pad[..., :NUM_LABELS]


# ======================= CRF Viterbi decode (glue) =======================

def crf_viterbi_decode(start, end, trans, emissions):
    """torchcrf CRF.decode for a full (all-ones) mask.  emissions: (B, S, L)."""
    # TODO(synk): ragged attention masks are not handled (example uses a full mask).
    first = start[None, :] + emissions[:, 0, :]                     # (B, L)
    rest = jnp.swapaxes(emissions[:, 1:, :], 0, 1)                  # (S-1, B, L)

    def fwd(score, emit_t):
        cand = score[:, :, None] + trans[None, :, :]                # (B, L, L)
        best_prev = jnp.argmax(cand, axis=1).astype(jnp.int32)
        new_score = jnp.max(cand, axis=1) + emit_t
        return new_score, best_prev

    # unroll=8: per-iteration while-loop overhead dominated this path (review).
    last_score, history = jax.lax.scan(fwd, first, rest, unroll=8)  # (S-1, B, L)
    last_score = last_score + end[None, :]
    last_tag = jnp.argmax(last_score, axis=-1).astype(jnp.int32)    # (B,)

    def bwd(tag, bp_t):
        prev = jnp.take_along_axis(bp_t, tag[:, None], axis=1)[:, 0]
        return prev, prev

    _, prev_tags = jax.lax.scan(bwd, last_tag, history, reverse=True, unroll=8)
    return jnp.concatenate([jnp.swapaxes(prev_tags, 0, 1), last_tag[:, None]],
                           axis=1)                                   # (B, S)


# ==================== parameters & backbone stubs (glue) ====================

def _linear_init(key, fan_in, fan_out):
    kw, kb = jax.random.split(key)
    bound = 1.0 / jnp.sqrt(jnp.float32(fan_in))
    w = jax.random.uniform(kw, (fan_in, fan_out), jnp.float32, -bound, bound)
    b = jax.random.uniform(kb, (fan_out,), jnp.float32, -bound, bound)
    return w, b


def init_params(key):
    keys = jax.random.split(key, 22)
    p = {}
    # encoder_text: Linear(H, 2H) -- tiny, stays in plain XLA (no Pallas launch)
    w, b = _linear_init(keys[0], H, 2 * H)
    p["enc_text_w"] = w.astype(jnp.float32)                          # (H, 2H)
    p["enc_text_b"] = b.astype(jnp.float32)                          # (2H,)
    # gates: 12 x Linear(4H, 2H) -- stacked & cast ONCE here (hoisted out of fwd)
    gws, gbs = [], []
    for i in range(N_LAYERS):
        w, b = _linear_init(keys[1 + i], 4 * H, 2 * H)
        gws.append(w); gbs.append(b)
    p["gates_w"] = jnp.stack(gws).astype(jnp.bfloat16)               # (12, 4H, 2H)
    p["gates_b"] = jnp.stack(gbs)[:, None, :].astype(jnp.float32)    # (12, 1, 2H)
    k = 1 + N_LAYERS
    # ArgumentAttention: attn = Linear(H, H), v = Linear(H, 1, bias=False)
    w, b = _linear_init(keys[k], H, H); k += 1
    p["attn_w"] = w.astype(jnp.bfloat16)
    p["attn_b"] = b[None, :].astype(jnp.float32)
    vw, _ = _linear_init(keys[k], H, 1); k += 1
    p["attn_v"] = vw.reshape(1, H).astype(jnp.float32)
    # ME_fc: Linear(H, NUM_LABELS), output padded to 128 lanes
    w, b = _linear_init(keys[k], H, NUM_LABELS); k += 1
    p["fc_w_pad"] = (jnp.zeros((H, FC_PAD), jnp.float32)
                     .at[:, :NUM_LABELS].set(w).astype(jnp.bfloat16))
    p["fc_b_pad"] = jnp.zeros((1, FC_PAD), jnp.float32).at[0, :NUM_LABELS].set(b)
    # CRF params (torchcrf init: uniform(-0.1, 0.1))
    p["crf_start"] = jax.random.uniform(keys[k], (NUM_LABELS,), jnp.float32, -0.1, 0.1); k += 1
    p["crf_end"] = jax.random.uniform(keys[k], (NUM_LABELS,), jnp.float32, -0.1, 0.1); k += 1
    p["crf_trans"] = jax.random.uniform(keys[k], (NUM_LABELS, NUM_LABELS), jnp.float32, -0.1, 0.1); k += 1
    # deterministic backbone-stub parameters
    p["bert_emb"] = 0.02 * jax.random.normal(keys[k], (VOCAB, H), jnp.float32); k += 1
    p["vit_proj"] = 0.02 * jax.random.normal(keys[k], (3 * IMG * IMG, H), jnp.float32); k += 1
    p["vit_block_bias"] = 0.1 * jax.random.normal(keys[k], (N_LAYERS, P, H), jnp.float32); k += 1
    return p


def bert_stub(params, input_ids, attention_mask=None):
    # TODO(synk): pretrained huggingface BertModel (incl. past_key_values cross-attn)
    # has no clean Pallas equivalent here; deterministic embedding stub (glue).
    hidden = params["bert_emb"][input_ids]                           # (B, L, H)
    if attention_mask is not None:
        m = attention_mask[:, -hidden.shape[1]:].astype(hidden.dtype)
        hidden = hidden * m[..., None]
    return hidden


def vit_stub(params, images):
    # TODO(synk): timm 'vit_base_patch32_224' forward-hook feature extractor is not
    # implemented; deterministic per-block patch-projection stub (glue).
    bx = images.shape[0]
    flat = images.reshape(bx, -1).astype(jnp.float32)                # (B, 3*IMG*IMG)
    base = jnp.tanh(flat @ params["vit_proj"])                       # (B, H)
    feats = jnp.tanh(base[:, None, None, :] + params["vit_block_bias"][None])
    # bf16 end-to-end on the ViT feature path (halves the gate-kernel x DMA)
    return jnp.transpose(feats, (1, 0, 2, 3)).astype(jnp.bfloat16)   # (12, B, P, H)


def vit_model_forward(params, images, aux_imgs):
    """ViTModel.forward with aux_imgs: per-block concat of global + 3 aux features."""
    global_feats = vit_stub(params, images)                          # (12, B, P, H) bf16
    aux_imgs = jnp.transpose(aux_imgs, (1, 0, 2, 3, 4))              # permute([1,0,2,3,4])
    aux_feats = [vit_stub(params, aux_imgs[i]) for i in range(aux_imgs.shape[0])]
    # stacked per-layer torch.cat((global, aux0, aux1, aux2), dim=-1)
    return jnp.concatenate([global_feats] + aux_feats, axis=-1)      # (12, B, P, 4H) bf16


def encoder_text_forward(params, seq_hidden):
    """text_key_val = softmax(leaky_relu(encoder_text(seq_hidden)), dim=0).

    Single tiny (B*Sseq,H)x(H,2H) matmul: a dedicated Pallas launch costs more
    than the compute, so this stays in plain XLA (per review).
    """
    y = seq_hidden @ params["enc_text_w"] + params["enc_text_b"]     # (B, Sseq, 2H) f32
    y = jnp.maximum(y, NEG_SLOPE * y)                                # leaky_relu
    return jax.nn.softmax(y, axis=0)                                 # implicit dim=0 (3-D)


# =========================== MEModel forward ===========================

def get_visual_prompt(params, images, aux_imgs, seq_last_hidden_state):
    bsz = images.shape[0]
    img_features = vit_model_forward(params, images, aux_imgs)       # (12, B, P, 4H) bf16
    text_key_val = encoder_text_forward(params, seq_last_hidden_state)  # (B, Sseq, 2H) f32
    # all 12 gates + text/image key_val assembly in ONE pallas_call (grid=(2,))
    key_val = prompt_gates_forward(text_key_val, img_features,
                                   params["gates_w"], params["gates_b"])
    key = key_val[..., :H].reshape(N_LAYERS, bsz, N_HEADS, -1, HEAD_DIM)
    value = key_val[..., H:].reshape(N_LAYERS, bsz, N_HEADS, -1, HEAD_DIM)
    return [(key[i], value[i]) for i in range(N_LAYERS)]


def me_model_forward(params, input_ids, attention_mask, token_type_ids,
                     NER_labels, images, aux_imgs,
                     seq_input_ids, seq_token_type_ids, seq_attention_mask,
                     use_prompt=True):
    bsz = attention_mask.shape[0]
    if use_prompt:
        seq_last_hidden_state = bert_stub(params, seq_input_ids, seq_attention_mask)
        prompt_guids = get_visual_prompt(params, images, aux_imgs, seq_last_hidden_state)
        prompt_guids_length = prompt_guids[0][0].shape[2]
        prompt_guids_mask = jnp.ones((bsz, prompt_guids_length), jnp.float32)
        prompt_attention_mask = jnp.concatenate(
            (prompt_guids_mask, attention_mask.astype(jnp.float32)), axis=1)
    else:
        prompt_guids = None
        prompt_attention_mask = attention_mask
    # second BERT pass (past_key_values=prompt_guids) -- backbone stubbed, see TODO above
    sequence_output = bert_stub(params, input_ids, prompt_attention_mask)
    # self.dropout(sequence_output): inference-mode identity.
    emissions = attn_emissions_forward(sequence_output, NER_labels, params)
    # TODO(synk): CRF Viterbi decode is sequential over the time axis; kept as
    # plain-JAX lax.scan (unroll=8) glue rather than a Pallas kernel.
    logits = crf_viterbi_decode(params["crf_start"], params["crf_end"],
                                params["crf_trans"], emissions)
    # ROLE_labels is None -> no CRF loss; return decoded tags (logits) + extras.
    return logits, emissions, prompt_guids


forward_jit = jax.jit(me_model_forward, static_argnames=("use_prompt",))


# ================================ main ================================

if __name__ == "__main__":
    key = jax.random.PRNGKey(0)
    pkey, k1, k2, k3, k4, k5 = jax.random.split(key, 6)
    params = init_params(pkey)

    input_ids = jax.random.randint(k1, (B, S), 0, VOCAB)
    attention_mask = jnp.ones((B, S), jnp.int32)
    token_type_ids = jnp.zeros((B, S), jnp.int32)
    NER_labels = jax.random.randint(k5, (B, S), 0, 2)
    seq_input_ids = jax.random.randint(k2, (B, S_SEQ), 0, VOCAB)
    seq_attention_mask = jnp.ones((B, S_SEQ), jnp.int32)
    seq_token_type_ids = jnp.zeros((B, S_SEQ), jnp.int32)
    images = jax.random.normal(k3, (B, 3, IMG, IMG), jnp.float32)        # NCHW
    aux_imgs = jax.random.normal(k4, (B, 3, 3, IMG, IMG), jnp.float32)   # (B, 3 aux, C, H, W)

    logits, emissions, prompt_guids = forward_jit(
        params, input_ids, attention_mask, token_type_ids, NER_labels,
        images, aux_imgs, seq_input_ids, seq_token_type_ids, seq_attention_mask,
        use_prompt=True)
    jax.block_until_ready((logits, emissions, prompt_guids))

    assert logits.shape == (B, S)
    assert emissions.shape == (B, S, NUM_LABELS)
    assert len(prompt_guids) == N_LAYERS
    assert prompt_guids[0][0].shape == (B, N_HEADS, S_SEQ + P, HEAD_DIM)
    print("KERNEL_OK")
</pallas_src>

<mosaic_0001>
module attributes {stable_mosaic.version = 11 : i64} {
  func.func @_attn_fc_kernel(%arg0: i32, %arg1: memref<1x80x64xf32, #tpu.memory_space<vmem>>, %arg2: memref<1x80x1xf32, #tpu.memory_space<vmem>>, %arg3: memref<64x64xbf16, #tpu.memory_space<vmem>>, %arg4: memref<1x64xf32, #tpu.memory_space<vmem>>, %arg5: memref<1x64xf32, #tpu.memory_space<vmem>>, %arg6: memref<64x128xbf16, #tpu.memory_space<vmem>>, %arg7: memref<1x128xf32, #tpu.memory_space<vmem>>, %arg8: memref<1x80x128xf32, #tpu.memory_space<vmem>>) attributes {dimension_semantics = [#tpu.dimension_semantics<parallel>], iteration_bounds = array<i64: 2>, scalar_prefetch = 0 : i64, scratch_operands = 0 : i64, tpu.core_type = #tpu.core_type<tc>, window_params = [{transform_indices = @transform_0, window_bounds = array<i64: 1, 80, 64>}, {transform_indices = @transform_1, window_bounds = array<i64: 1, 80, 1>}, {pipeline_mode = #tpu.pipeline_mode<synchronous>, transform_indices = @transform_2, window_bounds = array<i64: 64, 64>}, {pipeline_mode = #tpu.pipeline_mode<synchronous>, transform_indices = @transform_3, window_bounds = array<i64: 1, 64>}, {pipeline_mode = #tpu.pipeline_mode<synchronous>, transform_indices = @transform_4, window_bounds = array<i64: 1, 64>}, {pipeline_mode = #tpu.pipeline_mode<synchronous>, transform_indices = @transform_5, window_bounds = array<i64: 64, 128>}, {pipeline_mode = #tpu.pipeline_mode<synchronous>, transform_indices = @transform_6, window_bounds = array<i64: 1, 128>}, {transform_indices = @transform_7, window_bounds = array<i64: 1, 80, 128>}]} {
    %c0 = arith.constant 0 : index
    %c0_0 = arith.constant 0 : index
    %c0_1 = arith.constant 0 : index
    %0 = vector.load %arg1[%c0, %c0_0, %c0_1] : memref<1x80x64xf32, #tpu.memory_space<vmem>>, vector<1x80x64xf32>
    %1 = vector.shape_cast %0 : vector<1x80x64xf32> to vector<80x64xf32>
    %c0_2 = arith.constant 0 : index
    %c0_3 = arith.constant 0 : index
    %c0_4 = arith.constant 0 : index
    %2 = vector.load %arg2[%c0_2, %c0_3, %c0_4] : memref<1x80x1xf32, #tpu.memory_space<vmem>>, vector<1x80x1xf32>
    %3 = vector.shape_cast %2 : vector<1x80x1xf32> to vector<80x1xf32>
    %4 = vector.broadcast %3 : vector<80x1xf32> to vector<80x64xf32>
    %5 = arith.mulf %1, %4 : vector<80x64xf32>
    %cst = arith.constant 9.99999971E-10 : f32
    %6 = vector.broadcast %cst : f32 to vector<80x64xf32>
    %7 = arith.addf %5, %6 : vector<80x64xf32>
    %8 = arith.truncf %7 : vector<80x64xf32> to vector<80x64xbf16>
    %c0_5 = arith.constant 0 : index
    %c0_6 = arith.constant 0 : index
    %9 = vector.load %arg3[%c0_5, %c0_6] : memref<64x64xbf16, #tpu.memory_space<vmem>>, vector<64x64xbf16>
    %cst_7 = arith.constant dense<0.000000e+00> : vector<80x64xf32>
    %10 = tpu.matmul %8, %9, %cst_7 {dimension_numbers = #tpu.dot_dimension_numbers<[1], [0], [0], [1], [0, 0, 1, 1], [], []>} : vector<80x64xbf16>, vector<64x64xbf16>, vector<80x64xf32> -> vector<80x64xf32>
    %c0_8 = arith.constant 0 : index
    %c0_9 = arith.constant 0 : index
    %11 = vector.load %arg4[%c0_8, %c0_9] : memref<1x64xf32, #tpu.memory_space<vmem>>, vector<1x64xf32>
    %12 = vector.broadcast %11 : vector<1x64xf32> to vector<80x64xf32>
    %13 = arith.addf %10, %12 : vector<80x64xf32>
    %14 = math.tanh %13 : vector<80x64xf32>
    %c0_10 = arith.constant 0 : index
    %c0_11 = arith.constant 0 : index
    %15 = vector.load %arg5[%c0_10, %c0_11] : memref<1x64xf32, #tpu.memory_space<vmem>>, vector<1x64xf32>
    %16 = vector.broadcast %15 : vector<1x64xf32> to vector<80x64xf32>
    %17 = arith.mulf %14, %16 : vector<80x64xf32>
    %cst_12 = arith.constant dense<0.000000e+00> : vector<80xf32>
    %18 = vector.multi_reduction <add>, %17, %cst_12 [1] : vector<80x64xf32> to vector<80xf32>
    %19 = vector.shape_cast %18 : vector<80xf32> to vector<80x1xf32>
    %cst_13 = arith.constant 0.000000e+00 : f32
    %20 = vector.broadcast %cst_13 : f32 to vector<80x1xf32>
    %21 = arith.subf %20, %19 : vector<80x1xf32>
    %22 = math.exp %21 : vector<80x1xf32>
    %cst_14 = arith.constant 1.000000e+00 : f32
    %23 = vector.broadcast %cst_14 : f32 to vector<80x1xf32>
    %24 = arith.addf %23, %22 : vector<80x1xf32>
    %cst_15 = arith.constant 1.000000e+00 : f32
    %25 = vector.broadcast %cst_15 : f32 to vector<80x1xf32>
    %26 = arith.divf %25, %24 : vector<80x1xf32>
    %27 = vector.broadcast %26 : vector<80x1xf32> to vector<80x64xf32>
    %28 = arith.mulf %1, %27 : vector<80x64xf32>
    %29 = arith.truncf %28 : vector<80x64xf32> to vector<80x64xbf16>
    %c0_16 = arith.constant 0 : index
    %c0_17 = arith.constant 0 : index
    %30 = vector.load %arg6[%c0_16, %c0_17] : memref<64x128xbf16, #tpu.memory_space<vmem>>, vector<64x128xbf16>
    %cst_18 = arith.constant dense<0.000000e+00> : vector<80x128xf32>
    %31 = tpu.matmul %29, %30, %cst_18 {dimension_numbers = #tpu.dot_dimension_numbers<[1], [0], [0], [1], [0, 0, 1, 1], [], []>} : vector<80x64xbf16>, vector<64x128xbf16>, vector<80x128xf32> -> vector<80x128xf32>
    %c0_19 = arith.constant 0 : index
    %c0_20 = arith.constant 0 : index
    %32 = vector.load %arg7[%c0_19, %c0_20] : memref<1x128xf32, #tpu.memory_space<vmem>>, vector<1x128xf32>
    %33 = vector.broadcast %32 : vector<1x128xf32> to vector<80x128xf32>
    %34 = arith.addf %31, %33 : vector<80x128xf32>
    %c0_21 = arith.constant 0 : index
    %c0_22 = arith.constant 0 : index
    %c0_23 = arith.constant 0 : index
    %35 = vector.load %arg8[%c0_21, %c0_22, %c0_23] : memref<1x80x128xf32, #tpu.memory_space<vmem>>, vector<1x80x128xf32>
    %36 = vector.shape_cast %35 : vector<1x80x128xf32> to vector<80x128xf32>
    %37 = vector.shape_cast %34 : vector<80x128xf32> to vector<1x80x128xf32>
    tpu.vector_store %arg8[%c0_21, %c0_22, %c0_23], %37 {strides = array<i32>} : memref<1x80x128xf32, #tpu.memory_space<vmem>>, vector<1x80x128xf32>,
    return
  }
  func.func @transform_0(%arg0: i32) -> (i32, i32, i32) {
    %c0_i32 = arith.constant 0 : i32
    %c0_i32_0 = arith.constant 0 : i32
    %c0_i32_1 = arith.constant 0 : i32
    return %arg0, %c0_i32, %c0_i32_0 : i32, i32, i32
  }
  func.func @transform_1(%arg0: i32) -> (i32, i32, i32) {
    %c0_i32 = arith.constant 0 : i32
    %c0_i32_0 = arith.constant 0 : i32
    %c0_i32_1 = arith.constant 0 : i32
    return %arg0, %c0_i32, %c0_i32_0 : i32, i32, i32
  }
  func.func @transform_2(%arg0: i32) -> (i32, i32) {
    %c0_i32 = arith.constant 0 : i32
    %c0_i32_0 = arith.constant 0 : i32
    %c0_i32_1 = arith.constant 0 : i32
    return %c0_i32, %c0_i32_0 : i32, i32
  }
  func.func @transform_3(%arg0: i32) -> (i32, i32) {
    %c0_i32 = arith.constant 0 : i32
    %c0_i32_0 = arith.constant 0 : i32
    %c0_i32_1 = arith.constant 0 : i32
    return %c0_i32, %c0_i32_0 : i32, i32
  }
  func.func @transform_4(%arg0: i32) -> (i32, i32) {
    %c0_i32 = arith.constant 0 : i32
    %c0_i32_0 = arith.constant 0 : i32
    %c0_i32_1 = arith.constant 0 : i32
    return %c0_i32, %c0_i32_0 : i32, i32
  }
  func.func @transform_5(%arg0: i32) -> (i32, i32) {
    %c0_i32 = arith.constant 0 : i32
    %c0_i32_0 = arith.constant 0 : i32
    %c0_i32_1 = arith.constant 0 : i32
    return %c0_i32, %c0_i32_0 : i32, i32
  }
  func.func @transform_6(%arg0: i32) -> (i32, i32) {
    %c0_i32 = arith.constant 0 : i32
    %c0_i32_0 = arith.constant 0 : i32
    %c0_i32_1 = arith.constant 0 : i32
    return %c0_i32, %c0_i32_0 : i32, i32
  }
  func.func @transform_7(%arg0: i32) -> (i32, i32, i32) {
    %c0_i32 = arith.constant 0 : i32
    %c0_i32_0 = arith.constant 0 : i32
    %c0_i32_1 = arith.constant 0 : i32
    return %arg0, %c0_i32, %c0_i32_0 : i32, i32, i32
  }
}

module attributes {stable_mosaic.version = 11 : i64} {
  func.func @_prompt_kernel(%arg0: i32, %arg1: memref<2x32x128xf32, #tpu.memory_space<vmem>>, %arg2: memref<6x2x16x256xbf16, #tpu.memory_space<vmem>>, %arg3: memref<6x256x128xbf16, #tpu.memory_space<vmem>>, %arg4: memref<6x1x128xf32, #tpu.memory_space<vmem>>, %arg5: memref<6x2x48x128xf32, #tpu.memory_space<vmem>>) attributes {dimension_semantics = [#tpu.dimension_semantics<parallel>], iteration_bounds = array<i64: 2>, scalar_prefetch = 0 : i64, scratch_operands = 0 : i64, tpu.core_type = #tpu.core_type<tc>, window_params = [{pipeline_mode = #tpu.pipeline_mode<synchronous>, transform_indices = @transform_0, window_bounds = array<i64: 2, 32, 128>}, {transform_indices = @transform_1, window_bounds = array<i64: 6, 2, 16, 256>}, {transform_indices = @transform_2, window_bounds = array<i64: 6, 256, 128>}, {transform_indices = @transform_3, window_bounds = array<i64: 6, 1, 128>}, {transform_indices = @transform_4, window_bounds = array<i64: 6, 2, 48, 128>}]} {
    %c0 = arith.constant 0 : index
    %c0_0 = arith.constant 0 : index
    %c0_1 = arith.constant 0 : index
    %0 = vector.load %arg1[%c0, %c0_0, %c0_1] : memref<2x32x128xf32, #tpu.memory_space<vmem>>, vector<2x32x128xf32>
    %c0_2 = arith.constant 0 : index
    %c0_3 = arith.constant 0 : index
    %c0_4 = arith.constant 0 : index
    %c0_5 = arith.constant 0 : index
    %1 = vector.load %arg5[%c0_2, %c0_3, %c0_4, %c0_5] : memref<6x2x48x128xf32, #tpu.memory_space<vmem>>, vector<1x2x32x128xf32>
    %2 = vector.shape_cast %1 : vector<1x2x32x128xf32> to vector<2x32x128xf32>
    %3 = vector.shape_cast %0 : vector<2x32x128xf32> to vector<1x2x32x128xf32>
    tpu.vector_store %arg5[%c0_2, %c0_3, %c0_4, %c0_5], %3 {strides = array<i32>} : memref<6x2x48x128xf32, #tpu.memory_space<vmem>>, vector<1x2x32x128xf32>,
    %c0_6 = arith.constant 0 : index
    %c0_7 = arith.constant 0 : index
    %c0_8 = arith.constant 0 : index
    %c0_9 = arith.constant 0 : index
    %4 = vector.load %arg2[%c0_6, %c0_7, %c0_8, %c0_9] : memref<6x2x16x256xbf16, #tpu.memory_space<vmem>>, vector<1x2x16x256xbf16>
    %5 = vector.shape_cast %4 : vector<1x2x16x256xbf16> to vector<2x16x256xbf16>
    %6 = vector.shape_cast %5 : vector<2x16x256xbf16> to vector<32x256xbf16>
    %c0_10 = arith.constant 0 : index
    %c0_11 = arith.constant 0 : index
    %c0_12 = arith.constant 0 : index
    %7 = vector.load %arg3[%c0_10, %c0_11, %c0_12] : memref<6x256x128xbf16, #tpu.memory_space<vmem>>, vector<1x256x128xbf16>
    %8 = vector.shape_cast %7 : vector<1x256x128xbf16> to vector<256x128xbf16>
    %cst = arith.constant dense<0.000000e+00> : vector<32x128xf32>
    %9 = tpu.matmul %6, %8, %cst {dimension_numbers = #tpu.dot_dimension_numbers<[1], [0], [0], [1], [0, 0, 1, 1], [], []>} : vector<32x256xbf16>, vector<256x128xbf16>, vector<32x128xf32> -> vector<32x128xf32>
    %10 = vector.shape_cast %9 : vector<32x128xf32> to vector<2x16x128xf32>
    %c0_13 = arith.constant 0 : index
    %c0_14 = arith.constant 0 : index
    %c0_15 = arith.constant 0 : index
    %11 = vector.load %arg4[%c0_13, %c0_14, %c0_15] : memref<6x1x128xf32, #tpu.memory_space<vmem>>, vector<1x1x128xf32>
    %12 = vector.shape_cast %11 : vector<1x1x128xf32> to vector<1x128xf32>
    %13 = vector.shape_cast %12 : vector<1x128xf32> to vector<1x1x128xf32>
    %14 = vector.broadcast %13 : vector<1x1x128xf32> to vector<2x16x128xf32>
    %15 = arith.addf %10, %14 : vector<2x16x128xf32>
    %cst_16 = arith.constant 0.00999999977 : f32
    %16 = vector.broadcast %cst_16 : f32 to vector<2x16x128xf32>
    %17 = arith.mulf %16, %15 : vector<2x16x128xf32>
    %18 = arith.maximumf %15, %17 : vector<2x16x128xf32>
    %cst_17 = arith.constant dense<0xFF800000> : vector<16x128xf32>
    %19 = vector.multi_reduction <maximumf>, %18, %cst_17 [0] : vector<2x16x128xf32> to vector<16x128xf32>
    %20 = vector.shape_cast %19 : vector<16x128xf32> to vector<1x16x128xf32>
    %21 = vector.broadcast %20 : vector<1x16x128xf32> to vector<2x16x128xf32>
    %22 = arith.subf %18, %21 : vector<2x16x128xf32>
    %23 = math.exp %22 : vector<2x16x128xf32>
    %cst_18 = arith.constant dense<0.000000e+00> : vector<16x128xf32>
    %24 = vector.multi_reduction <add>, %23, %cst_18 [0] : vector<2x16x128xf32> to vector<16x128xf32>
    %25 = vector.shape_cast %24 : vector<16x128xf32> to vector<1x16x128xf32>
    %26 = vector.broadcast %25 : vector<1x16x128xf32> to vector<2x16x128xf32>
    %27 = arith.divf %23, %26 : vector<2x16x128xf32>
    %c0_19 = arith.constant 0 : index
    %c0_20 = arith.constant 0 : index
    %c32 = arith.constant 32 : index
    %c0_21 = arith.constant 0 : index
    %28 = vector.load %arg5[%c0_19, %c0_20, %c32, %c0_21] : memref<6x2x48x128xf32, #tpu.memory_space<vmem>>, vector<1x2x16x128xf32>
    %29 = vector.shape_cast %28 : vector<1x2x16x128xf32> to vector<2x16x128xf32>
    %30 = vector.shape_cast %27 : vector<2x16x128xf32> to vector<1x2x16x128xf32>
    tpu.vector_store %arg5[%c0_19, %c0_20, %c32, %c0_21], %30 {strides = array<i32>} : memref<6x2x48x128xf32, #tpu.memory_space<vmem>>, vector<1x2x16x128xf32>,
    %c1 = arith.constant 1 : index
    %c0_22 = arith.constant 0 : index
    %c0_23 = arith.constant 0 : index
    %c0_24 = arith.constant 0 : index
    %31 = vector.load %arg5[%c1, %c0_22, %c0_23, %c0_24] : memref<6x2x48x128xf32, #tpu.memory_space<vmem>>, vector<1x2x32x128xf32>
    %32 = vector.shape_cast %31 : vector<1x2x32x128xf32> to vector<2x32x128xf32>
    %33 = vector.shape_cast %0 : vector<2x32x128xf32> to vector<1x2x32x128xf32>
    tpu.vector_store %arg5[%c1, %c0_22, %c0_23, %c0_24], %33 {strides = array<i32>} : memref<6x2x48x128xf32, #tpu.memory_space<vmem>>, vector<1x2x32x128xf32>,
    %c1_25 = arith.constant 1 : index
    %c0_26 = arith.constant 0 : index
    %c0_27 = arith.constant 0 : index
    %c0_28 = arith.constant 0 : index
    %34 = vector.load %arg2[%c1_25, %c0_26, %c0_27, %c0_28] : memref<6x2x16x256xbf16, #tpu.memory_space<vmem>>, vector<1x2x16x256xbf16>
    %35 = vector.shape_cast %34 : vector<1x2x16x256xbf16> to vector<2x16x256xbf16>
    %36 = vector.shape_cast %35 : vector<2x16x256xbf16> to vector<32x256xbf16>
    %c1_29 = arith.constant 1 : index
    %c0_30 = arith.constant 0 : index
    %c0_31 = arith.constant 0 : index
    %37 = vector.load %arg3[%c1_29, %c0_30, %c0_31] : memref<6x256x128xbf16, #tpu.memory_space<vmem>>, vector<1x256x128xbf16>
    %38 = vector.shape_cast %37 : vector<1x256x128xbf16> to vector<256x128xbf16>
    %cst_32 = arith.constant dense<0.000000e+00> : vector<32x128xf32>
    %39 = tpu.matmul %36, %38, %cst_32 {dimension_numbers = #tpu.dot_dimension_numbers<[1], [0], [0], [1], [0, 0, 1, 1], [], []>} : vector<32x256xbf16>, vector<256x128xbf16>, vector<32x128xf32> -> vector<32x128xf32>
    %40 = vector.shape_cast %39 : vector<32x128xf32> to vector<2x16x128xf32>
    %c1_33 = arith.constant 1 : index
    %c0_34 = arith.constant 0 : index
    %c0_35 = arith.constant 0 : index
    %41 = vector.load %arg4[%c1_33, %c0_34, %c0_35] : memref<6x1x128xf32, #tpu.memory_space<vmem>>, vector<1x1x128xf32>
    %42 = vector.shape_cast %41 : vector<1x1x128xf32> to vector<1x128xf32>
    %43 = vector.shape_cast %42 : vector<1x128xf32> to vector<1x1x128xf32>
    %44 = vector.broadcast %43 : vector<1x1x128xf32> to vector<2x16x128xf32>
    %45 = arith.addf %40, %44 : vector<2x16x128xf32>
    %cst_36 = arith.constant 0.00999999977 : f32
    %46 = vector.broadcast %cst_36 : f32 to vector<2x16x128xf32>
    %47 = arith.mulf %46, %45 : vector<2x16x128xf32>
    %48 = arith.maximumf %45, %47 : vector<2x16x128xf32>
    %cst_37 = arith.constant dense<0xFF800000> : vector<16x128xf32>
    %49 = vector.multi_reduction <maximumf>, %48, %cst_37 [0] : vector<2x16x128xf32> to vector<16x128xf32>
    %50 = vector.shape_cast %49 : vector<16x128xf32> to vector<1x16x128xf32>
    %51 = vector.broadcast %50 : vector<1x16x128xf32> to vector<2x16x128xf32>
    %52 = arith.subf %48, %51 : vector<2x16x128xf32>
    %53 = math.exp %52 : vector<2x16x128xf32>
    %cst_38 = arith.constant dense<0.000000e+00> : vector<16x128xf32>
    %54 = vector.multi_reduction <add>, %53, %cst_38 [0] : vector<2x16x128xf32> to vector<16x128xf32>
    %55 = vector.shape_cast %54 : vector<16x128xf32> to vector<1x16x128xf32>
    %56 = vector.broadcast %55 : vector<1x16x128xf32> to vector<2x16x128xf32>
    %57 = arith.divf %53, %56 : vector<2x16x128xf32>
    %c1_39 = arith.constant 1 : index
    %c0_40 = arith.constant 0 : index
    %c32_41 = arith.constant 32 : index
    %c0_42 = arith.constant 0 : index
    %58 = vector.load %arg5[%c1_39, %c0_40, %c32_41, %c0_42] : memref<6x2x48x128xf32, #tpu.memory_space<vmem>>, vector<1x2x16x128xf32>
    %59 = vector.shape_cast %58 : vector<1x2x16x128xf32> to vector<2x16x128xf32>
    %60 = vector.shape_cast %57 : vector<2x16x128xf32> to vector<1x2x16x128xf32>
    tpu.vector_store %arg5[%c1_39, %c0_40, %c32_41, %c0_42], %60 {strides = array<i32>} : memref<6x2x48x128xf32, #tpu.memory_space<vmem>>, vector<1x2x16x128xf32>,
    %c2 = arith.constant 2 : index
    %c0_43 = arith.constant 0 : index
    %c0_44 = arith.constant 0 : index
    %c0_45 = arith.constant 0 : index
    %61 = vector.load %arg5[%c2, %c0_43, %c0_44, %c0_45] : memref<6x2x48x128xf32, #tpu.memory_space<vmem>>, vector<1x2x32x128xf32>
    %62 = vector.shape_cast %61 : vector<1x2x32x128xf32> to vector<2x32x128xf32>
    %63 = vector.shape_cast %0 : vector<2x32x128xf32> to vector<1x2x32x128xf32>
    tpu.vector_store %arg5[%c2, %c0_43, %c0_44, %c0_45], %63 {strides = array<i32>} : memref<6x2x48x128xf32, #tpu.memory_space<vmem>>, vector<1x2x32x128xf32>,
    %c2_46 = arith.constant 2 : index
    %c0_47 = arith.constant 0 : index
    %c0_48 = arith.constant 0 : index
    %c0_49 = arith.constant 0 : index
    %64 = vector.load %arg2[%c2_46, %c0_47, %c0_48, %c0_49] : memref<6x2x16x256xbf16, #tpu.memory_space<vmem>>, vector<1x2x16x256xbf16>
    %65 = vector.shape_cast %64 : vector<1x2x16x256xbf16> to vector<2x16x256xbf16>
    %66 = vector.shape_cast %65 : vector<2x16x256xbf16> to vector<32x256xbf16>
    %c2_50 = arith.constant 2 : index
    %c0_51 = arith.constant 0 : index
    %c0_52 = arith.constant 0 : index
    %67 = vector.load %arg3[%c2_50, %c0_51, %c0_52] : memref<6x256x128xbf16, #tpu.memory_space<vmem>>, vector<1x256x128xbf16>
    %68 = vector.shape_cast %67 : vector<1x256x128xbf16> to vector<256x128xbf16>
    %cst_53 = arith.constant dense<0.000000e+00> : vector<32x128xf32>
    %69 = tpu.matmul %66, %68, %cst_53 {dimension_numbers = #tpu.dot_dimension_numbers<[1], [0], [0], [1], [0, 0, 1, 1], [], []>} : vector<32x256xbf16>, vector<256x128xbf16>, vector<32x128xf32> -> vector<32x128xf32>
    %70 = vector.shape_cast %69 : vector<32x128xf32> to vector<2x16x128xf32>
    %c2_54 = arith.constant 2 : index
    %c0_55 = arith.constant 0 : index
    %c0_56 = arith.constant 0 : index
    %71 = vector.load %arg4[%c2_54, %c0_55, %c0_56] : memref<6x1x128xf32, #tpu.memory_space<vmem>>, vector<1x1x128xf32>
    %72 = vector.shape_cast %71 : vector<1x1x128xf32> to vector<1x128xf32>
    %73 = vector.shape_cast %72 : vector<1x128xf32> to vector<1x1x128xf32>
    %74 = vector.broadcast %73 : vector<1x1x128xf32> to vector<2x16x128xf32>
    %75 = arith.addf %70, %74 : vector<2x16x128xf32>
    %cst_57 = arith.constant 0.00999999977 : f32
    %76 = vector.broadcast %cst_57 : f32 to vector<2x16x128xf32>
    %77 = arith.mulf %76, %75 : vector<2x16x128xf32>
    %78 = arith.maximumf %75, %77 : vector<2x16x128xf32>
    %cst_58 = arith.constant dense<0xFF800000> : vector<16x128xf32>
    %79 = vector.multi_reduction <maximumf>, %78, %cst_58 [0] : vector<2x16x128xf32> to vector<16x128xf32>
    %80 = vector.shape_cast %79 : vector<16x128xf32> to vector<1x16x128xf32>
    %81 = vector.broadcast %80 : vector<1x16x128xf32> to vector<2x16x128xf32>
    %82 = arith.subf %78, %81 : vector<2x16x128xf32>
    %83 = math.exp %82 : vector<2x16x128xf32>
    %cst_59 = arith.constant dense<0.000000e+00> : vector<16x128xf32>
    %84 = vector.multi_reduction <add>, %83, %cst_59 [0] : vector<2x16x128xf32> to vector<16x128xf32>
    %85 = vector.shape_cast %84 : vector<16x128xf32> to vector<1x16x128xf32>
    %86 = vector.broadcast %85 : vector<1x16x128xf32> to vector<2x16x128xf32>
    %87 = arith.divf %83, %86 : vector<2x16x128xf32>
    %c2_60 = arith.constant 2 : index
    %c0_61 = arith.constant 0 : index
    %c32_62 = arith.constant 32 : index
    %c0_63 = arith.constant 0 : index
    %88 = vector.load %arg5[%c2_60, %c0_61, %c32_62, %c0_63] : memref<6x2x48x128xf32, #tpu.memory_space<vmem>>, vector<1x2x16x128xf32>
    %89 = vector.shape_cast %88 : vector<1x2x16x128xf32> to vector<2x16x128xf32>
    %90 = vector.shape_cast %87 : vector<2x16x128xf32> to vector<1x2x16x128xf32>
    tpu.vector_store %arg5[%c2_60, %c0_61, %c32_62, %c0_63], %90 {strides = array<i32>} : memref<6x2x48x128xf32, #tpu.memory_space<vmem>>, vector<1x2x16x128xf32>,
    %c3 = arith.constant 3 : index
    %c0_64 = arith.constant 0 : index
    %c0_65 = arith.constant 0 : index
    %c0_66 = arith.constant 0 : index
    %91 = vector.load %arg5[%c3, %c0_64, %c0_65, %c0_66] : memref<6x2x48x128xf32, #tpu.memory_space<vmem>>, vector<1x2x32x128xf32>
    %92 = vector.shape_cast %91 : vector<1x2x32x128xf32> to vector<2x32x128xf32>
    %93 = vector.shape_cast %0 : vector<2x32x128xf32> to vector<1x2x32x128xf32>
    tpu.vector_store %arg5[%c3, %c0_64, %c0_65, %c0_66], %93 {strides = array<i32>} : memref<6x2x48x128xf32, #tpu.memory_space<vmem>>, vector<1x2x32x128xf32>,
    %c3_67 = arith.constant 3 : index
    %c0_68 = arith.constant 0 : index
    %c0_69 = arith.constant 0 : index
    %c0_70 = arith.constant 0 : index
    %94 = vector.load %arg2[%c3_67, %c0_68, %c0_69, %c0_70] : memref<6x2x16x256xbf16, #tpu.memory_space<vmem>>, vector<1x2x16x256xbf16>
    %95 = vector.shape_cast %94 : vector<1x2x16x256xbf16> to vector<2x16x256xbf16>
    %96 = vector.shape_cast %95 : vector<2x16x256xbf16> to vector<32x256xbf16>
    %c3_71 = arith.constant 3 : index
    %c0_72 = arith.constant 0 : index
    %c0_73 = arith.constant 0 : index
    %97 = vector.load %arg3[%c3_71, %c0_72, %c0_73] : memref<6x256x128xbf16, #tpu.memory_space<vmem>>, vector<1x256x128xbf16>
    %98 = vector.shape_cast %97 : vector<1x256x128xbf16> to vector<256x128xbf16>
    %cst_74 = arith.constant dense<0.000000e+00> : vector<32x128xf32>
    %99 = tpu.matmul %96, %98, %cst_74 {dimension_numbers = #tpu.dot_dimension_numbers<[1], [0], [0], [1], [0, 0, 1, 1], [], []>} : vector<32x256xbf16>, vector<256x128xbf16>, vector<32x128xf32> -> vector<32x128xf32>
    %100 = vector.shape_cast %99 : vector<32x128xf32> to vector<2x16x128xf32>
    %c3_75 = arith.constant 3 : index
    %c0_76 = arith.constant 0 : index
    %c0_77 = arith.constant 0 : index
    %101 = vector.load %arg4[%c3_75, %c0_76, %c0_77] : memref<6x1x128xf32, #tpu.memory_space<vmem>>, vector<1x1x128xf32>
    %102 = vector.shape_cast %101 : vector<1x1x128xf32> to vector<1x128xf32>
    %103 = vector.shape_cast %102 : vector<1x128xf32> to vector<1x1x128xf32>
    %104 = vector.broadcast %103 : vector<1x1x128xf32> to vector<2x16x128xf32>
    %105 = arith.addf %100, %104 : vector<2x16x128xf32>
    %cst_78 = arith.constant 0.00999999977 : f32
    %106 = vector.broadcast %cst_78 : f32 to vector<2x16x128xf32>
    %107 = arith.mulf %106, %105 : vector<2x16x128xf32>
    %108 = arith.maximumf %105, %107 : vector<2x16x128xf32>
    %cst_79 = arith.constant dense<0xFF800000> : vector<16x128xf32>
    %109 = vector.multi_reduction <maximumf>, %108, %cst_79 [0] : vector<2x16x128xf32> to vector<16x128xf32>
    %110 = vector.shape_cast %109 : vector<16x128xf32> to vector<1x16x128xf32>
    %111 = vector.broadcast %110 : vector<1x16x128xf32> to vector<2x16x128xf32>
    %112 = arith.subf %108, %111 : vector<2x16x128xf32>
    %113 = math.exp %112 : vector<2x16x128xf32>
    %cst_80 = arith.constant dense<0.000000e+00> : vector<16x128xf32>
    %114 = vector.multi_reduction <add>, %113, %cst_80 [0] : vector<2x16x128xf32> to vector<16x128xf32>
    %115 = vector.shape_cast %114 : vector<16x128xf32> to vector<1x16x128xf32>
    %116 = vector.broadcast %115 : vector<1x16x128xf32> to vector<2x16x128xf32>
    %117 = arith.divf %113, %116 : vector<2x16x128xf32>
    %c3_81 = arith.constant 3 : index
    %c0_82 = arith.constant 0 : index
    %c32_83 = arith.constant 32 : index
    %c0_84 = arith.constant 0 : index
    %118 = vector.load %arg5[%c3_81, %c0_82, %c32_83, %c0_84] : memref<6x2x48x128xf32, #tpu.memory_space<vmem>>, vector<1x2x16x128xf32>
    %119 = vector.shape_cast %118 : vector<1x2x16x128xf32> to vector<2x16x128xf32>
    %120 = vector.shape_cast %117 : vector<2x16x128xf32> to vector<1x2x16x128xf32>
    tpu.vector_store %arg5[%c3_81, %c0_82, %c32_83, %c0_84], %120 {strides = array<i32>} : memref<6x2x48x128xf32, #tpu.memory_space<vmem>>, vector<1x2x16x128xf32>,
    %c4 = arith.constant 4 : index
    %c0_85 = arith.constant 0 : index
    %c0_86 = arith.constant 0 : index
    %c0_87 = arith.constant 0 : index
    %121 = vector.load %arg5[%c4, %c0_85, %c0_86, %c0_87] : memref<6x2x48x128xf32, #tpu.memory_space<vmem>>, vector<1x2x32x128xf32>
    %122 = vector.shape_cast %121 : vector<1x2x32x128xf32> to vector<2x32x128xf32>
    %123 = vector.shape_cast %0 : vector<2x32x128xf32> to vector<1x2x32x128xf32>
    tpu.vector_store %arg5[%c4, %c0_85, %c0_86, %c0_87], %123 {strides = array<i32>} : memref<6x2x48x128xf32, #tpu.memory_space<vmem>>, vector<1x2x32x128xf32>,
    %c4_88 = arith.constant 4 : index
    %c0_89 = arith.constant 0 : index
    %c0_90 = arith.constant 0 : index
    %c0_91 = arith.constant 0 : index
    %124 = vector.load %arg2[%c4_88, %c0_89, %c0_90, %c0_91] : memref<6x2x16x256xbf16, #tpu.memory_space<vmem>>, vector<1x2x16x256xbf16>
    %125 = vector.shape_cast %124 : vector<1x2x16x256xbf16> to vector<2x16x256xbf16>
    %126 = vector.shape_cast %125 : vector<2x16x256xbf16> to vector<32x256xbf16>
    %c4_92 = arith.constant 4 : index
    %c0_93 = arith.constant 0 : index
    %c0_94 = arith.constant 0 : index
    %127 = vector.load %arg3[%c4_92, %c0_93, %c0_94] : memref<6x256x128xbf16, #tpu.memory_space<vmem>>, vector<1x256x128xbf16>
    %128 = vector.shape_cast %127 : vector<1x256x128xbf16> to vector<256x128xbf16>
    %cst_95 = arith.constant dense<0.000000e+00> : vector<32x128xf32>
    %129 = tpu.matmul %126, %128, %cst_95 {dimension_numbers = #tpu.dot_dimension_numbers<[1], [0], [0], [1], [0, 0, 1, 1], [], []>} : vector<32x256xbf16>, vector<256x128xbf16>, vector<32x128xf32> -> vector<32x128xf32>
    %130 = vector.shape_cast %129 : vector<32x128xf32> to vector<2x16x128xf32>
    %c4_96 = arith.constant 4 : index
    %c0_97 = arith.constant 0 : index
    %c0_98 = arith.constant 0 : index
    %131 = vector.load %arg4[%c4_96, %c0_97, %c0_98] : memref<6x1x128xf32, #tpu.memory_space<vmem>>, vector<1x1x128xf32>
    %132 = vector.shape_cast %131 : vector<1x1x128xf32> to vector<1x128xf32>
    %133 = vector.shape_cast %132 : vector<1x128xf32> to vector<1x1x128xf32>
    %134 = vector.broadcast %133 : vector<1x1x128xf32> to vector<2x16x128xf32>
    %135 = arith.addf %130, %134 : vector<2x16x128xf32>
    %cst_99 = arith.constant 0.00999999977 : f32
    %136 = vector.broadcast %cst_99 : f32 to vector<2x16x128xf32>
    %137 = arith.mulf %136, %135 : vector<2x16x128xf32>
    %138 = arith.maximumf %135, %137 : vector<2x16x128xf32>
    %cst_100 = arith.constant dense<0xFF800000> : vector<16x128xf32>
    %139 = vector.multi_reduction <maximumf>, %138, %cst_100 [0] : vector<2x16x128xf32> to vector<16x128xf32>
    %140 = vector.shape_cast %139 : vector<16x128xf32> to vector<1x16x128xf32>
    %141 = vector.broadcast %140 : vector<1x16x128xf32> to vector<2x16x128xf32>
    %142 = arith.subf %138, %141 : vector<2x16x128xf32>
    %143 = math.exp %142 : vector<2x16x128xf32>
    %cst_101 = arith.constant dense<0.000000e+00> : vector<16x128xf32>
    %144 = vector.multi_reduction <add>, %143, %cst_101 [0] : vector<2x16x128xf32> to vector<16x128xf32>
    %145 = vector.shape_cast %144 : vector<16x128xf32> to vector<1x16x128xf32>
    %146 = vector.broadcast %145 : vector<1x16x128xf32> to vector<2x16x128xf32>
    %147 = arith.divf %143, %146 : vector<2x16x128xf32>
    %c4_102 = arith.constant 4 : index
    %c0_103 = arith.constant 0 : index
    %c32_104 = arith.constant 32 : index
    %c0_105 = arith.constant 0 : index
    %148 = vector.load %arg5[%c4_102, %c0_103, %c32_104, %c0_105] : memref<6x2x48x128xf32, #tpu.memory_space<vmem>>, vector<1x2x16x128xf32>
    %149 = vector.shape_cast %148 : vector<1x2x16x128xf32> to vector<2x16x128xf32>
    %150 = vector.shape_cast %147 : vector<2x16x128xf32> to vector<1x2x16x128xf32>
    tpu.vector_store %arg5[%c4_102, %c0_103, %c32_104, %c0_105], %150 {strides = array<i32>} : memref<6x2x48x128xf32, #tpu.memory_space<vmem>>, vector<1x2x16x128xf32>,
    %c5 = arith.constant 5 : index
    %c0_106 = arith.constant 0 : index
    %c0_107 = arith.constant 0 : index
    %c0_108 = arith.constant 0 : index
    %151 = vector.load %arg5[%c5, %c0_106, %c0_107, %c0_108] : memref<6x2x48x128xf32, #tpu.memory_space<vmem>>, vector<1x2x32x128xf32>
    %152 = vector.shape_cast %151 : vector<1x2x32x128xf32> to vector<2x32x128xf32>
    %153 = vector.shape_cast %0 : vector<2x32x128xf32> to vector<1x2x32x128xf32>
    tpu.vector_store %arg5[%c5, %c0_106, %c0_107, %c0_108], %153 {strides = array<i32>} : memref<6x2x48x128xf32, #tpu.memory_space<vmem>>, vector<1x2x32x128xf32>,
    %c5_109 = arith.constant 5 : index
    %c0_110 = arith.constant 0 : index
    %c0_111 = arith.constant 0 : index
    %c0_112 = arith.constant 0 : index
    %154 = vector.load %arg2[%c5_109, %c0_110, %c0_111, %c0_112] : memref<6x2x16x256xbf16, #tpu.memory_space<vmem>>, vector<1x2x16x256xbf16>
    %155 = vector.shape_cast %154 : vector<1x2x16x256xbf16> to vector<2x16x256xbf16>
    %156 = vector.shape_cast %155 : vector<2x16x256xbf16> to vector<32x256xbf16>
    %c5_113 = arith.constant 5 : index
    %c0_114 = arith.constant 0 : index
    %c0_115 = arith.constant 0 : index
    %157 = vector.load %arg3[%c5_113, %c0_114, %c0_115] : memref<6x256x128xbf16, #tpu.memory_space<vmem>>, vector<1x256x128xbf16>
    %158 = vector.shape_cast %157 : vector<1x256x128xbf16> to vector<256x128xbf16>
    %cst_116 = arith.constant dense<0.000000e+00> : vector<32x128xf32>
    %159 = tpu.matmul %156, %158, %cst_116 {dimension_numbers = #tpu.dot_dimension_numbers<[1], [0], [0], [1], [0, 0, 1, 1], [], []>} : vector<32x256xbf16>, vector<256x128xbf16>, vector<32x128xf32> -> vector<32x128xf32>
    %160 = vector.shape_cast %159 : vector<32x128xf32> to vector<2x16x128xf32>
    %c5_117 = arith.constant 5 : index
    %c0_118 = arith.constant 0 : index
    %c0_119 = arith.constant 0 : index
    %161 = vector.load %arg4[%c5_117, %c0_118, %c0_119] : memref<6x1x128xf32, #tpu.memory_space<vmem>>, vector<1x1x128xf32>
    %162 = vector.shape_cast %161 : vector<1x1x128xf32> to vector<1x128xf32>
    %163 = vector.shape_cast %162 : vector<1x128xf32> to vector<1x1x128xf32>
    %164 = vector.broadcast %163 : vector<1x1x128xf32> to vector<2x16x128xf32>
    %165 = arith.addf %160, %164 : vector<2x16x128xf32>
    %cst_120 = arith.constant 0.00999999977 : f32
    %166 = vector.broadcast %cst_120 : f32 to vector<2x16x128xf32>
    %167 = arith.mulf %166, %165 : vector<2x16x128xf32>
    %168 = arith.maximumf %165, %167 : vector<2x16x128xf32>
    %cst_121 = arith.constant dense<0xFF800000> : vector<16x128xf32>
    %169 = vector.multi_reduction <maximumf>, %168, %cst_121 [0] : vector<2x16x128xf32> to vector<16x128xf32>
    %170 = vector.shape_cast %169 : vector<16x128xf32> to vector<1x16x128xf32>
    %171 = vector.broadcast %170 : vector<1x16x128xf32> to vector<2x16x128xf32>
    %172 = arith.subf %168, %171 : vector<2x16x128xf32>
    %173 = math.exp %172 : vector<2x16x128xf32>
    %cst_122 = arith.constant dense<0.000000e+00> : vector<16x128xf32>
    %174 = vector.multi_reduction <add>, %173, %cst_122 [0] : vector<2x16x128xf32> to vector<16x128xf32>
    %175 = vector.shape_cast %174 : vector<16x128xf32> to vector<1x16x128xf32>
    %176 = vector.broadcast %175 : vector<1x16x128xf32> to vector<2x16x128xf32>
    %177 = arith.divf %173, %176 : vector<2x16x128xf32>
    %c5_123 = arith.constant 5 : index
    %c0_124 = arith.constant 0 : index
    %c32_125 = arith.constant 32 : index
    %c0_126 = arith.constant 0 : index
    %178 = vector.load %arg5[%c5_123, %c0_124, %c32_125, %c0_126] : memref<6x2x48x128xf32, #tpu.memory_space<vmem>>, vector<1x2x16x128xf32>
    %179 = vector.shape_cast %178 : vector<1x2x16x128xf32> to vector<2x16x128xf32>
    %180 = vector.shape_cast %177 : vector<2x16x128xf32> to vector<1x2x16x128xf32>
    tpu.vector_store %arg5[%c5_123, %c0_124, %c32_125, %c0_126], %180 {strides = array<i32>} : memref<6x2x48x128xf32, #tpu.memory_space<vmem>>, vector<1x2x16x128xf32>,
    return
  }
  func.func @transform_0(%arg0: i32) -> (i32, i32, i32) {
    %c0_i32 = arith.constant 0 : i32
    %c0_i32_0 = arith.constant 0 : i32
    %c0_i32_1 = arith.constant 0 : i32
    %c0_i32_2 = arith.constant 0 : i32
    return %c0_i32, %c0_i32_0, %c0_i32_1 : i32, i32, i32
  }
  func.func @transform_1(%arg0: i32) -> (i32, i32, i32, i32) {
    %c0_i32 = arith.constant 0 : i32
    %c0_i32_0 = arith.constant 0 : i32
    %c0_i32_1 = arith.constant 0 : i32
    %c0_i32_2 = arith.constant 0 : i32
    return %arg0, %c0_i32, %c0_i32_0, %c0_i32_1 : i32, i32, i32, i32
  }
  func.func @transform_2(%arg0: i32) -> (i32, i32, i32) {
    %c0_i32 = arith.constant 0 : i32
    %c0_i32_0 = arith.constant 0 : i32
    %c0_i32_1 = arith.constant 0 : i32
    return %arg0, %c0_i32, %c0_i32_0 : i32, i32, i32
  }
  func.func @transform_3(%arg0: i32) -> (i32, i32, i32) {
    %c0_i32 = arith.constant 0 : i32
    %c0_i32_0 = arith.constant 0 : i32
    %c0_i32_1 = arith.constant 0 : i32
    return %arg0, %c0_i32, %c0_i32_0 : i32, i32, i32
  }
  func.func @transform_4(%arg0: i32) -> (i32, i32, i32, i32) {
    %c0_i32 = arith.constant 0 : i32
    %c0_i32_0 = arith.constant 0 : i32
    %c0_i32_1 = arith.constant 0 : i32
    %c0_i32_2 = arith.constant 0 : i32
    return %arg0, %c0_i32, %c0_i32_0, %c0_i32_1 : i32, i32, i32, i32
  }
}

</mosaic_0001>

<bundles_post_ra>
// kernel: custom-call.50
= control target key start
LH: loop header
LB: loop body
LE: loop exit
PB: predicated region body
PF: predicated region fallthrough
CT: control target
= control target key end

     0   :  { %s6_s0 = inlined_call_operand.vmem [shape: s32[9,8,2,8], index: 0, kind: output, shape index: {}]  }

// kernel: squeeze.80
= control target key start
LH: loop header
LB: loop body
LE: loop exit
PB: predicated region body
PF: predicated region fallthrough
CT: control target
= control target key end

     0   :  { %s228_s18 = smov 12  ;;  %s268_s19 = smov 3  ;;  %vm202_vm0 = vcmask 1043458   ;;  %vm207_vm1 = vcmask 1045508   ;;  %vm212_vm2 = vcmask 1047558   ;;  %vm184_vm3 = vcmask 1047556   ;;  %s705_s0 = inlined_call_operand.vmem [shape: bf16[1,2,3,16,16], index: 0, kind: input, shape index: {}]   ;;  %s706_s1 = inlined_call_operand.vmem [shape: bf16[2,768], index: 1, kind: output, shape index: {}]  }
   0x1   :  { %v579_v0 = vld [vmem:[%s705_s0 + $0x28] sm:$0xff]   ;;  %v582_v1 = vld [vmem:[%s705_s0 + $0x10] sm:$0xff]   ;;  %v580_v2 = vld [vmem:[%s705_s0 + $0x20] sm:$0xff]   ;;  %s225_s20 = smov 3  ;;  %s626_s21 = smov 3  ;;  %vm186_vm4 = vcmask 130048  }
   0x2   :  { %v557_v3 = vunpack.c.l.bf16 %v579_v0  ;;  %v558_v4 = vunpack.c.h.bf16 %v579_v0  ;;  %v570_v5 = vunpack.c.h.bf16 %v582_v1  ;;  %v569_v6 = vunpack.c.l.bf16 %v582_v1  ;;  %v581_v7 = vld [vmem:[%s705_s0 + $0x18] sm:$0xff]   ;;  %v583_v10 = vld [vmem:[%s705_s0 + $0x8] sm:$0xff]   ;;  %v576_v13 = vld [vmem:[%s705_s0] sm:$0xff]   ;;  %s271_s0 = smov 12  ;;  %s243_s22 = smov 12 }
   0x3   :  { %v562_v8 = vunpack.c.h.bf16 %v580_v2  ;;  %v561_v9 = vunpack.c.l.bf16 %v580_v2  ;;  %v566_v11 = vunpack.c.h.bf16 %v581_v7  ;;  %v565_v12 = vunpack.c.l.bf16 %v581_v7  ;;  %s248_s23 = smov 48  ;;  %s253_s24 = smov 192 }
   0x4   :  { %18 = vst [vmem:[#allocation1 + $0x58] sm:$0xff] %v558_v4  ;;  %v574_v14 = vunpack.c.h.bf16 %v583_v10  ;;  %v573_v15 = vunpack.c.l.bf16 %v583_v10  ;;  %v578_v16 = vunpack.c.h.bf16 %v576_v13  ;;  %v577_v17 = vunpack.c.l.bf16 %v576_v13  ;;  %s197_s25 = smov 3  ;;  %s591_s26 = smov 96  }
   0x5   :  { %33 = vst [vmem:[#allocation1 + $0x50] sm:$0xff] %v557_v3  ;;  %s592_s27 = smov 112   ;;  %s200_s28 = smov 12  ;;  %vm216_vm5 = vcmask 1048448   ;;  %vm259_vm6 = vcmask 917248   ;;  %vm302_vm7 = vcmask 786048  }
   0x6   :  { %108 = vst [vmem:[#allocation1 + $0x28] sm:$0xff] %v570_v5  ;;  %s205_s29 = smov 48  ;;  %s210_s30 = smov 192  ;;  %vm345_vm8 = vcmask 654848   ;;  %vm388_vm9 = vcmask 523648   ;;  %vm431_vm10 = vcmask 392448  }
   0x7   :  { %123 = vst [vmem:[#allocation1 + $0x20] sm:$0xff] %v569_v6  ;;  %s326_s2 = smov 3  ;;  %s329_s3 = smov 12  ;;  %vm474_vm11 = vcmask 261248  }
   0x8   :  { %48 = vst [vmem:[#allocation1 + $0x48] sm:$0xff] %v562_v8  ;;  %s334_s4 = smov 48  ;;  %s311_s5 = smov 3 }
   0x9   :  { %63 = vst [vmem:[#allocation1 + $0x40] sm:$0xff] %v561_v9  ;;  %s314_s6 = smov 12  ;;  %s354_s7 = smov 3 }
   0xa   :  { %78 = vst [vmem:[#allocation1 + $0x38] sm:$0xff] %v566_v11  ;;  %s357_s8 = smov 12  ;;  %s339_s9 = smov 192 }
   0xb   :  { %93 = vst [vmem:[#allocation1 + $0x30] sm:$0xff] %v565_v12  ;;  %s412_s10 = smov 3  ;;  %s415_s11 = smov 12 }
   0xc   :  { %138 = vst [vmem:[#allocation1 + $0x18] sm:$0xff] %v574_v14  ;;  %s593_s12 = smov 80   ;;  %s283_s13 = smov 3 }
   0xd   :  { %v272_v18 = vld [vmem:[#allocation1 - $0x32] ss:$48 sm:%s271_s0]   ;;  %v229_v19 = vld [vmem:[#allocation1 - $0x31] ss:$48 sm:%s228_s18]   ;;  %153 = vst [vmem:[#allocation1 + $0x10] sm:$0xff] %v573_v15  ;;  %s286_s14 = smov 12 }
   0xe   :  { %v269_v20 = vld [vmem:[#allocation1 + $0x26] ss:$48 sm:%s268_s19]   ;;  %v226_v21 = vld [vmem:[#allocation1 + $0x27] ss:$48 sm:%s225_s20]   ;;  %168 = vst [vmem:[#allocation1 + $0x8] sm:$0xff] %v578_v16  ;;  %s291_s15 = smov 48 }
   0xf   :  { %v274_v22 = vsel %vm202_vm0, %v272_v18, %v269_v20  ;;  %v231_v23 = vsel %vm202_vm0, %v229_v19, %v226_v21  ;;  %181 = vst [vmem:[#allocation1] sm:$0xff] %v577_v17  ;;  %v312_v36 = vld [vmem:[#allocation1 + $0x25] ss:$48 sm:%s311_s5]   ;;  %v315_v39 = vld [vmem:[#allocation1 - $0x33] ss:$48 sm:%s314_s6]   ;;  %s296_s16 = smov 192 }
  0x10   :  { %275 = vrot.lane.b32.xlu1 %v274_v22, %s591_s26  ;;  %232 = vrot.lane.b32.xlu0 %v231_v23, %s592_s27  ;;  %v355_v44 = vld [vmem:[#allocation1 + $0x24] ss:$48 sm:%s354_s7]   ;;  %v317_v45 = vsel %vm202_vm0, %v315_v39, %v312_v36  ;;  %v358_v46 = vld [vmem:[#allocation1 - $0x34] ss:$48 sm:%s357_s8]   ;;  %s369_s17 = smov 3  ;;  %s372_s0 = smov 12 }
  0x11   :  { %318 = vrot.lane.b32.xlu2 %v317_v45, %s593_s12  ;;  %s420_s18 = smov 48  ;;  %v360_v57 = vsel %vm202_vm0, %v358_v46, %v355_v44  ;;  %s377_s19 = smov 48 }
  0x12   :  { %s425_s20 = smov 192  ;;  %s443_s5 = smov 12 }
  0x13   :  { %v254_v25 = vld [vmem:[#allocation1 - $0x102] ss:$48 sm:%s253_s24]   ;;  %v211_v27 = vld [vmem:[#allocation1 - $0x101] ss:$48 sm:%s210_s30]   ;;  %v340_v47 = vld [vmem:[#allocation1 - $0x104] ss:$48 sm:%s339_s9]  }
  0x14   :  { %v249_v24 = vld [vmem:[#allocation1 - $0xaa] ss:$48 sm:%s248_s23]   ;;  %v206_v26 = vld [vmem:[#allocation1 - $0xa9] ss:$48 sm:%s205_s29]   ;;  %v335_v43 = vld [vmem:[#allocation1 - $0xac] ss:$48 sm:%s334_s4]  }
  0x15   :  { %v244_v28 = vld [vmem:[#allocation1 - $0x52] ss:$48 sm:%s243_s22]   ;;  %v201_v29 = vld [vmem:[#allocation1 - $0x51] ss:$48 sm:%s200_s28]   ;;  %v330_v30 = vld [vmem:[#allocation1 - $0x54] ss:$48 sm:%s329_s3]  }
  0x16   :  { %v241_v31 = vld [vmem:[#allocation1 + $0x6] ss:$48 sm:%s626_s21]   ;;  %v198_v32 = vld [vmem:[#allocation1 + $0x7] ss:$48 sm:%s197_s25]   ;;  %v327_v33 = vld [vmem:[#allocation1 + $0x4] ss:$48 sm:%s326_s2]  }
  0x17   :  { %v246_v34 = vsel %vm202_vm0, %v244_v28, %v241_v31  ;;  %v203_v35 = vsel %vm202_vm0, %v201_v29, %v198_v32  ;;  %v332_v42 = vsel %vm202_vm0, %v330_v30, %v327_v33  ;;  %v284_v49 = vld [vmem:[#allocation1 + $0x5] ss:$48 sm:%s283_s13]   ;;  %v287_v50 = vld [vmem:[#allocation1 - $0x53] ss:$48 sm:%s286_s14]   ;;  %v413_v54 = vld [vmem:[#allocation1 + $0x2] ss:$48 sm:%s412_s10]  }
  0x18   :  { %v251_v37 = vsel %vm207_vm1, %v249_v24, %v246_v34  ;;  %v208_v38 = vsel %vm207_vm1, %v206_v26, %v203_v35  ;;  %v337_v48 = vsel %vm207_vm1, %v335_v43, %v332_v42  ;;  %v289_v51 = vsel %vm202_vm0, %v287_v50, %v284_v49  ;;  %v292_v52 = vld [vmem:[#allocation1 - $0xab] ss:$48 sm:%s291_s15]   ;;  %v297_v53 = vld [vmem:[#allocation1 - $0x103] ss:$48 sm:%s296_s16]   ;;  %v416_v55 = vld [vmem:[#allocation1 - $0x56] ss:$48 sm:%s415_s11]  }
  0x19   :  { %v256_v40 = vsel %vm212_vm2, %v254_v25, %v251_v37  ;;  %v213_v41 = vsel %vm212_vm2, %v211_v27, %v208_v38  ;;  %v294_v56 = vsel %vm207_vm1, %v292_v52, %v289_v51  ;;  %v342_v58 = vsel %vm212_vm2, %v340_v47, %v337_v48  ;;  %v370_v59 = vld [vmem:[#allocation1 + $0x3] ss:$48 sm:%s369_s17]   ;;  %v373_v60 = vld [vmem:[#allocation1 - $0x55] ss:$48 sm:%s372_s0]   ;;  %v421_v63 = vld [vmem:[#allocation1 - $0xae] ss:$48 sm:%s420_s18]  }
  0x1a   :  { %257 = vrot.lane.b32.xlu1 %v256_v40, %s591_s26  ;;  %214 = vrot.lane.b32.xlu0 %v213_v41, %s592_s27  ;;  %v299_v61 = vsel %vm212_vm2, %v297_v53, %v294_v56  ;;  %v418_v62 = vsel %vm202_vm0, %v416_v55, %v413_v54  ;;  %s397_s21 = smov 3  ;;  %s400_s22 = smov 12  ;;  %v375_v0 = vsel %vm202_vm0, %v373_v60, %v370_v59  ;;  %v378_v1 = vld [vmem:[#allocation1 - $0xad] ss:$48 sm:%s377_s19]   ;;  %v426_v3 = vld [vmem:[#allocation1 - $0x106] ss:$48 sm:%s425_s20]  }
  0x1b   :  { %s594_s23 = smov 64   ;;  %s382_s24 = smov 192  ;;  %300 = vrot.lane.b32.xlu2 %v299_v61, %s593_s12  ;;  %v423_v2 = vsel %vm207_vm1, %v421_v63, %v418_v62  ;;  %v398_v4 = vld [vmem:[#allocation1 + $0x23] ss:$48 sm:%s397_s21]   ;;  %v401_v5 = vld [vmem:[#allocation1 - $0x35] ss:$48 sm:%s400_s22]   ;;  %v380_v6 = vsel %vm207_vm1, %v378_v1, %v375_v0 }
  0x1c   :  { %s455_s25 = smov 3  ;;  %s458_s26 = smov 12  ;;  %v383_v7 = vld [vmem:[#allocation1 - $0x105] ss:$48 sm:%s382_s24]   ;;  %v428_v10 = vsel %vm212_vm2, %v426_v3, %v423_v2  ;;  %v403_v11 = vsel %vm202_vm0, %v401_v5, %v398_v4  ;;  %v444_v20 = vld [vmem:[#allocation1 - $0x36] ss:$48 sm:%s443_s5]  }
  0x1d   :  { %v456_v8 = vld [vmem:[#allocation1 + $0x1] ss:$48 sm:%s455_s25]   ;;  %v459_v9 = vld [vmem:[#allocation1 - $0x57] ss:$48 sm:%s458_s26]   ;;  %s463_s27 = smov 48  ;;  %s483_s28 = smov 3  ;;  %v385_v12 = vsel %vm212_vm2, %v383_v7, %v380_v6 }
  0x1e   :  { %s486_s29 = smov 12  ;;  %v461_v13 = vsel %vm202_vm0, %v459_v9, %v456_v8  ;;  %v464_v14 = vld [vmem:[#allocation1 - $0xaf] ss:$48 sm:%s463_s27]   ;;  %s468_s30 = smov 192 }
  0x1f   :  { %s595_s2 = smov 32   ;;  %s596_s3 = smov 48   ;;  %v484_v15 = vld [vmem:[#allocation1 + $0x21] ss:$48 sm:%s483_s28]   ;;  %v487_v16 = vld [vmem:[#allocation1 - $0x37] ss:$48 sm:%s486_s29]   ;;  %v466_v17 = vsel %vm207_vm1, %v464_v14, %v461_v13 }
  0x20   :  { %s440_s4 = smov 3  ;;  %v469_v18 = vld [vmem:[#allocation1 - $0x107] ss:$48 sm:%s468_s30]   ;;  %v489_v21 = vsel %vm202_vm0, %v487_v16, %v484_v15  ;;  %s597_s6 = smov 16  }
  0x21   :  { %v441_v19 = vld [vmem:[#allocation1 + $0x22] ss:$48 sm:%s440_s4]   ;;  %v471_v22 = vsel %vm212_vm2, %v469_v18, %v466_v17  ;;  %v182_v24 = vld [vmem:[#allocation1] ss:$8 sm:$0xf]  }
  0x22   :  { %361 = vrot.lane.b32.xlu1 %v360_v57, %s594_s23  ;;  %343 = vrot.lane.b32.xlu0 %v342_v58, %s594_s23  ;;  %v446_v23 = vsel %vm202_vm0, %v444_v20, %v441_v19  ;;  %v183_v25 = vld [vmem:[#allocation1] ss:$8 sm:$0xf0]  }
  0x23   :  { %386 = vrot.lane.b32.xlu2 %v385_v12, %s596_s3  ;;  %v192_v26 = vld [vmem:[#allocation1 + $0x40] ss:$8 sm:$0xf]   ;;  %v185_v27 = vsel %vm184_vm3, %v183_v25, %v182_v24 }
  0x24   :  { %195 = vst.msk [vmem:[#allocation0 + $0x11] ss:$8 sm:$0xf] %vm186_vm4, %v192_v26  }
  0x25   :  { %188 = vst.msk [vmem:[#allocation0] ss:$8 sm:$0x30] %vm186_vm4, %v185_v27  }
  0x26   :  { %187 = vst.msk [vmem:[#allocation0] ss:$8 sm:$0xf] %vm186_vm4, %v185_v27  }
  0x27   :  { %190 = vst.msk [vmem:[#allocation0 - $0x2f] ss:$8 sm:$0xc0] %vm186_vm4, %v185_v27  }
  0x2a   :  { %429 = vrot.lane.b32.xlu1 %v428_v10, %s595_s2  ;;  %404 = vrot.lane.b32.xlu0 %v403_v11, %s596_s3 }
  0x2b   :  { %447 = vrot.lane.b32.xlu2 %v446_v23, %s595_s2 }
  0x32   :  { %490 = vrot.lane.b32.xlu1 %v489_v21, %s597_s6  ;;  %472 = vrot.lane.b32.xlu0 %v471_v22, %s597_s6 }
  0x6b   :  { %v319_v28 = vpop.permute.xlu2 %318  }
  0x75   :  { %v301_v29 = vpop.permute.xlu2 %300  }
  0x7d   :  { %v387_v32 = vpop.permute.xlu2 %386  }
  0x82   :  { %v276_v30 = vpop.permute.xlu1 %275   ;;  %v233_v31 = vpop.permute.xlu0 %232  }
  0x83   :  { %236 = vst.msk [vmem:[#allocation0 + $0x20] sm:$0x3] %vm216_vm5, %v233_v31  }
  0x84   :  { %238 = vst.msk [vmem:[#allocation0 + $0x26] sm:$0xc] %vm216_vm5, %v233_v31  }
  0x85   :  { %279 = vst.msk [vmem:[#allocation0 + $0x20] sm:$0x3] %vm259_vm6, %v276_v30   ;;  %v448_v35 = vpop.permute.xlu2 %447  }
  0x86   :  { %281 = vst.msk [vmem:[#allocation0 + $0x26] sm:$0xc] %vm259_vm6, %v276_v30  }
  0x87   :  { %322 = vst.msk [vmem:[#allocation0 + $0x20] sm:$0x3] %vm302_vm7, %v319_v28  }
  0x88   :  { %324 = vst.msk [vmem:[#allocation0 + $0x26] sm:$0xc] %vm302_vm7, %v319_v28  }
  0x8c   :  { %v258_v33 = vpop.permute.xlu1 %257   ;;  %v215_v34 = vpop.permute.xlu0 %214  }
  0x8d   :  { %217 = vst.msk [vmem:[#allocation0] sm:$0x3] %vm216_vm5, %v215_v34  }
  0x8e   :  { %219 = vst.msk [vmem:[#allocation0 + $0x6] sm:$0xc] %vm216_vm5, %v215_v34  }
  0x8f   :  { %221 = vst.msk [vmem:[#allocation0 + $0xc] sm:$0x30] %vm216_vm5, %v215_v34  }
  0x90   :  { %223 = vst.msk [vmem:[#allocation0 + $0x12] sm:$0xc0] %vm216_vm5, %v215_v34  }
  0x91   :  { %260 = vst.msk [vmem:[#allocation0] sm:$0x3] %vm259_vm6, %v258_v33  }
  0x92   :  { %262 = vst.msk [vmem:[#allocation0 + $0x6] sm:$0xc] %vm259_vm6, %v258_v33  }
  0x93   :  { %264 = vst.msk [vmem:[#allocation0 + $0xc] sm:$0x30] %vm259_vm6, %v258_v33  }
  0x94   :  { %266 = vst.msk [vmem:[#allocation0 + $0x12] sm:$0xc0] %vm259_vm6, %v258_v33   ;;  %v362_v36 = vpop.permute.xlu1 %361   ;;  %v344_v37 = vpop.permute.xlu0 %343  }
  0x95   :  { %303 = vst.msk [vmem:[#allocation0] sm:$0x3] %vm302_vm7, %v301_v29  }
  0x96   :  { %305 = vst.msk [vmem:[#allocation0 + $0x6] sm:$0xc] %vm302_vm7, %v301_v29  }
  0x97   :  { %307 = vst.msk [vmem:[#allocation0 + $0xc] sm:$0x30] %vm302_vm7, %v301_v29  }
  0x98   :  { %309 = vst.msk [vmem:[#allocation0 + $0x12] sm:$0xc0] %vm302_vm7, %v301_v29  }
  0x99   :  { %365 = vst.msk [vmem:[#allocation0 + $0x20] sm:$0x3] %vm345_vm8, %v362_v36  }
  0x9a   :  { %367 = vst.msk [vmem:[#allocation0 + $0x26] sm:$0xc] %vm345_vm8, %v362_v36  }
  0x9b   :  { %346 = vst.msk [vmem:[#allocation0] sm:$0x3] %vm345_vm8, %v344_v37  }
  0x9c   :  { %348 = vst.msk [vmem:[#allocation0 + $0x6] sm:$0xc] %vm345_vm8, %v344_v37   ;;  %v430_v38 = vpop.permute.xlu1 %429   ;;  %v405_v39 = vpop.permute.xlu0 %404  }
  0x9d   :  { %350 = vst.msk [vmem:[#allocation0 + $0xc] sm:$0x30] %vm345_vm8, %v344_v37  }
  0x9e   :  { %352 = vst.msk [vmem:[#allocation0 + $0x12] sm:$0xc0] %vm345_vm8, %v344_v37  }
  0x9f   :  { %389 = vst.msk [vmem:[#allocation0] sm:$0x3] %vm388_vm9, %v387_v32  }
  0xa0   :  { %391 = vst.msk [vmem:[#allocation0 + $0x6] sm:$0xc] %vm388_vm9, %v387_v32  }
  0xa1   :  { %393 = vst.msk [vmem:[#allocation0 + $0xc] sm:$0x30] %vm388_vm9, %v387_v32  }
  0xa2   :  { %395 = vst.msk [vmem:[#allocation0 + $0x12] sm:$0xc0] %vm388_vm9, %v387_v32  }
  0xa3   :  { %432 = vst.msk [vmem:[#allocation0] sm:$0x3] %vm431_vm10, %v430_v38  }
  0xa4   :  { %434 = vst.msk [vmem:[#allocation0 + $0x6] sm:$0xc] %vm431_vm10, %v430_v38   ;;  %v491_v40 = vpop.permute.xlu1 %490   ;;  %v473_v41 = vpop.permute.xlu0 %472  }
  0xa5   :  { %436 = vst.msk [vmem:[#allocation0 + $0xc] sm:$0x30] %vm431_vm10, %v430_v38  }
  0xa6   :  { %438 = vst.msk [vmem:[#allocation0 + $0x12] sm:$0xc0] %vm431_vm10, %v430_v38  }
  0xa7   :  { %408 = vst.msk [vmem:[#allocation0 + $0x20] sm:$0x3] %vm388_vm9, %v405_v39  }
  0xa8   :  { %410 = vst.msk [vmem:[#allocation0 + $0x26] sm:$0xc] %vm388_vm9, %v405_v39  }
  0xa9   :  { %451 = vst.msk [vmem:[#allocation0 + $0x20] sm:$0x3] %vm431_vm10, %v448_v35  }
  0xaa   :  { %453 = vst.msk [vmem:[#allocation0 + $0x26] sm:$0xc] %vm431_vm10, %v448_v35  }
  0xab   :  { %494 = vst.msk [vmem:[#allocation0 + $0x20] sm:$0x3] %vm474_vm11, %v491_v40  }
  0xac   :  { %496 = vst.msk [vmem:[#allocation0 + $0x26] sm:$0xc] %vm474_vm11, %v491_v40  }
  0xad   :  { %475 = vst.msk [vmem:[#allocation0] sm:$0x3] %vm474_vm11, %v473_v41  }
  0xae   :  { %477 = vst.msk [vmem:[#allocation0 + $0x6] sm:$0xc] %vm474_vm11, %v473_v41  }
  0xaf   :  { %479 = vst.msk [vmem:[#allocation0 + $0xc] sm:$0x30] %vm474_vm11, %v473_v41  }
  0xb0   :  { %481 = vst.msk [vmem:[#allocation0 + $0x12] sm:$0xc0] %vm474_vm11, %v473_v41  }
  0xb2   :  { %v526_v42 = vld [vmem:[#allocation0 + $0x20] sm:$0x3] }
  0xb3   :  { %v527_v43 = vpack.c.bf16 0.0, %v526_v42  ;;  %v533_v44 = vld [vmem:[#allocation0 + $0x28] sm:$0x3] }
  0xb4   :  { %v534_v45 = vpack.c.bf16 0.0, %v533_v44  ;;  %v499_v46 = vld [vmem:[#allocation0] sm:$0x3] }
  0xb5   :  { %553 = vst [vmem:[%s706_s1 + $0x4] sm:$0x1] %v527_v43  ;;  %v500_v47 = vpack.c.bf16 0.0, %v499_v46  ;;  %v505_v48 = vld [vmem:[#allocation0 + $0x8] sm:$0x3] }
  0xb6   :  { %554 = vst [vmem:[%s706_s1 + $0x5] sm:$0x1] %v534_v45  ;;  %v506_v49 = vpack.c.bf16 0.0, %v505_v48  ;;  %v512_v50 = vld [vmem:[#allocation0 + $0x10] sm:$0x3] }
  0xb7   :  { %503 = vst [vmem:[%s706_s1] sm:$0x1] %v500_v47  ;;  %v513_v51 = vpack.c.bf16 0.0, %v512_v50  ;;  %v519_v52 = vld [vmem:[#allocation0 + $0x18] sm:$0x3] }
  0xb8   :  { %550 = vst [vmem:[%s706_s1 + $0x1] sm:$0x1] %v506_v49  ;;  %v520_v53 = vpack.c.bf16 0.0, %v519_v52 }
  0xb9   :  { %551 = vst [vmem:[%s706_s1 + $0x2] sm:$0x1] %v513_v51 }
  0xba   :  { %552 = vst [vmem:[%s706_s1 + $0x3] sm:$0x1] %v520_v53 }

// kernel: me_model_forward.3
= control target key start
LH: loop header
LB: loop body
LE: loop exit
PB: predicated region body
PF: predicated region fallthrough
CT: control target
= control target key end

     0   :  { %s1095_s24 = smov 0   ;;  %s1382_s0 = inlined_call_operand.vmem [shape: f32[2,80,64], index: 0, kind: input, shape index: {}]   ;;  %s1383_s1 = inlined_call_operand.vmem [shape: f32[2,80,1], index: 1, kind: input, shape index: {}]   ;;  %s1384_s2 = inlined_call_operand.vmem [shape: bf16[64,64], index: 2, kind: input, shape index: {}]   ;;  %s1385_s3 = inlined_call_operand.vmem [shape: f32[1,64], index: 3, kind: input, shape index: {}]   ;;  %s1386_s4 = inlined_call_operand.vmem [shape: f32[1,64], index: 4, kind: input, shape index: {}]   ;;  %s1387_s5 = inlined_call_operand.vmem [shape: bf16[64,128], index: 5, kind: input, shape index: {}]   ;;  %s1388_s6 = inlined_call_operand.vmem [shape: f32[1,128], index: 6, kind: input, shape index: {}]   ;;  %s1389_s7 = inlined_call_operand.vmem [shape: f32[2,80,128], index: 7, kind: output, shape index: {}]  }
   0x1 LB: > { %s902_s25 = sadd.s32 4294967295, %s1052_s24   ;;  %p906_p0 = scmp.ge.s32.totalorder %s1052_s24, 1  ;;  %s1052_s24 = sphi %s1095_s24, %s17_s24  }
   0x2   : > { %p247_p1 = scmp.lt.s32.totalorder %s1052_s24, 3 }
   0x4   : > { %p248_p2 = pnand %p906_p0, %p247_p1 }
   0x5   : > { %p284_p3 = scmp.lt.s32.totalorder (!%p248_p2), %s902_s25, 1 }
   0x6   : > { %251 = sbr.rel (%p248_p2) target bundleno = 610 (0x262), region = 48 }
   0xb   : > { %v957_v0 = vld [vmem:[%s1384_s2 + $0x18] sm:$0xff]  ;;  %v1054_v1 = vmov 0   ;;  %s1407_s25 = smov (!%p284_p3, %s902_s25), 1  ;;  %v956_v12 = vld [vmem:[%s1384_s2 + $0x10] sm:$0xff]  ;;  %v955_v13 = vld [vmem:[%s1384_s2 + $0x8] sm:$0xff]  ;;  %vm431_vm0 = vcmask 523264  }
   0xc   : > { %981 = vset.pattern.permute.xlu1 %v1054_v1  ;;  %980 = vset.pattern.permute.xlu0 %v1054_v1  ;;  %s1106_s28 = smul.u32 80, %s1407_s25  ;;  %v954_v14 = vld [vmem:[%s1384_s2] sm:$0xff] }
   0xd   : > { %982 = vset.pattern.permute.xlu2 %v1054_v1  ;;  %451 = vmatpush.bf16.msra.mxu0 %v957_v0  ;;  %v983_v60 = vld [vmem:[%s1385_s3] ss:$0 sm:$0xff] }
   0xe   : > { %962 = vmatpush.bf16.msra.mxu2 %v957_v0  ;;  %s293_s8 = scalar_lea.vmem %s1383_s1, %s1106_s28  ;;  %s1125_s17 = scalar_lea.vmem %s1382_s0, %s1106_s28  ;;  %v1178_v0 = vld [vmem:[%s1386_s4] ss:$0 sm:$0xff] }
   0xf   : > { %v316_v2 = vld [vmem:[%s293_s8 + $0x30] sm:$0xff]  ;;  %v310_v3 = vld [vmem:[%s293_s8] sm:$0xff]  ;;  %v317_v5 = vld [vmem:[%s293_s8 + $0x38] sm:$0xff]  ;;  %s298_s13 = scalar_lea.vmem %s1389_s7, %s1106_s28 }
  0x10   : > { %352 = vperm.xlu1 %981, %v316_v2   ;;  %322 = vperm.xlu0 %980, %v310_v3   ;;  %v312_v4 = vld [vmem:[%s293_s8 + $0x10] sm:$0xff]  ;;  %v311_v6 = vld [vmem:[%s293_s8 + $0x8] sm:$0xff]  ;;  %v313_v7 = vld [vmem:[%s293_s8 + $0x18] sm:$0xff] }
  0x11   : > { %332 = vperm.xlu2 %982, %v312_v4   ;;  %v319_v8 = vld [vmem:[%s293_s8 + $0x48] sm:$0xff]  ;;  %v318_v9 = vld [vmem:[%s293_s8 + $0x40] sm:$0xff]  ;;  %452 = vmatpush.bf16.msra.mxu0 %v956_v12  ;;  %v1128_v17 = vld [vmem:[%s1125_s17 + $0x30] sm:$0xff] }
  0x12   : > { %v314_v10 = vld [vmem:[%s293_s8 + $0x20] sm:$0xff]  ;;  %v315_v11 = vld [vmem:[%s293_s8 + $0x28] sm:$0xff]  ;;  %963 = vmatpush.bf16.msra.mxu2 %v956_v12  ;;  %v1135_v20 = vld [vmem:[%s1125_s17 + $0x38] sm:$0xff] }
  0x13   : > { %v1131_v18 = vld [vmem:[%s1125_s17] sm:$0xff]  ;;  %v1138_v21 = vld [vmem:[%s1125_s17 + $0x8] sm:$0xff]  ;;  %v1146_v34 = vld [vmem:[%s1125_s17 + $0x10] sm:$0xff] }
  0x14   : > { %v1149_v35 = vld [vmem:[%s1125_s17 + $0x18] sm:$0xff]  ;;  %v1152_v37 = vld [vmem:[%s1125_s17 + $0x48] sm:$0xff]  ;;  %v1155_v39 = vld [vmem:[%s1125_s17 + $0x40] sm:$0xff] }
  0x15   : > { %453 = vmatpush.bf16.msra.mxu0 %v955_v13  ;;  %v1164_v52 = vld [vmem:[%s1125_s17 + $0x28] sm:$0xff]  ;;  %v1167_v54 = vld [vmem:[%s1125_s17 + $0x20] sm:$0xff] }
  0x16   : > { %964 = vmatpush.bf16.msra.mxu2 %v955_v13 }
  0x18   : > { %357 = vperm.xlu1 %981, %v317_v5   ;;  %327 = vperm.xlu0 %980, %v311_v6  }
  0x19   : > { %337 = vperm.xlu2 %982, %v313_v7   ;;  %454 = vmatpush.bf16.msra.mxu0 %v954_v14 }
  0x1a   : > { %965 = vmatpush.bf16.msra.mxu2 %v954_v14 }
  0x20   : > { %367 = vperm.xlu1 %981, %v319_v8   ;;  %362 = vperm.xlu0 %980, %v318_v9  }
  0x21   : > { %342 = vperm.xlu2 %982, %v314_v10  }
  0x28   : > { %347 = vperm.xlu0 %980, %v315_v11  }
  0x6b   : > { %v333_v28 = vpop.permute.xlu2 %332 }
  0x6c   : > { %v372_v40 = vmul.f32 %v333_v28, %v1146_v34 }
  0x6e   : > { %v382_v45 = vadd.f32 1e-09, %v372_v40 }
  0x73   : > { %v338_v41 = vpop.permute.xlu2 %337 }
  0x74   : > { %v373_v42 = vmul.f32 %v338_v41, %v1149_v35 }
  0x76   : > { %v383_v46 = vadd.f32 1e-09, %v373_v42 }
  0x78   : > { %v391_v49 = vpack.c.bf16 %v383_v46, %v382_v45 }
  0x7b   : > { %v343_v53 = vpop.permute.xlu2 %342 }
  0x7c   : > { %v374_v56 = vmul.f32 %v343_v53, %v1167_v54 }
  0x7e   : > { %v384_v58 = vadd.f32 1e-09, %v374_v56 }
  0x82   : > { %v353_v15 = vpop.permute.xlu1 %352  ;;  %v323_v16 = vpop.permute.xlu0 %322 }
  0x83   : > { %v376_v19 = vmul.f32 %v353_v15, %v1128_v17  ;;  %v370_v22 = vmul.f32 %v323_v16, %v1131_v18 }
  0x85   : > { %v386_v27 = vadd.f32 1e-09, %v376_v19  ;;  %v380_v29 = vadd.f32 1e-09, %v370_v22 }
  0x8a   : > { %v358_v23 = vpop.permute.xlu1 %357  ;;  %v328_v24 = vpop.permute.xlu0 %327 }
  0x8b   : > { %v377_v25 = vmul.f32 %v358_v23, %v1135_v20  ;;  %v371_v26 = vmul.f32 %v328_v24, %v1138_v21 }
  0x8d   : > { %v387_v30 = vadd.f32 1e-09, %v377_v25  ;;  %v381_v31 = vadd.f32 1e-09, %v371_v26 }
  0x8f   : > { %v393_v32 = vpack.c.bf16 %v387_v30, %v386_v27  ;;  %v390_v33 = vpack.c.bf16 %v381_v31, %v380_v29 }
  0x91   : > { %926 = vmatmul.msk.bf16.vlgmr.msra.gmra.mxu0 %vm431_vm0, %v390_v33  ;;  %929 = vmatmul.msk.bf16.vlgmr.msra.gmra.mxu2 %vm431_vm0, %v393_v32 }
  0x92   : > { %v368_v36 = vpop.permute.xlu1 %367  ;;  %v363_v38 = vpop.permute.xlu0 %362 }
  0x93   : > { %v379_v43 = vmul.f32 %v368_v36, %v1152_v37  ;;  %v378_v44 = vmul.f32 %v363_v38, %v1155_v39 }
  0x95   : > { %v389_v47 = vadd.f32 1e-09, %v379_v43  ;;  %v388_v48 = vadd.f32 1e-09, %v378_v44 }
  0x97   : > { %v394_v50 = vpack.c.bf16 %v389_v47, %v388_v48 }
  0x9a   : > { %v348_v51 = vpop.permute.xlu0 %347 }
  0x9b   : > { %v375_v55 = vmul.f32 %v348_v51, %v1164_v52 }
  0x9d   : > { %v385_v57 = vadd.f32 1e-09, %v375_v55 }
  0x9f   : > { %v392_v59 = vpack.c.bf16 %v385_v57, %v384_v58  ;;  %v961_v58 = vld [vmem:[%s1387_s5 + $0x18] sm:$0xff] }
  0xa0   : > { %795 = vmatpush.bf16.msra.mxu1 %v961_v58  ;;  %966 = vmatpush.bf16.msra.mxu3 %v961_v58 }
  0xa1   : > { %927 = vmatmul.msk.bf16.gmra.mxu0 %vm431_vm0, %v391_v49  ;;  %930 = vmatmul.msk.bf16.gmra.mxu2 %vm431_vm0, %v394_v50 }
  0xb1   : > { %928 = vmatmul.msk.bf16.gmra.mxu0 %vm431_vm0, %v392_v59 }
 0x10e   : > { %v456_v61 = vpop.f32.mrf.mxu0 }
 0x10f   : > { %v457_v62 = vadd.f32 %v983_v60, %v456_v61 }
 0x111   : > { %986 = vtanh.f32 %v457_v62 }
 0x114   : > { %v471_v63 = vpop.f32.mrf.mxu2 }
 0x115   : > { %v472_v1 = vadd.f32 %v983_v60, %v471_v63  ;;  %v959_v63 = vld [vmem:[%s1387_s5 + $0x8] sm:$0xff] }
 0x116   : > { %v458_v2 = vpop.f32.mrf.mxu0 }
 0x117   : > { %v987_v3 = vpop.eup %986  ;;  %988 = vtanh.f32 %v472_v1  ;;  %v459_v4 = vadd.f32 %v983_v60, %v458_v2 }
 0x118   : > { %v495_v5 = vmul.f32 %v987_v3, %v1178_v0  ;;  %v958_v3 = vld [vmem:[%s1387_s5] sm:$0xff] }
 0x119   : > { %990 = vtanh.f32 %v459_v4 }
 0x11a   : > { %v505_v6 = vsel %vm431_vm0, %v495_v5, 0.0 }
 0x11b   : > { %506 = vadd.xlane.f32.xlu1 %v505_v6 }
 0x11c   : > { %v473_v7 = vpop.f32.mrf.mxu2 }
 0x11d   : > { %v989_v8 = vpop.eup %988  ;;  %v474_v9 = vadd.f32 %v983_v60, %v473_v7 }
 0x11e   : > { %v461_v10 = vpop.f32.mrf.mxu0  ;;  %v501_v11 = vmul.f32 %v989_v8, %v1178_v0 }
 0x11f   : > { %v991_v12 = vpop.eup %990  ;;  %992 = vtanh.f32 %v474_v9  ;;  %v462_v13 = vadd.f32 %v983_v60, %v461_v10 }
 0x120   : > { %v523_v14 = vsel %vm431_vm0, %v501_v11, 0.0  ;;  %v496_v15 = vmul.f32 %v991_v12, %v1178_v0 }
 0x121   : > { %994 = vtanh.f32 %v462_v13  ;;  %524 = vadd.xlane.f32.xlu0 %v523_v14 }
 0x122   : > { %v508_v16 = vsel %vm431_vm0, %v496_v15, 0.0 }
 0x123   : > { %509 = vadd.xlane.f32.xlu2 %v508_v16 }
 0x124   : > { %v476_v19 = vpop.f32.mrf.mxu2 }
 0x125   : > { %v993_v22 = vpop.eup %992  ;;  %v477_v23 = vadd.f32 %v983_v60, %v476_v19 }
 0x126   : > { %v463_v24 = vpop.f32.mrf.mxu0  ;;  %v502_v25 = vmul.f32 %v993_v22, %v1178_v0 }
 0x127   : > { %v995_v26 = vpop.eup %994  ;;  %996 = vtanh.f32 %v477_v23  ;;  %v464_v27 = vadd.f32 %v983_v60, %v463_v24 }
 0x128   : > { %v497_v28 = vmul.f32 %v995_v26, %v1178_v0  ;;  %v526_v29 = vsel %vm431_vm0, %v502_v25, 0.0 }
 0x129   : > { %998 = vtanh.f32 %v464_v27 }
 0x12a   : > { %v511_v30 = vsel %vm431_vm0, %v497_v28, 0.0 }
 0x12b   : > { %527 = vadd.xlane.f32.xlu2 %v526_v29  ;;  %512 = vadd.xlane.f32.xlu1 %v511_v30 }
 0x12c   : > { %v478_v31 = vpop.f32.mrf.mxu2 }
 0x12d   : > { %v997_v32 = vpop.eup %996  ;;  %v479_v33 = vadd.f32 %v983_v60, %v478_v31 }
 0x12e   : > { %v466_v36 = vpop.f32.mrf.mxu0  ;;  %v503_v38 = vmul.f32 %v997_v32, %v1178_v0 }
 0x12f   : > { %v999_v40 = vpop.eup %998  ;;  %1000 = vtanh.f32 %v479_v33  ;;  %v467_v41 = vadd.f32 %v983_v60, %v466_v36 }
 0x130   : > { %v529_v42 = vsel %vm431_vm0, %v503_v38, 0.0  ;;  %v498_v43 = vmul.f32 %v999_v40, %v1178_v0 }
 0x131   : > { %1002 = vtanh.f32 %v467_v41  ;;  %530 = vadd.xlane.f32.xlu0 %v529_v42 }
 0x132   : > { %v514_v44 = vsel %vm431_vm0, %v498_v43, 0.0 }
 0x133   : > { %515 = vadd.xlane.f32.xlu2 %v514_v44 }
 0x135   : > { %v1001_v45 = vpop.eup %1000 }
 0x136   : > { %v468_v46 = vpop.f32.mrf.mxu0  ;;  %v504_v47 = vmul.f32 %v1001_v45, %v1178_v0 }
 0x137   : > { %v1003_v48 = vpop.eup %1002  ;;  %v469_v49 = vadd.f32 %v983_v60, %v468_v46  ;;  %v960_v60 = vld [vmem:[%s1387_s5 + $0x10] sm:$0xff] }
 0x138   : > { %v532_v50 = vsel %vm431_vm0, %v504_v47, 0.0  ;;  %v499_v51 = vmul.f32 %v1003_v48, %v1178_v0  ;;  %796 = vmatpush.bf16.msra.mxu1 %v960_v60  ;;  %967 = vmatpush.bf16.msra.mxu3 %v960_v60 }
 0x139   : > { %1004 = vtanh.f32 %v469_v49  ;;  %533 = vadd.xlane.f32.xlu1 %v532_v50 }
 0x13a   : > { %v517_v53 = vsel %vm431_vm0, %v499_v51, 0.0 }
 0x13b   : > { %518 = vadd.xlane.f32.xlu2 %v517_v53 }
 0x13c   : > { %797 = vmatpush.bf16.msra.mxu1 %v959_v63  ;;  %968 = vmatpush.bf16.msra.mxu3 %v959_v63 }
 0x13f   : > { %v1005_v55 = vpop.eup %1004 }
 0x140   : > { %v500_v56 = vmul.f32 %v1005_v55, %v1178_v0  ;;  %798 = vmatpush.bf16.msra.mxu1 %v958_v3  ;;  %969 = vmatpush.bf16.msra.mxu3 %v958_v3 }
 0x142   : > { %v520_v57 = vsel %vm431_vm0, %v500_v56, 0.0 }
 0x143   : > { %521 = vadd.xlane.f32.xlu0 %v520_v57 }
 0x18e   : > { %v507_v59 = vpop.xlane.xlu1 %506 }
 0x18f   : > { %v535_v61 = vsub.f32 0.0, %v507_v59 }
 0x191   : > { %v545_v62 = vmul.f32 1.442695, %v535_v61 }
 0x193   : > { %1006 = vpow2.f32 %v545_v62 }
 0x194   : > { %v525_v0 = vpop.xlane.xlu0 %524 }
 0x195   : > { %v541_v1 = vsub.f32 0.0, %v525_v0 }
 0x196   : > { %v510_v2 = vpop.xlane.xlu2 %509 }
 0x197   : > { %v557_v4 = vmul.f32 1.442695, %v541_v1  ;;  %v536_v5 = vsub.f32 0.0, %v510_v2 }
 0x199   : > { %v1007_v6 = vpop.eup %1006  ;;  %1008 = vpow2.f32 %v557_v4  ;;  %v547_v7 = vmul.f32 1.442695, %v536_v5 }
 0x19a   : > { %v565_v8 = vadd.f32 1.0, %v1007_v6 }
 0x19b   : > { %1010 = vpow2.f32 %v547_v7 }
 0x19c   : > { %1012 = vrcp.f32 %v565_v8  ;;  %v584_v29 = vand.u32 2147483647, %v565_v8  ;;  %v586_v30 = vand.u32 2147483648, %v565_v8  ;;  %vm580_vm1 = vweird.f32 %v565_v8 }
 0x19e   : > { %v528_v9 = vpop.xlane.xlu2 %527  ;;  %v513_v10 = vpop.xlane.xlu1 %512  ;;  %vm1224_vm3 = vcmp.eq.f32.partialorder %v584_v29, 8.507059e+37  ;;  %v587_v46 = vor.u32 1.1754944e-38, %v586_v30 }
 0x19f   : > { %v1009_v11 = vpop.eup %1008  ;;  %v542_v12 = vsub.f32 0.0, %v528_v9  ;;  %v537_v13 = vsub.f32 0.0, %v513_v10 }
 0x1a0   : > { %v1212_v14 = vadd.f32 1.0, %v1009_v11 }
 0x1a1   : > { %v1011_v15 = vpop.eup %1010  ;;  %v559_v16 = vmul.f32 1.442695, %v542_v12  ;;  %v549_v19 = vmul.f32 1.442695, %v537_v13 }
 0x1a2   : > { %v1013_v22 = vpop.eup %1012  ;;  %1014 = vrcp.f32 %v1212_v14  ;;  %v1215_v23 = vadd.f32 1.0, %v1011_v15  ;;  %v674_v51 = vand.u32 2147483647, %v1212_v14  ;;  %vm670_vm5 = vweird.f32 %v1212_v14 }
 0x1a3   : > { %v576_v24 = vmul.f32 %v1013_v22, %v565_v8  ;;  %1016 = vpow2.f32 %v559_v16  ;;  %vm581_vm2 = vweird.f32 %v1013_v22  ;;  %v676_v0 = vand.u32 2147483648, %v1212_v14 }
 0x1a4   : > { %1018 = vrcp.f32 %v1215_v23  ;;  %v531_v25 = vpop.xlane.xlu0 %530  ;;  %v599_v47 = vand.u32 2147483647, %v1215_v23  ;;  %vm1236_vm4 = vmor %vm580_vm1, %vm581_vm2  ;;  %v601_v57 = vand.u32 2147483648, %v1215_v23  ;;  %vm595_vm6 = vweird.f32 %v1215_v23 }
 0x1a5   : > { %v577_v26 = vsub.f32 1.0, %v576_v24  ;;  %1020 = vpow2.f32 %v549_v19  ;;  %v543_v27 = vsub.f32 0.0, %v531_v25  ;;  %vm1252_vm9 = vcmp.eq.f32.partialorder %v674_v51, 8.507059e+37 }
 0x1a6   : > { %v516_v28 = vpop.xlane.xlu2 %515  ;;  %vm1247_vm7 = vcmp.eq.f32.partialorder %v599_v47, 8.507059e+37  ;;  %v602_v8 = vor.u32 1.1754944e-38, %v601_v57  ;;  %v677_v25 = vor.u32 1.1754944e-38, %v676_v0 }
 0x1a7   : > { %v561_v31 = vmul.f32 1.442695, %v543_v27  ;;  %v538_v32 = vsub.f32 0.0, %v516_v28  ;;  %v578_v33 = vmul.f32 %v1013_v22, %v577_v26 }
 0x1a8   : > { %v1218_v36 = vpop.eup %1014 }
 0x1a9   : > { %v1017_v38 = vpop.eup %1016  ;;  %v666_v40 = vmul.f32 %v1218_v36, %v1212_v14  ;;  %1022 = vpow2.f32 %v561_v31  ;;  %v551_v41 = vmul.f32 1.442695, %v538_v32  ;;  %v579_v42 = vadd.f32 %v1013_v22, %v578_v33 }
 0x1aa   : > { %v1019_v43 = vpop.eup %1018  ;;  %v1222_v44 = vadd.f32 1.0, %v1017_v38  ;;  %vm671_vm10 = vweird.f32 %v1218_v36 }
 0x1ab   : > { %v1021_v48 = vpop.eup %1020  ;;  %v667_v49 = vsub.f32 1.0, %v666_v40  ;;  %v591_v50 = vmul.f32 %v1019_v43, %v1215_v23  ;;  %1024 = vpow2.f32 %v551_v41  ;;  %v583_v60 = vsel %vm1236_vm4, %v1013_v22, %v579_v42  ;;  %vm1280_vm12 = vmor %vm670_vm5, %vm671_vm10 }
 0x1ac   : > { %1026 = vrcp.f32 %v1222_v44  ;;  %v1232_v53 = vadd.f32 1.0, %v1021_v48  ;;  %v534_v55 = vpop.xlane.xlu1 %533  ;;  %vm596_vm8 = vweird.f32 %v1019_v43  ;;  %v588_v7 = vsel %vm1224_vm3, %v587_v46, %v583_v60 }
 0x1ad   : > { %v592_v58 = vsub.f32 1.0, %v591_v50  ;;  %v544_v59 = vsub.f32 0.0, %v534_v55  ;;  %v668_v61 = vmul.f32 %v1218_v36, %v667_v49  ;;  %vm597_vm11 = vmor %vm595_vm6, %vm596_vm8  ;;  %v689_v16 = vand.u32 2147483647, %v1222_v44 }
 0x1ae   : > { %1028 = vrcp.f32 %v1232_v53  ;;  %v519_v62 = vpop.xlane.xlu2 %518  ;;  %v691_v19 = vand.u32 2147483648, %v1222_v44  ;;  %v725_v28 = vmul.f32 %v588_v7, %v1131_v18  ;;  %vm685_vm13 = vweird.f32 %v1222_v44 }
 0x1af   : > { %v1023_v1 = vpop.eup %1022  ;;  %v563_v2 = vmul.f32 1.442695, %v544_v59  ;;  %v539_v3 = vsub.f32 0.0, %v519_v62  ;;  %v593_v4 = vmul.f32 %v1019_v43, %v592_v58  ;;  %v669_v12 = vadd.f32 %v1218_v36, %v668_v61 }
 0x1b0   : > { %v1256_v6 = vadd.f32 1.0, %v1023_v1  ;;  %vm1291_vm15 = vcmp.eq.f32.partialorder %v689_v16, 8.507059e+37  ;;  %v692_v33 = vor.u32 1.1754944e-38, %v691_v19  ;;  %vm610_vm1 = vweird.f32 %v1232_v53 }
 0x1b1   : > { %v1025_v9 = vpop.eup %1024  ;;  %1030 = vpow2.f32 %v563_v2  ;;  %v553_v10 = vmul.f32 1.442695, %v539_v3  ;;  %v594_v11 = vadd.f32 %v1019_v43, %v593_v4  ;;  %v673_v18 = vsel %vm1280_vm12, %v1218_v36, %v669_v12 }
 0x1b2   : > { %v1027_v13 = vpop.eup %1026  ;;  %1032 = vrcp.f32 %v1256_v6  ;;  %v1263_v15 = vadd.f32 1.0, %v1025_v9  ;;  %v678_v36 = vsel %vm1252_vm9, %v677_v25, %v673_v18  ;;  %v614_v46 = vand.u32 2147483647, %v1232_v53 }
 0x1b3   : > { %v681_v22 = vmul.f32 %v1027_v13, %v1222_v44  ;;  %1034 = vpow2.f32 %v553_v10  ;;  %v598_v24 = vsel %vm597_vm11, %v1019_v43, %v594_v11  ;;  %vm686_vm14 = vweird.f32 %v1027_v13 }
 0x1b4   : > { %v1270_v26 = vpop.eup %1028  ;;  %1036 = vrcp.f32 %v1263_v15  ;;  %v603_v27 = vsel %vm1247_vm7, %v602_v8, %v598_v24  ;;  %vm687_vm3 = vmor %vm685_vm13, %vm686_vm14  ;;  %v616_v57 = vand.u32 2147483648, %v1232_v53  ;;  %v629_v58 = vand.u32 2147483647, %v1263_v15 }
 0x1b5   : > { %v682_v29 = vsub.f32 1.0, %v681_v22  ;;  %v606_v30 = vmul.f32 %v1270_v26, %v1232_v53  ;;  %v726_v31 = vmul.f32 %v603_v27, %v1138_v21  ;;  %vm611_vm2 = vweird.f32 %v1270_v26 }
 0x1b6   : > { %v522_v32 = vpop.xlane.xlu0 %521  ;;  %v631_v0 = vand.u32 2147483648, %v1263_v15  ;;  %v731_v1 = vmul.f32 %v678_v36, %v1128_v17  ;;  %vm1328_vm4 = vmor %vm610_vm1, %vm611_vm2  ;;  %vm615_vm5 = vcmp.eq.f32.partialorder %v614_v46, 8.507059e+37  ;;  %v617_v5 = vor.u32 1.1754944e-38, %v616_v57 }
 0x1b7   : > { %v1031_v38 = vpop.eup %1030  ;;  %v607_v40 = vsub.f32 1.0, %v606_v30  ;;  %v540_v41 = vsub.f32 0.0, %v522_v32  ;;  %v735_v42 = vpack.c.bf16 %v726_v31, %v725_v28  ;;  %v683_v43 = vmul.f32 %v1027_v13, %v682_v29 }
 0x1b8   : > { %v1296_v45 = vpop.eup %1032  ;;  %v1298_v21 = vadd.f32 1.0, %v1031_v38  ;;  %vm625_vm7 = vweird.f32 %v1263_v15  ;;  %vm1337_vm8 = vcmp.eq.f32.partialorder %v629_v58, 8.507059e+37  ;;  %v632_v9 = vor.u32 1.1754944e-38, %v631_v0 }
 0x1b9   : > { %v1035_v47 = vpop.eup %1034  ;;  %v696_v48 = vmul.f32 %v1296_v45, %v1256_v6  ;;  %v555_v49 = vmul.f32 1.442695, %v540_v41  ;;  %947 = vmatmul.msk.bf16.vlgmr.msra.gmra.mxu1 %vm431_vm0, %v735_v42  ;;  %v684_v50 = vadd.f32 %v1027_v13, %v683_v43  ;;  %v608_v51 = vmul.f32 %v1270_v26, %v607_v40 }
 0x1ba   : > { %v1037_v55 = vpop.eup %1036  ;;  %1038 = vrcp.f32 %v1298_v21  ;;  %v1309_v56 = vadd.f32 1.0, %v1035_v47  ;;  %vm700_vm9 = vweird.f32 %v1256_v6  ;;  %vm701_vm10 = vweird.f32 %v1296_v45 }
 0x1bb   : > { %v697_v59 = vsub.f32 1.0, %v696_v48  ;;  %v621_v60 = vmul.f32 %v1037_v55, %v1263_v15  ;;  %1040 = vpow2.f32 %v555_v49  ;;  %v688_v61 = vsel %vm687_vm3, %v1027_v13, %v684_v50  ;;  %vm702_vm13 = vmor %vm700_vm9, %vm701_vm10 }
 0x1bc   : > { %1042 = vrcp.f32 %v1309_v56  ;;  %v693_v62 = vsel %vm1291_vm15, %v692_v33, %v688_v61  ;;  %v609_v63 = vadd.f32 %v1270_v26, %v608_v51  ;;  %vm626_vm6 = vweird.f32 %v1037_v55 }
 0x1bd   : > { %v622_v44 = vsub.f32 1.0, %v621_v60  ;;  %v732_v2 = vmul.f32 %v693_v62, %v1135_v20  ;;  %v698_v17 = vmul.f32 %v1296_v45, %v697_v59  ;;  %vm627_vm11 = vmor %vm625_vm7, %vm626_vm6  ;;  %v704_v15 = vand.u32 2147483647, %v1256_v6 }
 0x1be   : > { %v613_v4 = vsel %vm1328_vm4, %v1270_v26, %v609_v63  ;;  %v706_v22 = vand.u32 2147483648, %v1256_v6  ;;  %v719_v24 = vand.u32 2147483647, %v1298_v21  ;;  %v721_v30 = vand.u32 2147483648, %v1298_v21 }
 0x1bf   : > { %v738_v7 = vpack.c.bf16 %v732_v2, %v731_v1  ;;  %v623_v8 = vmul.f32 %v1037_v55, %v622_v44  ;;  %v618_v12 = vsel %vm615_vm5, %v617_v5, %v613_v4  ;;  %v699_v28 = vadd.f32 %v1296_v45, %v698_v17  ;;  %v985_v44 = vld [vmem:[%s1388_s6] ss:$0 sm:$0xff] }
 0x1c0   : > { %v1039_v20 = vpop.eup %1038  ;;  %v727_v29 = vmul.f32 %v618_v12, %v1146_v34  ;;  %vm715_vm14 = vweird.f32 %v1298_v21  ;;  %v707_v34 = vor.u32 1.1754944e-38, %v706_v22  ;;  %v722_v41 = vor.u32 1.1754944e-38, %v721_v30 }
 0x1c1   : > { %v1041_v10 = vpop.eup %1040  ;;  %v711_v11 = vmul.f32 %v1039_v20, %v1298_v21  ;;  %950 = vmatmul.msk.bf16.vlgmr.msra.gmra.mxu3 %vm431_vm0, %v738_v7  ;;  %v624_v13 = vadd.f32 %v1037_v55, %v623_v8  ;;  %vm716_vm12 = vweird.f32 %v1039_v20  ;;  %v703_v33 = vsel %vm702_vm13, %v1296_v45, %v699_v28 }
 0x1c2   : > { %v1043_v16 = vpop.eup %1042  ;;  %v570_v19 = vadd.f32 1.0, %v1041_v10  ;;  %vm717_vm15 = vmor %vm715_vm14, %vm716_vm12  ;;  %vm705_vm1 = vcmp.eq.f32.partialorder %v704_v15, 8.507059e+37  ;;  %vm720_vm2 = vcmp.eq.f32.partialorder %v719_v24, 8.507059e+37  ;;  %v646_v45 = vand.u32 2147483648, %v1309_v56 }
 0x1c3   : > { %v712_v25 = vsub.f32 1.0, %v711_v11  ;;  %v636_v26 = vmul.f32 %v1043_v16, %v1309_v56  ;;  %v628_v27 = vsel %vm627_vm11, %v1037_v55, %v624_v13  ;;  %v708_v43 = vsel %vm705_vm1, %v707_v34, %v703_v33 }
 0x1c4   : > { %1044 = vrcp.f32 %v570_v19  ;;  %v633_v23 = vsel %vm1337_vm8, %v632_v9, %v628_v27  ;;  %vm641_vm3 = vweird.f32 %v1043_v16  ;;  %v733_v48 = vmul.f32 %v708_v43, %v1155_v39 }
 0x1c5   : > { %v637_v31 = vsub.f32 1.0, %v636_v26  ;;  %v728_v18 = vmul.f32 %v633_v23, %v1149_v35  ;;  %v713_v32 = vmul.f32 %v1039_v20, %v712_v25  ;;  %vm640_vm4 = vweird.f32 %v1309_v56 }
 0x1c6   : > { %v644_v49 = vand.u32 2147483647, %v1309_v56  ;;  %vm642_vm5 = vmor %vm640_vm4, %vm641_vm3  ;;  %v659_v50 = vand.u32 2147483647, %v570_v19  ;;  %v661_v51 = vand.u32 2147483648, %v570_v19  ;;  %v647_v59 = vor.u32 1.1754944e-38, %v646_v45 }
 0x1c7   : > { %v736_v14 = vpack.c.bf16 %v728_v18, %v727_v29  ;;  %v714_v38 = vadd.f32 %v1039_v20, %v713_v32  ;;  %v638_v40 = vmul.f32 %v1043_v16, %v637_v31  ;;  %vm655_vm8 = vweird.f32 %v570_v19 }
 0x1c8   : > { %vm645_vm7 = vcmp.eq.f32.partialorder %v644_v49, 8.507059e+37  ;;  %v662_v39 = vor.u32 1.1754944e-38, %v661_v51  ;;  %vm660_vm10 = vcmp.eq.f32.partialorder %v659_v50, 8.507059e+37 }
 0x1c9   : > { %948 = vmatmul.msk.bf16.gmra.mxu1 %vm431_vm0, %v736_v14  ;;  %v718_v35 = vsel %vm717_vm15, %v1039_v20, %v714_v38  ;;  %v639_v21 = vadd.f32 %v1043_v16, %v638_v40 }
 0x1ca   : > { %v1045_v42 = vpop.eup %1044  ;;  %v723_v36 = vsel %vm720_vm2, %v722_v41, %v718_v35 }
 0x1cb   : > { %v651_v6 = vmul.f32 %v1045_v42, %v570_v19  ;;  %v734_v46 = vmul.f32 %v723_v36, %v1152_v37  ;;  %v643_v57 = vsel %vm642_vm5, %v1043_v16, %v639_v21  ;;  %vm656_vm6 = vweird.f32 %v1045_v42 }
 0x1cc   : > { %v648_v60 = vsel %vm645_vm7, %v647_v59, %v643_v57  ;;  %vm657_vm9 = vmor %vm655_vm8, %vm656_vm6 }
 0x1cd   : > { %v652_v47 = vsub.f32 1.0, %v651_v6  ;;  %v739_v55 = vpack.c.bf16 %v734_v46, %v733_v48  ;;  %v729_v62 = vmul.f32 %v648_v60, %v1167_v54 }
 0x1cf   : > { %v653_v58 = vmul.f32 %v1045_v42, %v652_v47 }
 0x1d1   : > { %951 = vmatmul.msk.bf16.gmra.mxu3 %vm431_vm0, %v739_v55  ;;  %v654_v37 = vadd.f32 %v1045_v42, %v653_v58 }
 0x1d3   : > { %v658_v61 = vsel %vm657_vm9, %v1045_v42, %v654_v37 }
 0x1d4   : > { %v663_v56 = vsel %vm660_vm10, %v662_v39, %v658_v61 }
 0x1d5   : > { %v730_v63 = vmul.f32 %v663_v56, %v1164_v52 }
 0x1d7   : > { %v737_v0 = vpack.c.bf16 %v730_v63, %v729_v62 }
 0x1d9   : > { %949 = vmatmul.msk.bf16.gmra.mxu1 %vm431_vm0, %v737_v0 }
 0x236   : > { %v800_v1 = vpop.f32.mrf.mxu1 }
 0x237   : > { %v801_v2 = vadd.f32 %v985_v44, %v800_v1 }
 0x239   : > { %825 = vst [vmem:[%s298_s13] sm:$0xff] %v801_v2 }
 0x23e   : > { %v802_v3 = vpop.f32.mrf.mxu1 }
 0x23f   : > { %v803_v4 = vadd.f32 %v985_v44, %v802_v3 }
 0x241   : > { %826 = vst [vmem:[%s298_s13 + $0x8] sm:$0xff] %v803_v4 }
 0x244   : > { %v815_v54 = vpop.f32.mrf.mxu3 }
 0x245   : > { %v816_v5 = vadd.f32 %v985_v44, %v815_v54 }
 0x246   : > { %v805_v52 = vpop.f32.mrf.mxu1 }
 0x247   : > { %831 = vst [vmem:[%s298_s13 + $0x30] sm:$0xff] %v816_v5  ;;  %v806_v7 = vadd.f32 %v985_v44, %v805_v52 }
 0x249   : > { %827 = vst [vmem:[%s298_s13 + $0x10] sm:$0xff] %v806_v7 }
 0x24c   : > { %v817_v8 = vpop.f32.mrf.mxu3 }
 0x24d   : > { %v818_v17 = vadd.f32 %v985_v44, %v817_v8 }
 0x24e   : > { %v807_v20 = vpop.f32.mrf.mxu1 }
 0x24f   : > { %832 = vst [vmem:[%s298_s13 + $0x38] sm:$0xff] %v818_v17  ;;  %v808_v53 = vadd.f32 %v985_v44, %v807_v20 }
 0x251   : > { %828 = vst [vmem:[%s298_s13 + $0x18] sm:$0xff] %v808_v53 }
 0x254   : > { %v820_v9 = vpop.f32.mrf.mxu3 }
 0x255   : > { %v821_v10 = vadd.f32 %v985_v44, %v820_v9 }
 0x256   : > { %v810_v11 = vpop.f32.mrf.mxu1 }
 0x257   : > { %833 = vst [vmem:[%s298_s13 + $0x40] sm:$0xff] %v821_v10  ;;  %v811_v12 = vadd.f32 %v985_v44, %v810_v11 }
 0x259   : > { %829 = vst [vmem:[%s298_s13 + $0x20] sm:$0xff] %v811_v12 }
 0x25c   : > { %v822_v13 = vpop.f32.mrf.mxu3 }
 0x25d   : > { %v823_v16 = vadd.f32 %v985_v44, %v822_v13 }
 0x25e   : > { %v812_v19 = vpop.f32.mrf.mxu1 }
 0x25f   : > { %834 = vst [vmem:[%s298_s13 + $0x48] sm:$0xff] %v823_v16  ;;  %v813_v15 = vadd.f32 %v985_v44, %v812_v19 }
 0x261   : > { %830 = vst [vmem:[%s298_s13 + $0x28] sm:$0xff] %v813_v15 }
 0x262 PF: > { %s17_s24 = sadd.s32 1, %s1052_s24  }
 0x263   : > { %p14_p4 = scmp.ge.s32.totalorder %s17_s24, 4  }
 0x265   :  { %16 = sbr.rel (!%p14_p4) target bundleno = 1 (0x1), region = 81 }

// kernel: squeeze.84
= control target key start
LH: loop header
LB: loop body
LE: loop exit
PB: predicated region body
PF: predicated region fallthrough
CT: control target
= control target key end

     0   :  { %s403_s10 = smov 112   ;;  %vm3_vm0 = vcmask 130048   ;;  %s405_s12 = smov 80   ;;  %s644_s0 = inlined_call_operand.vmem [shape: f32[1,2,48,64], index: 0, kind: input, shape index: {}]   ;;  %s645_s1 = inlined_call_operand.vmem [shape: f32[2,4,48,16], index: 1, kind: output, shape index: {}]  }
   0x1   :  { %v334_v0 = vld [vmem:[%s644_s0 + $0x10] sm:$0xff]   ;;  %v60_v1 = vld [vmem:[%s644_s0] sm:$0xff]   ;;  %v336_v3 = vld [vmem:[%s644_s0 + $0x18] sm:$0xff]  }
   0x2   :  { %75 = vrot.lane.b32.xlu1 %v334_v0, %s403_s10  ;;  %61 = vrot.lane.b32.xlu0 %v60_v1, %s403_s10  ;;  %v338_v2 = vld [vmem:[%s644_s0 + $0x20] sm:$0xff]   ;;  %v332_v4 = vld [vmem:[%s644_s0 + $0x8] sm:$0xff]  }
   0x3   :  { %89 = vrot.lane.b32.xlu2 %v338_v2, %s403_s10  ;;  %v340_v5 = vld [vmem:[%s644_s0 + $0x28] sm:$0xff]   ;;  %v344_v6 = vld [vmem:[%s644_s0 + $0x38] sm:$0xff]   ;;  %v342_v7 = vld [vmem:[%s644_s0 + $0x30] sm:$0xff]  }
   0x4   :  { %v346_v8 = vld [vmem:[%s644_s0 + $0x40] sm:$0xff]   ;;  %v350_v9 = vld [vmem:[%s644_s0 + $0x50] sm:$0xff]   ;;  %v348_v10 = vld [vmem:[%s644_s0 + $0x48] sm:$0xff]   ;;  %4 = vst.msk [vmem:[%s645_s1] ss:$4 sm:$0xff] %vm3_vm0, %v60_v1  }
   0x5   :  { %v352_v11 = vld [vmem:[%s644_s0 + $0x58] sm:$0xff]   ;;  %s404_s0 = smov 96   ;;  %310 = vst.msk [vmem:[%s645_s1 + $0x20] ss:$4 sm:$0xff] %vm3_vm0, %v332_v4  }
   0x6   :  { %312 = vst.msk [vmem:[%s645_s1 + $0x40] ss:$4 sm:$0xff] %vm3_vm0, %v334_v0  }
   0x7   :  { %314 = vst.msk [vmem:[%s645_s1 + $0x60] ss:$4 sm:$0xff] %vm3_vm0, %v336_v3  }
   0x8   :  { %316 = vst.msk [vmem:[%s645_s1 + $0x80] ss:$4 sm:$0xff] %vm3_vm0, %v338_v2  }
   0x9   :  { %318 = vst.msk [vmem:[%s645_s1 + $0xa0] ss:$4 sm:$0xff] %vm3_vm0, %v340_v5  }
   0xa   :  { %82 = vrot.lane.b32.xlu1 %v336_v3, %s403_s10  ;;  %68 = vrot.lane.b32.xlu0 %v332_v4, %s403_s10  ;;  %320 = vst.msk [vmem:[%s645_s1 + $0xc0] ss:$4 sm:$0xff] %vm3_vm0, %v342_v7  }
   0xb   :  { %96 = vrot.lane.b32.xlu2 %v340_v5, %s403_s10  ;;  %322 = vst.msk [vmem:[%s645_s1 + $0xe0] ss:$4 sm:$0xff] %vm3_vm0, %v344_v6  }
   0xc   :  { %324 = vst.msk [vmem:[%s645_s1 + $0x100] ss:$4 sm:$0xff] %vm3_vm0, %v346_v8  }
   0xd   :  { %326 = vst.msk [vmem:[%s645_s1 + $0x120] ss:$4 sm:$0xff] %vm3_vm0, %v348_v10  }
   0xe   :  { %328 = vst.msk [vmem:[%s645_s1 + $0x140] ss:$4 sm:$0xff] %vm3_vm0, %v350_v9  }
   0xf   :  { %330 = vst.msk [vmem:[%s645_s1 + $0x160] ss:$4 sm:$0xff] %vm3_vm0, %v352_v11  }
  0x12   :  { %110 = vrot.lane.b32.xlu1 %v344_v6, %s403_s10  ;;  %103 = vrot.lane.b32.xlu0 %v342_v7, %s403_s10 }
  0x13   :  { %117 = vrot.lane.b32.xlu2 %v346_v8, %s403_s10 }
  0x1a   :  { %131 = vrot.lane.b32.xlu1 %v350_v9, %s403_s10  ;;  %124 = vrot.lane.b32.xlu0 %v348_v10, %s403_s10 }
  0x1b   :  { %138 = vrot.lane.b32.xlu2 %v352_v11, %s403_s10 }
  0x22   :  { %151 = vrot.lane.b32.xlu1 %v332_v4, %s404_s0  ;;  %144 = vrot.lane.b32.xlu0 %v60_v1, %s404_s0 }
  0x23   :  { %158 = vrot.lane.b32.xlu2 %v334_v0, %s404_s0 }
  0x2a   :  { %172 = vrot.lane.b32.xlu1 %v338_v2, %s404_s0  ;;  %165 = vrot.lane.b32.xlu0 %v336_v3, %s404_s0 }
  0x2b   :  { %179 = vrot.lane.b32.xlu2 %v340_v5, %s404_s0 }
  0x32   :  { %193 = vrot.lane.b32.xlu1 %v344_v6, %s404_s0  ;;  %186 = vrot.lane.b32.xlu0 %v342_v7, %s404_s0 }
  0x33   :  { %200 = vrot.lane.b32.xlu2 %v346_v8, %s404_s0 }
  0x3a   :  { %214 = vrot.lane.b32.xlu1 %v350_v9, %s404_s0  ;;  %207 = vrot.lane.b32.xlu0 %v348_v10, %s404_s0 }
  0x3b   :  { %221 = vrot.lane.b32.xlu2 %v352_v11, %s404_s0 }
  0x42   :  { %234 = vrot.lane.b32.xlu1 %v332_v4, %s405_s12  ;;  %227 = vrot.lane.b32.xlu0 %v60_v1, %s405_s12 }
  0x43   :  { %241 = vrot.lane.b32.xlu2 %v334_v0, %s405_s12 }
  0x4a   :  { %255 = vrot.lane.b32.xlu1 %v338_v2, %s405_s12  ;;  %248 = vrot.lane.b32.xlu0 %v336_v3, %s405_s12 }
  0x4b   :  { %262 = vrot.lane.b32.xlu2 %v340_v5, %s405_s12 }
  0x52   :  { %276 = vrot.lane.b32.xlu1 %v344_v6, %s405_s12  ;;  %269 = vrot.lane.b32.xlu0 %v342_v7, %s405_s12 }
  0x53   :  { %283 = vrot.lane.b32.xlu2 %v346_v8, %s405_s12 }
  0x5a   :  { %297 = vrot.lane.b32.xlu1 %v350_v9, %s405_s12  ;;  %290 = vrot.lane.b32.xlu0 %v348_v10, %s405_s12 }
  0x5b   :  { %304 = vrot.lane.b32.xlu2 %v352_v11, %s405_s12 }
  0x5d   :  { %v90_v12 = vpop.permute.xlu2 %89  }
  0x5e   :  { %339 = vst.msk [vmem:[%s645_s1 + $0x81] ss:$4 sm:$0xff] %vm3_vm0, %v90_v12  }
  0x65   :  { %v97_v13 = vpop.permute.xlu2 %96  }
  0x66   :  { %341 = vst.msk [vmem:[%s645_s1 + $0xa1] ss:$4 sm:$0xff] %vm3_vm0, %v97_v13  }
  0x6d   :  { %v118_v14 = vpop.permute.xlu2 %117  }
  0x6e   :  { %347 = vst.msk [vmem:[%s645_s1 + $0x101] ss:$4 sm:$0xff] %vm3_vm0, %v118_v14  }
  0x74   :  { %v76_v15 = vpop.permute.xlu1 %75   ;;  %v62_v16 = vpop.permute.xlu0 %61  }
  0x75   :  { %335 = vst.msk [vmem:[%s645_s1 + $0x41] ss:$4 sm:$0xff] %vm3_vm0, %v76_v15   ;;  %v139_v17 = vpop.permute.xlu2 %138  }
  0x76   :  { %331 = vst.msk [vmem:[%s645_s1 + $0x1] ss:$4 sm:$0xff] %vm3_vm0, %v62_v16  }
  0x77   :  { %353 = vst.msk [vmem:[%s645_s1 + $0x161] ss:$4 sm:$0xff] %vm3_vm0, %v139_v17  }
  0x7c   :  { %v83_v18 = vpop.permute.xlu1 %82   ;;  %v69_v19 = vpop.permute.xlu0 %68  }
  0x7d   :  { %337 = vst.msk [vmem:[%s645_s1 + $0x61] ss:$4 sm:$0xff] %vm3_vm0, %v83_v18   ;;  %v159_v20 = vpop.permute.xlu2 %158  }
  0x7e   :  { %333 = vst.msk [vmem:[%s645_s1 + $0x21] ss:$4 sm:$0xff] %vm3_vm0, %v69_v19  }
  0x7f   :  { %358 = vst.msk [vmem:[%s645_s1 + $0x42] ss:$4 sm:$0xff] %vm3_vm0, %v159_v20  }
  0x84   :  { %v111_v21 = vpop.permute.xlu1 %110   ;;  %v104_v22 = vpop.permute.xlu0 %103  }
  0x85   :  { %345 = vst.msk [vmem:[%s645_s1 + $0xe1] ss:$4 sm:$0xff] %vm3_vm0, %v111_v21   ;;  %v180_v23 = vpop.permute.xlu2 %179  }
  0x86   :  { %343 = vst.msk [vmem:[%s645_s1 + $0xc1] ss:$4 sm:$0xff] %vm3_vm0, %v104_v22  }
  0x87   :  { %364 = vst.msk [vmem:[%s645_s1 + $0xa2] ss:$4 sm:$0xff] %vm3_vm0, %v180_v23  }
  0x8c   :  { %v132_v24 = vpop.permute.xlu1 %131   ;;  %v125_v25 = vpop.permute.xlu0 %124  }
  0x8d   :  { %351 = vst.msk [vmem:[%s645_s1 + $0x141] ss:$4 sm:$0xff] %vm3_vm0, %v132_v24   ;;  %v201_v26 = vpop.permute.xlu2 %200  }
  0x8e   :  { %349 = vst.msk [vmem:[%s645_s1 + $0x121] ss:$4 sm:$0xff] %vm3_vm0, %v125_v25  }
  0x8f   :  { %370 = vst.msk [vmem:[%s645_s1 + $0x102] ss:$4 sm:$0xff] %vm3_vm0, %v201_v26  }
  0x94   :  { %v152_v27 = vpop.permute.xlu1 %151   ;;  %v145_v28 = vpop.permute.xlu0 %144  }
  0x95   :  { %356 = vst.msk [vmem:[%s645_s1 + $0x22] ss:$4 sm:$0xff] %vm3_vm0, %v152_v27   ;;  %v222_v29 = vpop.permute.xlu2 %221  }
  0x96   :  { %354 = vst.msk [vmem:[%s645_s1 + $0x2] ss:$4 sm:$0xff] %vm3_vm0, %v145_v28  }
  0x97   :  { %376 = vst.msk [vmem:[%s645_s1 + $0x162] ss:$4 sm:$0xff] %vm3_vm0, %v222_v29  }
  0x9c   :  { %v173_v30 = vpop.permute.xlu1 %172   ;;  %v166_v31 = vpop.permute.xlu0 %165  }
  0x9d   :  { %362 = vst.msk [vmem:[%s645_s1 + $0x82] ss:$4 sm:$0xff] %vm3_vm0, %v173_v30   ;;  %v242_v32 = vpop.permute.xlu2 %241  }
  0x9e   :  { %360 = vst.msk [vmem:[%s645_s1 + $0x62] ss:$4 sm:$0xff] %vm3_vm0, %v166_v31  }
  0x9f   :  { %381 = vst.msk [vmem:[%s645_s1 + $0x43] ss:$4 sm:$0xff] %vm3_vm0, %v242_v32  }
  0xa4   :  { %v194_v33 = vpop.permute.xlu1 %193   ;;  %v187_v34 = vpop.permute.xlu0 %186  }
  0xa5   :  { %368 = vst.msk [vmem:[%s645_s1 + $0xe2] ss:$4 sm:$0xff] %vm3_vm0, %v194_v33   ;;  %v263_v35 = vpop.permute.xlu2 %262  }
  0xa6   :  { %366 = vst.msk [vmem:[%s645_s1 + $0xc2] ss:$4 sm:$0xff] %vm3_vm0, %v187_v34  }
  0xa7   :  { %387 = vst.msk [vmem:[%s645_s1 + $0xa3] ss:$4 sm:$0xff] %vm3_vm0, %v263_v35  }
  0xac   :  { %v215_v36 = vpop.permute.xlu1 %214   ;;  %v208_v37 = vpop.permute.xlu0 %207  }
  0xad   :  { %374 = vst.msk [vmem:[%s645_s1 + $0x142] ss:$4 sm:$0xff] %vm3_vm0, %v215_v36   ;;  %v284_v38 = vpop.permute.xlu2 %283  }
  0xae   :  { %372 = vst.msk [vmem:[%s645_s1 + $0x122] ss:$4 sm:$0xff] %vm3_vm0, %v208_v37  }
  0xaf   :  { %393 = vst.msk [vmem:[%s645_s1 + $0x103] ss:$4 sm:$0xff] %vm3_vm0, %v284_v38  }
  0xb4   :  { %v235_v39 = vpop.permute.xlu1 %234   ;;  %v228_v40 = vpop.permute.xlu0 %227  }
  0xb5   :  { %379 = vst.msk [vmem:[%s645_s1 + $0x23] ss:$4 sm:$0xff] %vm3_vm0, %v235_v39   ;;  %v305_v41 = vpop.permute.xlu2 %304  }
  0xb6   :  { %377 = vst.msk [vmem:[%s645_s1 + $0x3] ss:$4 sm:$0xff] %vm3_vm0, %v228_v40  }
  0xb7   :  { %399 = vst.msk [vmem:[%s645_s1 + $0x163] ss:$4 sm:$0xff] %vm3_vm0, %v305_v41  }
  0xbc   :  { %v256_v42 = vpop.permute.xlu1 %255   ;;  %v249_v43 = vpop.permute.xlu0 %248  }
  0xbd   :  { %385 = vst.msk [vmem:[%s645_s1 + $0x83] ss:$4 sm:$0xff] %vm3_vm0, %v256_v42  }
  0xbe   :  { %383 = vst.msk [vmem:[%s645_s1 + $0x63] ss:$4 sm:$0xff] %vm3_vm0, %v249_v43  }
  0xc4   :  { %v277_v44 = vpop.permute.xlu1 %276   ;;  %v270_v45 = vpop.permute.xlu0 %269  }
  0xc5   :  { %391 = vst.msk [vmem:[%s645_s1 + $0xe3] ss:$4 sm:$0xff] %vm3_vm0, %v277_v44  }
  0xc6   :  { %389 = vst.msk [vmem:[%s645_s1 + $0xc3] ss:$4 sm:$0xff] %vm3_vm0, %v270_v45  }
  0xcc   :  { %v298_v46 = vpop.permute.xlu1 %297   ;;  %v291_v47 = vpop.permute.xlu0 %290  }
  0xcd   :  { %397 = vst.msk [vmem:[%s645_s1 + $0x143] ss:$4 sm:$0xff] %vm3_vm0, %v298_v46  }
  0xce   :  { %395 = vst.msk [vmem:[%s645_s1 + $0x123] ss:$4 sm:$0xff] %vm3_vm0, %v291_v47  }

// kernel: me_model_forward.2
= control target key start
LH: loop header
LB: loop body
LE: loop exit
PB: predicated region body
PF: predicated region fallthrough
CT: control target
= control target key end

     0   :  { %s2932_s15 = smov 0   ;;  %s3512_s0 = inlined_call_operand.vmem [shape: f32[2,32,128], index: 0, kind: input, shape index: {}]   ;;  %s3513_s1 = inlined_call_operand.vmem [shape: bf16[12,2,16,256], index: 1, kind: input, shape index: {}]   ;;  %s3514_s2 = inlined_call_operand.vmem [shape: bf16[12,256,128], index: 2, kind: input, shape index: {}]   ;;  %s3515_s3 = inlined_call_operand.vmem [shape: f32[12,1,128], index: 3, kind: input, shape index: {}]   ;;  %s3516_s4 = inlined_call_operand.vmem [shape: f32[12,2,48,128], index: 4, kind: output, shape index: {}]  }
   0x1 LB: > { %s1953_s16 = sadd.s32 4294967295, %s2905_s15   ;;  %p1957_p0 = scmp.ge.s32.totalorder %s2905_s15, 1  ;;  %s2905_s15 = sphi %s2932_s15, %s14_s15  }
   0x2   : > { %p186_p1 = scmp.lt.s32.totalorder %s2905_s15, 3 }
   0x4   : > { %p187_p2 = pnand %p1957_p0, %p186_p1 }
   0x5   : > { %s224_s17 = smul.u32 (!%p187_p2), 6, %s1953_s16 }
   0x6   : > { %190 = sbr.rel (%p187_p2) target bundleno = 319 (0x13f), region = 36 }
   0x7   : > { %p225_p3 = scmp.lt.s32.totalorder (!%p187_p2), %s224_s17, 11 }
   0xb   : > { %s3530_s17 = smov (!%p225_p3, %s224_s17), 11 }
   0xc   : > { %s2691_s18 = sshll.u32 %s3530_s17, 7  ;;  %s2690_s22 = sshll.u32 %s3530_s17, 5 }
   0xd   : > { %s2946_s21 = scalar_lea.vmem %s3514_s2, %s2691_s18  ;;  %s2978_s25 = scalar_lea.vmem %s3513_s1, %s2690_s22 }
   0xe   : > { %v2703_v0 = vld [vmem:[%s2946_s21 + $0x38] sm:$0xff]  ;;  %v2702_v4 = vld [vmem:[%s2946_s21 + $0x30] sm:$0xff]  ;;  %v2701_v8 = vld [vmem:[%s2946_s21 + $0x28] sm:$0xff]  ;;  %s3004_s28 = scalar_lea.vmem %s3515_s3, %s3530_s17  ;;  %s2812_s29 = smul.u32 96, %s3530_s17 }
   0xf   : > { %v2711_v1 = vld [vmem:[%s2946_s21 + $0x78] sm:$0xff]  ;;  %418 = vmatpush.bf16.msra.mxu0 %v2703_v0  ;;  %v2710_v5 = vld [vmem:[%s2946_s21 + $0x70] sm:$0xff]  ;;  %v2709_v9 = vld [vmem:[%s2946_s21 + $0x68] sm:$0xff] }
  0x10   : > { %v2723_v2 = vld [vmem:[%s2946_s21 + $0xb8] sm:$0xff]  ;;  %437 = vmatpush.bf16.msra.mxu1 %v2711_v1  ;;  %v2722_v6 = vld [vmem:[%s2946_s21 + $0xb0] sm:$0xff]  ;;  %v2721_v10 = vld [vmem:[%s2946_s21 + $0xa8] sm:$0xff]  ;;  %s3108_s6 = scalar_lea.vmem %s3516_s4, %s2812_s29 }
  0x11   : > { %v2731_v3 = vld [vmem:[%s2946_s21 + $0xf8] sm:$0xff]  ;;  %687 = vmatpush.bf16.msra.mxu2 %v2723_v2  ;;  %v2730_v7 = vld [vmem:[%s2946_s21 + $0xf0] sm:$0xff]  ;;  %v2729_v11 = vld [vmem:[%s2946_s21 + $0xe8] sm:$0xff] }
  0x12   : > { %706 = vmatpush.bf16.msra.mxu3 %v2731_v3  ;;  %v2700_v12 = vld [vmem:[%s2946_s21 + $0x20] sm:$0xff]  ;;  %v2699_v16 = vld [vmem:[%s2946_s21 + $0x18] sm:$0xff]  ;;  %v2698_v20 = vld [vmem:[%s2946_s21 + $0x10] sm:$0xff] }
  0x13   : > { %419 = vmatpush.bf16.msra.mxu0 %v2702_v4  ;;  %v2708_v13 = vld [vmem:[%s2946_s21 + $0x60] sm:$0xff]  ;;  %v2707_v17 = vld [vmem:[%s2946_s21 + $0x58] sm:$0xff]  ;;  %v2706_v21 = vld [vmem:[%s2946_s21 + $0x50] sm:$0xff] }
  0x14   : > { %438 = vmatpush.bf16.msra.mxu1 %v2710_v5  ;;  %v2720_v14 = vld [vmem:[%s2946_s21 + $0xa0] sm:$0xff]  ;;  %v2719_v18 = vld [vmem:[%s2946_s21 + $0x98] sm:$0xff]  ;;  %v2718_v22 = vld [vmem:[%s2946_s21 + $0x90] sm:$0xff] }
  0x15   : > { %688 = vmatpush.bf16.msra.mxu2 %v2722_v6  ;;  %v2728_v15 = vld [vmem:[%s2946_s21 + $0xe0] sm:$0xff]  ;;  %v2727_v19 = vld [vmem:[%s2946_s21 + $0xd8] sm:$0xff]  ;;  %v2726_v23 = vld [vmem:[%s2946_s21 + $0xd0] sm:$0xff] }
  0x16   : > { %707 = vmatpush.bf16.msra.mxu3 %v2730_v7  ;;  %v2697_v24 = vld [vmem:[%s2946_s21 + $0x8] sm:$0xff]  ;;  %v2696_v28 = vld [vmem:[%s2946_s21] sm:$0xff]  ;;  %v2763_v40 = vld [vmem:[%s2946_s21 + $0x1b8] sm:$0xff] }
  0x17   : > { %420 = vmatpush.bf16.msra.mxu0 %v2701_v8  ;;  %v2705_v25 = vld [vmem:[%s2946_s21 + $0x48] sm:$0xff]  ;;  %v2704_v29 = vld [vmem:[%s2946_s21 + $0x40] sm:$0xff]  ;;  %v2771_v41 = vld [vmem:[%s2946_s21 + $0x1f8] sm:$0xff] }
  0x18   : > { %439 = vmatpush.bf16.msra.mxu1 %v2709_v9  ;;  %v2717_v26 = vld [vmem:[%s2946_s21 + $0x88] sm:$0xff]  ;;  %v2716_v30 = vld [vmem:[%s2946_s21 + $0x80] sm:$0xff]  ;;  %v2743_v46 = vld [vmem:[%s2946_s21 + $0x138] sm:$0xff] }
  0x19   : > { %689 = vmatpush.bf16.msra.mxu2 %v2721_v10  ;;  %v2725_v27 = vld [vmem:[%s2946_s21 + $0xc8] sm:$0xff]  ;;  %v2724_v31 = vld [vmem:[%s2946_s21 + $0xc0] sm:$0xff]  ;;  %v2751_v47 = vld [vmem:[%s2946_s21 + $0x178] sm:$0xff] }
  0x1a   : > { %708 = vmatpush.bf16.msra.mxu3 %v2729_v11  ;;  %v1965_v32 = vld [vmem:[%s2978_s25] sm:$0xf]  ;;  %v2693_v33 = vld [vmem:[%s2978_s25 + $0x4] sm:$0xf0]  ;;  %v2692_v34 = vld [vmem:[%s2978_s25 + $0x4] sm:$0xf] }
  0x1b   : > { %421 = vmatpush.bf16.msra.mxu0 %v2700_v12  ;;  %v1967_v35 = vld [vmem:[%s2978_s25 + $0x8] sm:$0xf0]  ;;  %v2089_v36 = vld [vmem:[%s2978_s25 + $0x20] sm:$0xf]  ;;  %v2713_v37 = vld [vmem:[%s2978_s25 + $0x24] sm:$0xf0]  ;;  %v1966_v42 = vor.u32 %v2693_v33, %v1965_v32 }
  0x1c   : > { %440 = vmatpush.bf16.msra.mxu1 %v2708_v13  ;;  %v2712_v38 = vld [vmem:[%s2978_s25 + $0x24] sm:$0xf]  ;;  %v2091_v39 = vld [vmem:[%s2978_s25 + $0x28] sm:$0xf0]  ;;  %v1970_v43 = vor.u32 %v2692_v34, %v1967_v35  ;;  %v2090_v44 = vor.u32 %v2713_v37, %v2089_v36  ;;  %v2762_v48 = vld [vmem:[%s2946_s21 + $0x1b0] sm:$0xff] }
  0x1d   : > { %690 = vmatpush.bf16.msra.mxu2 %v2720_v14  ;;  %v2094_v45 = vor.u32 %v2712_v38, %v2091_v39  ;;  %v2770_v49 = vld [vmem:[%s2946_s21 + $0x1f0] sm:$0xff]  ;;  %v2761_v52 = vld [vmem:[%s2946_s21 + $0x1a8] sm:$0xff]  ;;  %v2760_v56 = vld [vmem:[%s2946_s21 + $0x1a0] sm:$0xff] }
  0x1e   : > { %709 = vmatpush.bf16.msra.mxu3 %v2728_v15  ;;  %v2742_v50 = vld [vmem:[%s2946_s21 + $0x130] sm:$0xff]  ;;  %v2769_v53 = vld [vmem:[%s2946_s21 + $0x1e8] sm:$0xff]  ;;  %v2768_v57 = vld [vmem:[%s2946_s21 + $0x1e0] sm:$0xff] }
  0x1f   : > { %422 = vmatpush.bf16.msra.mxu0 %v2699_v16  ;;  %v2750_v51 = vld [vmem:[%s2946_s21 + $0x170] sm:$0xff]  ;;  %v2741_v54 = vld [vmem:[%s2946_s21 + $0x128] sm:$0xff]  ;;  %v2740_v58 = vld [vmem:[%s2946_s21 + $0x120] sm:$0xff] }
  0x20   : > { %441 = vmatpush.bf16.msra.mxu1 %v2707_v17  ;;  %v2749_v55 = vld [vmem:[%s2946_s21 + $0x168] sm:$0xff]  ;;  %v2748_v59 = vld [vmem:[%s2946_s21 + $0x160] sm:$0xff]  ;;  %v1973_v60 = vld [vmem:[%s2978_s25 + $0x10] sm:$0xf] }
  0x21   : > { %691 = vmatpush.bf16.msra.mxu2 %v2719_v18  ;;  %v2695_v61 = vld [vmem:[%s2978_s25 + $0x14] sm:$0xf0]  ;;  %v2694_v62 = vld [vmem:[%s2978_s25 + $0x14] sm:$0xf]  ;;  %v1975_v63 = vld [vmem:[%s2978_s25 + $0x18] sm:$0xf0] }
  0x22   : > { %710 = vmatpush.bf16.msra.mxu3 %v2727_v19  ;;  %v2097_v0 = vld [vmem:[%s2978_s25 + $0x30] sm:$0xf]  ;;  %v2715_v1 = vld [vmem:[%s2978_s25 + $0x34] sm:$0xf0]  ;;  %v2714_v2 = vld [vmem:[%s2978_s25 + $0x34] sm:$0xf]  ;;  %v1974_v6 = vor.u32 %v2695_v61, %v1973_v60  ;;  %v1978_v7 = vor.u32 %v2694_v62, %v1975_v63 }
  0x23   : > { %423 = vmatpush.bf16.msra.mxu0 %v2698_v20  ;;  %v2099_v3 = vld [vmem:[%s2978_s25 + $0x38] sm:$0xf0]  ;;  %v2098_v8 = vor.u32 %v2715_v1, %v2097_v0  ;;  %v2758_v12 = vld [vmem:[%s2946_s21 + $0x190] sm:$0xff]  ;;  %v2757_v16 = vld [vmem:[%s2946_s21 + $0x188] sm:$0xff] }
  0x24   : > { %442 = vmatpush.bf16.msra.mxu1 %v2706_v21  ;;  %v2759_v4 = vld [vmem:[%s2946_s21 + $0x198] sm:$0xff]  ;;  %v2102_v9 = vor.u32 %v2714_v2, %v2099_v3  ;;  %v2766_v13 = vld [vmem:[%s2946_s21 + $0x1d0] sm:$0xff]  ;;  %v2765_v17 = vld [vmem:[%s2946_s21 + $0x1c8] sm:$0xff] }
  0x25   : > { %692 = vmatpush.bf16.msra.mxu2 %v2718_v22  ;;  %v2767_v5 = vld [vmem:[%s2946_s21 + $0x1d8] sm:$0xff]  ;;  %v2738_v14 = vld [vmem:[%s2946_s21 + $0x110] sm:$0xff]  ;;  %v2737_v18 = vld [vmem:[%s2946_s21 + $0x108] sm:$0xff] }
  0x26   : > { %711 = vmatpush.bf16.msra.mxu3 %v2726_v23  ;;  %v2739_v10 = vld [vmem:[%s2946_s21 + $0x118] sm:$0xff]  ;;  %v2746_v15 = vld [vmem:[%s2946_s21 + $0x150] sm:$0xff]  ;;  %v2745_v19 = vld [vmem:[%s2946_s21 + $0x148] sm:$0xff] }
  0x27   : > { %424 = vmatpush.bf16.msra.mxu0 %v2697_v24  ;;  %v2747_v11 = vld [vmem:[%s2946_s21 + $0x158] sm:$0xff]  ;;  %v2756_v20 = vld [vmem:[%s2946_s21 + $0x180] sm:$0xff]  ;;  %v2349_v33 = vld [vmem:[%s2978_s25 + $0x68] sm:$0xf0] }
  0x28   : > { %443 = vmatpush.bf16.msra.mxu1 %v2705_v25  ;;  %v2764_v21 = vld [vmem:[%s2946_s21 + $0x1c0] sm:$0xff]  ;;  %v2803_v25 = vld [vmem:[%s2946_s21 + $0x2b8] sm:$0xff]  ;;  %v2802_v36 = vld [vmem:[%s2946_s21 + $0x2b0] sm:$0xff] }
  0x29   : > { %693 = vmatpush.bf16.msra.mxu2 %v2717_v26  ;;  %v2736_v22 = vld [vmem:[%s2946_s21 + $0x100] sm:$0xff]  ;;  %v2811_v26 = vld [vmem:[%s2946_s21 + $0x2f8] sm:$0xff]  ;;  %v2810_v37 = vld [vmem:[%s2946_s21 + $0x2f0] sm:$0xff] }
  0x2a   : > { %712 = vmatpush.bf16.msra.mxu3 %v2725_v27  ;;  %v2744_v23 = vld [vmem:[%s2946_s21 + $0x140] sm:$0xff]  ;;  %v2733_v27 = vld [vmem:[%s2978_s25 + $0x44] sm:$0xf0]  ;;  %v2783_v34 = vld [vmem:[%s2946_s21 + $0x238] sm:$0xff] }
  0x2b   : > { %425 = vmatpush.bf16.msra.mxu0 %v2696_v28  ;;  %v2218_v24 = vld [vmem:[%s2978_s25 + $0x40] sm:$0xf]  ;;  %v2732_v28 = vld [vmem:[%s2978_s25 + $0x44] sm:$0xf]  ;;  %v2791_v35 = vld [vmem:[%s2946_s21 + $0x278] sm:$0xff] }
  0x2c   : > { %444 = vmatpush.bf16.msra.mxu1 %v2704_v29  ;;  %v2220_v29 = vld [vmem:[%s2978_s25 + $0x48] sm:$0xf0]  ;;  %v2752_v32 = vld [vmem:[%s2978_s25 + $0x64] sm:$0xf]  ;;  %v2219_v38 = vor.u32 %v2733_v27, %v2218_v24  ;;  %v2754_v60 = vld [vmem:[%s2978_s25 + $0x74] sm:$0xf] }
  0x2d   : > { %694 = vmatpush.bf16.msra.mxu2 %v2716_v30  ;;  %v2347_v30 = vld [vmem:[%s2978_s25 + $0x60] sm:$0xf]  ;;  %v2223_v39 = vor.u32 %v2732_v28, %v2220_v29  ;;  %v2357_v61 = vld [vmem:[%s2978_s25 + $0x78] sm:$0xf0]  ;;  %v2798_v0 = vld [vmem:[%s2946_s21 + $0x290] sm:$0xff] }
  0x2e   : > { %713 = vmatpush.bf16.msra.mxu3 %v2724_v31  ;;  %426 = vmatmul.bf16.vlgmr.msra.gmra.mxu0 %v1966_v42  ;;  %v2753_v31 = vld [vmem:[%s2978_s25 + $0x64] sm:$0xf0]  ;;  %v2782_v42 = vld [vmem:[%s2946_s21 + $0x230] sm:$0xff]  ;;  %v2779_v62 = vld [vmem:[%s2946_s21 + $0x218] sm:$0xff] }
  0x2f   : > { %445 = vmatmul.bf16.vlgmr.msra.gmra.mxu1 %v1970_v43  ;;  %957 = vmatpush.bf16.msrb.mxu0 %v2743_v46  ;;  %v2790_v43 = vld [vmem:[%s2946_s21 + $0x270] sm:$0xff]  ;;  %v2781_v46 = vld [vmem:[%s2946_s21 + $0x228] sm:$0xff]  ;;  %v2787_v63 = vld [vmem:[%s2946_s21 + $0x258] sm:$0xff] }
  0x30   : > { %695 = vmatmul.bf16.vlgmr.msra.gmra.mxu2 %v2090_v44  ;;  %976 = vmatpush.bf16.msrb.mxu1 %v2751_v47  ;;  %v2801_v44 = vld [vmem:[%s2946_s21 + $0x2a8] sm:$0xff]  ;;  %v2806_v1 = vld [vmem:[%s2946_s21 + $0x2d0] sm:$0xff]  ;;  %v2775_v29 = vld [vmem:[%s2978_s25 + $0x94] sm:$0xf0] }
  0x31   : > { %1227 = vmatpush.bf16.msrb.mxu2 %v2763_v40  ;;  %714 = vmatmul.bf16.vlgmr.msra.gmra.mxu3 %v2094_v45  ;;  %v2348_v40 = vor.u32 %v2753_v31, %v2347_v30  ;;  %v2809_v45 = vld [vmem:[%s2946_s21 + $0x2e8] sm:$0xff]  ;;  %v2484_v28 = vld [vmem:[%s2978_s25 + $0x90] sm:$0xf]  ;;  %v2774_v30 = vld [vmem:[%s2978_s25 + $0x94] sm:$0xf] }
  0x32   : > { %1246 = vmatpush.bf16.msrb.mxu3 %v2771_v41  ;;  %v2352_v41 = vor.u32 %v2752_v32, %v2349_v33  ;;  %v2789_v47 = vld [vmem:[%s2946_s21 + $0x268] sm:$0xff]  ;;  %v2486_v31 = vld [vmem:[%s2978_s25 + $0x98] sm:$0xf0]  ;;  %v2613_v32 = vld [vmem:[%s2978_s25 + $0xb0] sm:$0xf] }
  0x33   : > { %958 = vmatpush.bf16.msrb.mxu0 %v2742_v50  ;;  %v2780_v50 = vld [vmem:[%s2946_s21 + $0x220] sm:$0xff]  ;;  %v2795_v33 = vld [vmem:[%s2978_s25 + $0xb4] sm:$0xf0] }
  0x34   : > { %977 = vmatpush.bf16.msrb.mxu1 %v2750_v51  ;;  %v2788_v51 = vld [vmem:[%s2946_s21 + $0x260] sm:$0xff] }
  0x35   : > { %1228 = vmatpush.bf16.msrb.mxu2 %v2762_v48  ;;  %v2800_v48 = vld [vmem:[%s2946_s21 + $0x2a0] sm:$0xff] }
  0x36   : > { %1247 = vmatpush.bf16.msrb.mxu3 %v2770_v49  ;;  %v2808_v49 = vld [vmem:[%s2946_s21 + $0x2e0] sm:$0xff] }
  0x37   : > { %959 = vmatpush.bf16.msrb.mxu0 %v2741_v54  ;;  %v2807_v54 = vld [vmem:[%s2946_s21 + $0x2d8] sm:$0xff] }
  0x38   : > { %978 = vmatpush.bf16.msrb.mxu1 %v2749_v55  ;;  %v2735_v55 = vld [vmem:[%s2978_s25 + $0x54] sm:$0xf0] }
  0x39   : > { %1229 = vmatpush.bf16.msrb.mxu2 %v2761_v52  ;;  %v2226_v52 = vld [vmem:[%s2978_s25 + $0x50] sm:$0xf] }
  0x3a   : > { %1248 = vmatpush.bf16.msrb.mxu3 %v2769_v53  ;;  %v2799_v53 = vld [vmem:[%s2946_s21 + $0x298] sm:$0xff]  ;;  %v2227_v2 = vor.u32 %v2735_v55, %v2226_v52  ;;  %v2821_v55 = vld [vmem:[%s3004_s28] ss:$0 sm:$0xff] }
  0x3b   : > { %960 = vmatpush.bf16.msrb.mxu0 %v2740_v58  ;;  %v2355_v58 = vld [vmem:[%s2978_s25 + $0x70] sm:$0xf] }
  0x3c   : > { %979 = vmatpush.bf16.msrb.mxu1 %v2748_v59  ;;  %v2755_v59 = vld [vmem:[%s2978_s25 + $0x74] sm:$0xf0] }
  0x3d   : > { %1230 = vmatpush.bf16.msrb.mxu2 %v2760_v56  ;;  %v2734_v56 = vld [vmem:[%s2978_s25 + $0x54] sm:$0xf] }
  0x3e   : > { %1249 = vmatpush.bf16.msrb.mxu3 %v2768_v57  ;;  %431 = vmatmul.bf16.gmra.mxu0 %v1974_v6  ;;  %v2228_v57 = vld [vmem:[%s2978_s25 + $0x58] sm:$0xf0]  ;;  %v2778_v6 = vld [vmem:[%s2946_s21 + $0x210] sm:$0xff] }
  0x3f   : > { %450 = vmatmul.bf16.gmra.mxu1 %v1978_v7  ;;  %961 = vmatpush.bf16.msrb.mxu0 %v2739_v10  ;;  %v2231_v3 = vor.u32 %v2734_v56, %v2228_v57  ;;  %v2786_v7 = vld [vmem:[%s2946_s21 + $0x250] sm:$0xff]  ;;  %v2777_v10 = vld [vmem:[%s2946_s21 + $0x208] sm:$0xff] }
  0x40   : > { %700 = vmatmul.bf16.gmra.mxu2 %v2098_v8  ;;  %980 = vmatpush.bf16.msrb.mxu1 %v2747_v11  ;;  %v2797_v8 = vld [vmem:[%s2946_s21 + $0x288] sm:$0xff] }
  0x41   : > { %1231 = vmatpush.bf16.msrb.mxu2 %v2759_v4  ;;  %719 = vmatmul.bf16.gmra.mxu3 %v2102_v9  ;;  %v2356_v4 = vor.u32 %v2755_v59, %v2355_v58  ;;  %v2805_v9 = vld [vmem:[%s2946_s21 + $0x2c8] sm:$0xff] }
  0x42   : > { %1250 = vmatpush.bf16.msrb.mxu3 %v2767_v5  ;;  %v2360_v5 = vor.u32 %v2754_v60, %v2357_v61  ;;  %v2785_v11 = vld [vmem:[%s2946_s21 + $0x248] sm:$0xff] }
  0x43   : > { %962 = vmatpush.bf16.msrb.mxu0 %v2738_v14  ;;  %v2776_v14 = vld [vmem:[%s2946_s21 + $0x200] sm:$0xff] }
  0x44   : > { %981 = vmatpush.bf16.msrb.mxu1 %v2746_v15  ;;  %v2784_v15 = vld [vmem:[%s2946_s21 + $0x240] sm:$0xff] }
  0x45   : > { %1232 = vmatpush.bf16.msrb.mxu2 %v2758_v12  ;;  %v2796_v12 = vld [vmem:[%s2946_s21 + $0x280] sm:$0xff] }
  0x46   : > { %1251 = vmatpush.bf16.msrb.mxu3 %v2766_v13  ;;  %v2804_v13 = vld [vmem:[%s2946_s21 + $0x2c0] sm:$0xff] }
  0x47   : > { %963 = vmatpush.bf16.msrb.mxu0 %v2737_v18  ;;  %v2772_v18 = vld [vmem:[%s2978_s25 + $0x84] sm:$0xf] }
  0x48   : > { %982 = vmatpush.bf16.msrb.mxu1 %v2745_v19  ;;  %v2478_v19 = vld [vmem:[%s2978_s25 + $0x88] sm:$0xf0] }
  0x49   : > { %1233 = vmatpush.bf16.msrb.mxu2 %v2757_v16  ;;  %v2476_v16 = vld [vmem:[%s2978_s25 + $0x80] sm:$0xf] }
  0x4a   : > { %1252 = vmatpush.bf16.msrb.mxu3 %v2765_v17  ;;  %v2773_v17 = vld [vmem:[%s2978_s25 + $0x84] sm:$0xf0] }
  0x4b   : > { %964 = vmatpush.bf16.msrb.mxu0 %v2736_v22  ;;  %v2792_v22 = vld [vmem:[%s2978_s25 + $0xa4] sm:$0xf]  ;;  %v2477_v24 = vor.u32 %v2773_v17, %v2476_v16 }
  0x4c   : > { %983 = vmatpush.bf16.msrb.mxu1 %v2744_v23  ;;  %v2607_v23 = vld [vmem:[%s2978_s25 + $0xa8] sm:$0xf0] }
  0x4d   : > { %1234 = vmatpush.bf16.msrb.mxu2 %v2756_v20  ;;  %v2605_v20 = vld [vmem:[%s2978_s25 + $0xa0] sm:$0xf]  ;;  %v2610_v27 = vor.u32 %v2792_v22, %v2607_v23 }
  0x4e   : > { %1253 = vmatpush.bf16.msrb.mxu3 %v2764_v21  ;;  %965 = vmatmul.bf16.vlgmr.msrb.gmra.mxu0 %v2219_v38  ;;  %v2793_v21 = vld [vmem:[%s2978_s25 + $0xa4] sm:$0xf0]  ;;  %v2614_v38 = vor.u32 %v2795_v33, %v2613_v32 }
  0x4f   : > { %1497 = vmatpush.bf16.msra.mxu0 %v2783_v34  ;;  %984 = vmatmul.bf16.vlgmr.msrb.gmra.mxu1 %v2223_v39  ;;  %v2794_v34 = vld [vmem:[%s2978_s25 + $0xb4] sm:$0xf] }
  0x50   : > { %1516 = vmatpush.bf16.msra.mxu1 %v2791_v35  ;;  %1235 = vmatmul.bf16.vlgmr.msrb.gmra.mxu2 %v2348_v40  ;;  %v2615_v35 = vld [vmem:[%s2978_s25 + $0xb8] sm:$0xf0]  ;;  %v3113_v40 = vld [vmem:[%s3512_s0] sm:$0xff] }
  0x51   : > { %1767 = vmatpush.bf16.msra.mxu2 %v2803_v25  ;;  %1254 = vmatmul.bf16.vlgmr.msrb.gmra.mxu3 %v2352_v41  ;;  %v2481_v25 = vor.u32 %v2772_v18, %v2478_v19  ;;  %v2618_v39 = vor.u32 %v2794_v34, %v2615_v35  ;;  %v3118_v41 = vld [vmem:[%s3512_s0 + $0x8] sm:$0xff]  ;;  %258 = vst [vmem:[%s3108_s6] sm:$0xff] %v3113_v40 }
  0x52   : > { %1786 = vmatpush.bf16.msra.mxu3 %v2811_v26  ;;  %v2606_v26 = vor.u32 %v2793_v21, %v2605_v20  ;;  %259 = vst [vmem:[%s3108_s6 + $0x8] sm:$0xff] %v3118_v41 }
  0x53   : > { %1498 = vmatpush.bf16.msra.mxu0 %v2782_v42  ;;  %v3123_v42 = vld [vmem:[%s3512_s0 + $0x10] sm:$0xff]  ;;  %2043 = vst [vmem:[%s3108_s6 + $0x60] sm:$0xff] %v3113_v40 }
  0x54   : > { %1517 = vmatpush.bf16.msra.mxu1 %v2790_v43  ;;  %v3128_v43 = vld [vmem:[%s3512_s0 + $0x18] sm:$0xff]  ;;  %260 = vst [vmem:[%s3108_s6 + $0x10] sm:$0xff] %v3123_v42 }
  0x55   : > { %1768 = vmatpush.bf16.msra.mxu2 %v2802_v36  ;;  %v2485_v36 = vor.u32 %v2775_v29, %v2484_v28  ;;  %261 = vst [vmem:[%s3108_s6 + $0x18] sm:$0xff] %v3128_v43 }
  0x56   : > { %1787 = vmatpush.bf16.msra.mxu3 %v2810_v37  ;;  %v2489_v37 = vor.u32 %v2774_v30, %v2486_v31  ;;  %2044 = vst [vmem:[%s3108_s6 + $0x68] sm:$0xff] %v3118_v41 }
  0x57   : > { %1499 = vmatpush.bf16.msra.mxu0 %v2781_v46  ;;  %v3149_v46 = vld [vmem:[%s3512_s0 + $0x30] sm:$0xff]  ;;  %2045 = vst [vmem:[%s3108_s6 + $0x70] sm:$0xff] %v3123_v42 }
  0x58   : > { %1518 = vmatpush.bf16.msra.mxu1 %v2789_v47  ;;  %v3156_v47 = vld [vmem:[%s3512_s0 + $0x38] sm:$0xff]  ;;  %264 = vst [vmem:[%s3108_s6 + $0x40] sm:$0xff] %v3149_v46 }
  0x59   : > { %1769 = vmatpush.bf16.msra.mxu2 %v2801_v44  ;;  %v3135_v44 = vld [vmem:[%s3512_s0 + $0x20] sm:$0xff]  ;;  %265 = vst [vmem:[%s3108_s6 + $0x48] sm:$0xff] %v3156_v47 }
  0x5a   : > { %1788 = vmatpush.bf16.msra.mxu3 %v2809_v45  ;;  %v3142_v45 = vld [vmem:[%s3512_s0 + $0x28] sm:$0xff]  ;;  %262 = vst [vmem:[%s3108_s6 + $0x30] sm:$0xff] %v3135_v44 }
  0x5b   : > { %1500 = vmatpush.bf16.msra.mxu0 %v2780_v50  ;;  %263 = vst [vmem:[%s3108_s6 + $0x38] sm:$0xff] %v3142_v45 }
  0x5c   : > { %1519 = vmatpush.bf16.msra.mxu1 %v2788_v51  ;;  %2046 = vst [vmem:[%s3108_s6 + $0x78] sm:$0xff] %v3128_v43 }
  0x5d   : > { %1770 = vmatpush.bf16.msra.mxu2 %v2800_v48  ;;  %2047 = vst [vmem:[%s3108_s6 + $0x90] sm:$0xff] %v3135_v44 }
  0x5e   : > { %1789 = vmatpush.bf16.msra.mxu3 %v2808_v49  ;;  %970 = vmatmul.bf16.gmra.mxu0 %v2227_v2  ;;  %2048 = vst [vmem:[%s3108_s6 + $0x98] sm:$0xff] %v3142_v45 }
  0x5f   : > { %1501 = vmatpush.bf16.msra.mxu0 %v2779_v62  ;;  %989 = vmatmul.bf16.gmra.mxu1 %v2231_v3  ;;  %2049 = vst [vmem:[%s3108_s6 + $0xa0] sm:$0xff] %v3149_v46 }
  0x60   : > { %1520 = vmatpush.bf16.msra.mxu1 %v2787_v63  ;;  %1240 = vmatmul.bf16.gmra.mxu2 %v2356_v4  ;;  %2050 = vst [vmem:[%s3108_s6 + $0xa8] sm:$0xff] %v3156_v47  ;;  %v2822_v63 = vld [vmem:[%s3004_s28 + $0x1] ss:$0 sm:$0xff] }
  0x61   : > { %1771 = vmatpush.bf16.msra.mxu2 %v2799_v53  ;;  %1259 = vmatmul.bf16.gmra.mxu3 %v2360_v5  ;;  %2172 = vst [vmem:[%s3108_s6 + $0xc0] sm:$0xff] %v3113_v40 }
  0x62   : > { %1790 = vmatpush.bf16.msra.mxu3 %v2807_v54  ;;  %2173 = vst [vmem:[%s3108_s6 + $0xc8] sm:$0xff] %v3118_v41 }
  0x63   : > { %1502 = vmatpush.bf16.msra.mxu0 %v2778_v6  ;;  %2174 = vst [vmem:[%s3108_s6 + $0xd0] sm:$0xff] %v3123_v42 }
  0x64   : > { %1521 = vmatpush.bf16.msra.mxu1 %v2786_v7  ;;  %2175 = vst [vmem:[%s3108_s6 + $0xd8] sm:$0xff] %v3128_v43 }
  0x65   : > { %1772 = vmatpush.bf16.msra.mxu2 %v2798_v0  ;;  %2176 = vst [vmem:[%s3108_s6 + $0xf0] sm:$0xff] %v3135_v44 }
  0x66   : > { %1791 = vmatpush.bf16.msra.mxu3 %v2806_v1  ;;  %2177 = vst [vmem:[%s3108_s6 + $0xf8] sm:$0xff] %v3142_v45 }
  0x67   : > { %1503 = vmatpush.bf16.msra.mxu0 %v2777_v10  ;;  %2178 = vst [vmem:[%s3108_s6 + $0x100] sm:$0xff] %v3149_v46 }
  0x68   : > { %1522 = vmatpush.bf16.msra.mxu1 %v2785_v11  ;;  %2179 = vst [vmem:[%s3108_s6 + $0x108] sm:$0xff] %v3156_v47 }
  0x69   : > { %1773 = vmatpush.bf16.msra.mxu2 %v2797_v8  ;;  %2301 = vst [vmem:[%s3108_s6 + $0x120] sm:$0xff] %v3113_v40 }
  0x6a   : > { %1792 = vmatpush.bf16.msra.mxu3 %v2805_v9  ;;  %2302 = vst [vmem:[%s3108_s6 + $0x128] sm:$0xff] %v3118_v41 }
  0x6b   : > { %1504 = vmatpush.bf16.msra.mxu0 %v2776_v14  ;;  %2303 = vst [vmem:[%s3108_s6 + $0x130] sm:$0xff] %v3123_v42 }
  0x6c   : > { %1523 = vmatpush.bf16.msra.mxu1 %v2784_v15  ;;  %2304 = vst [vmem:[%s3108_s6 + $0x138] sm:$0xff] %v3128_v43 }
  0x6d   : > { %1774 = vmatpush.bf16.msra.mxu2 %v2796_v12  ;;  %2305 = vst [vmem:[%s3108_s6 + $0x150] sm:$0xff] %v3135_v44 }
  0x6e   : > { %1793 = vmatpush.bf16.msra.mxu3 %v2804_v13  ;;  %1505 = vmatmul.bf16.vlgmr.msra.gmra.mxu0 %v2477_v24  ;;  %2306 = vst [vmem:[%s3108_s6 + $0x158] sm:$0xff] %v3142_v45 }
  0x6f   : > { %1524 = vmatmul.bf16.vlgmr.msra.gmra.mxu1 %v2481_v25  ;;  %2307 = vst [vmem:[%s3108_s6 + $0x160] sm:$0xff] %v3149_v46 }
  0x70   : > { %1775 = vmatmul.bf16.vlgmr.msra.gmra.mxu2 %v2606_v26  ;;  %2308 = vst [vmem:[%s3108_s6 + $0x168] sm:$0xff] %v3156_v47 }
  0x71   : > { %1794 = vmatmul.bf16.vlgmr.msra.gmra.mxu3 %v2610_v27  ;;  %2430 = vst [vmem:[%s3108_s6 + $0x180] sm:$0xff] %v3113_v40 }
  0x72   : > { %2431 = vst [vmem:[%s3108_s6 + $0x188] sm:$0xff] %v3118_v41 }
  0x73   : > { %2432 = vst [vmem:[%s3108_s6 + $0x190] sm:$0xff] %v3123_v42 }
  0x74   : > { %2433 = vst [vmem:[%s3108_s6 + $0x198] sm:$0xff] %v3128_v43 }
  0x75   : > { %2434 = vst [vmem:[%s3108_s6 + $0x1b0] sm:$0xff] %v3135_v44 }
  0x76   : > { %2435 = vst [vmem:[%s3108_s6 + $0x1b8] sm:$0xff] %v3142_v45 }
  0x77   : > { %2436 = vst [vmem:[%s3108_s6 + $0x1c0] sm:$0xff] %v3149_v46 }
  0x78   : > { %2437 = vst [vmem:[%s3108_s6 + $0x1c8] sm:$0xff] %v3156_v47 }
  0x79   : > { %2559 = vst [vmem:[%s3108_s6 + $0x1e0] sm:$0xff] %v3113_v40 }
  0x7a   : > { %2560 = vst [vmem:[%s3108_s6 + $0x1e8] sm:$0xff] %v3118_v41 }
  0x7b   : > { %2561 = vst [vmem:[%s3108_s6 + $0x1f0] sm:$0xff] %v3123_v42 }
  0x7c   : > { %2562 = vst [vmem:[%s3108_s6 + $0x1f8] sm:$0xff] %v3128_v43 }
  0x7d   : > { %2563 = vst [vmem:[%s3108_s6 + $0x210] sm:$0xff] %v3135_v44 }
  0x7e   : > { %1510 = vmatmul.bf16.gmra.mxu0 %v2485_v36  ;;  %2564 = vst [vmem:[%s3108_s6 + $0x218] sm:$0xff] %v3142_v45 }
  0x7f   : > { %1529 = vmatmul.bf16.gmra.mxu1 %v2489_v37  ;;  %2565 = vst [vmem:[%s3108_s6 + $0x220] sm:$0xff] %v3149_v46 }
  0x80   : > { %1780 = vmatmul.bf16.gmra.mxu2 %v2614_v38  ;;  %2566 = vst [vmem:[%s3108_s6 + $0x228] sm:$0xff] %v3156_v47 }
  0x81   : > { %1799 = vmatmul.bf16.gmra.mxu3 %v2618_v39 }
  0xab   : > { %v427_v48 = vpop.f32.mrf.mxu0 }
  0xac   : > { %v446_v49 = vpop.f32.mrf.mxu1 }
  0xad   : > { %v447_v54 = vadd.f32 %v446_v49, %v427_v48 }
  0xaf   : > { %v460_v56 = vadd.f32 %v2821_v55, %v447_v54 }
  0xb1   : > { %v464_v1 = vmul.f32 0.01, %v460_v56 }
  0xb3   : > { %v696_v50 = vpop.f32.mrf.mxu2  ;;  %v429_v52 = vpop.f32.mrf.mxu0  ;;  %v468_v6 = vmax.f32 %v460_v56, %v464_v1 }
  0xb4   : > { %v715_v51 = vpop.f32.mrf.mxu3  ;;  %v448_v53 = vpop.f32.mrf.mxu1 }
  0xb5   : > { %v716_v62 = vadd.f32 %v715_v51, %v696_v50  ;;  %v449_v0 = vadd.f32 %v448_v53, %v429_v52 }
  0xb7   : > { %v730_v4 = vadd.f32 %v2822_v63, %v716_v62  ;;  %v461_v5 = vadd.f32 %v2821_v55, %v449_v0  ;;  %v3258_v62 = vld [vmem:[%s3004_s28 + $0x3] ss:$0 sm:$0xff] }
  0xb9   : > { %v734_v15 = vmul.f32 0.01, %v730_v4  ;;  %v465_v16 = vmul.f32 0.01, %v461_v5 }
  0xbb   : > { %v698_v57 = vpop.f32.mrf.mxu2  ;;  %v432_v59 = vpop.f32.mrf.mxu0  ;;  %v738_v25 = vmax.f32 %v730_v4, %v734_v15  ;;  %v469_v28 = vmax.f32 %v461_v5, %v465_v16 }
  0xbc   : > { %v717_v58 = vpop.f32.mrf.mxu3  ;;  %v451_v60 = vpop.f32.mrf.mxu1 }
  0xbd   : > { %v452_v61 = vadd.f32 %v451_v60, %v432_v59  ;;  %v718_v18 = vadd.f32 %v717_v58, %v698_v57  ;;  %v3255_v58 = vld [vmem:[%s3004_s28 + $0x2] ss:$0 sm:$0xff] }
  0xbf   : > { %v462_v2 = vadd.f32 %v2821_v55, %v452_v61  ;;  %v731_v29 = vadd.f32 %v2822_v63, %v718_v18 }
  0xc1   : > { %v466_v3 = vmul.f32 0.01, %v462_v2  ;;  %v735_v48 = vmul.f32 0.01, %v731_v29 }
  0xc3   : > { %v470_v7 = vmax.f32 %v462_v2, %v466_v3  ;;  %v701_v8 = vpop.f32.mrf.mxu2  ;;  %v434_v11 = vpop.f32.mrf.mxu0 }
  0xc4   : > { %v720_v9 = vpop.f32.mrf.mxu3  ;;  %v453_v12 = vpop.f32.mrf.mxu1 }
  0xc5   : > { %v721_v10 = vadd.f32 %v720_v9, %v701_v8  ;;  %v472_v13 = vmax.f32 %v468_v6, %v470_v7  ;;  %v454_v14 = vadd.f32 %v453_v12, %v434_v11 }
  0xc7   : > { %v732_v17 = vadd.f32 %v2822_v63, %v721_v10  ;;  %v474_v19 = vsub.f32 %v468_v6, %v472_v13  ;;  %v476_v20 = vsub.f32 %v470_v7, %v472_v13  ;;  %v463_v21 = vadd.f32 %v2821_v55, %v454_v14 }
  0xc8   : > { %v739_v55 = vmax.f32 %v731_v29, %v735_v48 }
  0xc9   : > { %v736_v22 = vmul.f32 0.01, %v732_v17  ;;  %v478_v23 = vmul.f32 1.442695, %v474_v19  ;;  %v482_v24 = vmul.f32 1.442695, %v476_v20 }
  0xca   : > { %v467_v27 = vmul.f32 0.01, %v463_v21 }
  0xcb   : > { %v740_v26 = vmax.f32 %v732_v17, %v736_v22  ;;  %2827 = vpow2.f32 %v478_v23  ;;  %v703_v30 = vpop.f32.mrf.mxu2  ;;  %v966_v35 = vpop.f32.mrf.mxu0 }
  0xcc   : > { %v722_v31 = vpop.f32.mrf.mxu3  ;;  %2829 = vpow2.f32 %v482_v24  ;;  %v471_v33 = vmax.f32 %v463_v21, %v467_v27  ;;  %v985_v36 = vpop.f32.mrf.mxu1 }
  0xcd   : > { %v742_v32 = vmax.f32 %v738_v25, %v740_v26  ;;  %v723_v34 = vadd.f32 %v722_v31, %v703_v30  ;;  %v986_v46 = vadd.f32 %v985_v36, %v966_v35 }
  0xce   : > { %v473_v39 = vmax.f32 %v469_v28, %v471_v33 }
  0xcf   : > { %v744_v37 = vsub.f32 %v738_v25, %v742_v32  ;;  %v746_v38 = vsub.f32 %v740_v26, %v742_v32  ;;  %v733_v40 = vadd.f32 %v2822_v63, %v723_v34  ;;  %v1000_v4 = vadd.f32 %v3255_v58, %v986_v46 }
  0xd0   : > { %v475_v50 = vsub.f32 %v469_v28, %v473_v39  ;;  %v477_v51 = vsub.f32 %v471_v33, %v473_v39 }
  0xd1   : > { %v748_v41 = vmul.f32 1.442695, %v744_v37  ;;  %v752_v49 = vmul.f32 1.442695, %v746_v38  ;;  %v3244_v42 = vpop.eup %2827  ;;  %v737_v43 = vmul.f32 0.01, %v733_v40 }
  0xd2   : > { %v3248_v52 = vpop.eup %2829  ;;  %v480_v53 = vmul.f32 1.442695, %v475_v50  ;;  %v484_v54 = vmul.f32 1.442695, %v477_v51  ;;  %v1004_v17 = vmul.f32 0.01, %v1000_v4 }
  0xd3   : > { %2831 = vpow2.f32 %v748_v41  ;;  %v486_v44 = vadd.f32 %v3248_v52, %v3244_v42  ;;  %v741_v45 = vmax.f32 %v733_v40, %v737_v43  ;;  %v1236_v56 = vpop.f32.mrf.mxu2  ;;  %v968_v59 = vpop.f32.mrf.mxu0 }
  0xd4   : > { %2833 = vpow2.f32 %v752_v49  ;;  %v1255_v57 = vpop.f32.mrf.mxu3  ;;  %v987_v60 = vpop.f32.mrf.mxu1  ;;  %v3282_v27 = vmax.f32 %v1000_v4, %v1004_v17 }
  0xd5   : > { %2835 = vpow2.f32 %v480_v53  ;;  %v743_v47 = vmax.f32 %v739_v55, %v741_v45  ;;  %v1256_v61 = vadd.f32 %v1255_v57, %v1236_v56  ;;  %v988_v2 = vadd.f32 %v987_v60, %v968_v59 }
  0xd6   : > { %2837 = vrcp.f32 %v486_v44  ;;  %v497_v21 = vand.u32 2147483647, %v486_v44  ;;  %v499_v22 = vand.u32 2147483648, %v486_v44  ;;  %vm493_vm1 = vweird.f32 %v486_v44 }
  0xd7   : > { %2839 = vpow2.f32 %v484_v54  ;;  %v745_v0 = vsub.f32 %v739_v55, %v743_v47  ;;  %v747_v1 = vsub.f32 %v741_v45, %v743_v47  ;;  %v1270_v10 = vadd.f32 %v3258_v62, %v1256_v61 }
  0xd8   : > { %v1001_v13 = vadd.f32 %v3255_v58, %v988_v2  ;;  %vm3284_vm2 = vcmp.eq.f32.partialorder %v497_v21, 8.507059e+37  ;;  %v500_v32 = vor.u32 1.1754944e-38, %v499_v22 }
  0xd9   : > { %v3260_v63 = vpop.eup %2831  ;;  %v750_v7 = vmul.f32 1.442695, %v745_v0  ;;  %v754_v8 = vmul.f32 1.442695, %v747_v1  ;;  %v1274_v23 = vmul.f32 0.01, %v1270_v10 }
  0xda   : > { %v3262_v3 = vpop.eup %2833  ;;  %v1005_v26 = vmul.f32 0.01, %v1001_v13 }
  0xdb   : > { %v3265_v5 = vpop.eup %2835  ;;  %v3269_v6 = vadd.f32 %v3262_v3, %v3260_v63  ;;  %v1238_v14 = vpop.f32.mrf.mxu2  ;;  %v3293_v36 = vmax.f32 %v1270_v10, %v1274_v23 }
  0xdc   : > { %v2838_v9 = vpop.eup %2837  ;;  %v1257_v15 = vpop.f32.mrf.mxu3  ;;  %v3303_v41 = vmax.f32 %v1001_v13, %v1005_v26 }
  0xdd   : > { %v3272_v11 = vpop.eup %2839  ;;  %v489_v12 = vmul.f32 %v2838_v9, %v486_v44  ;;  %2841 = vrcp.f32 %v3269_v6  ;;  %v971_v18 = vpop.f32.mrf.mxu0  ;;  %vm494_vm0 = vweird.f32 %v2838_v9  ;;  %v767_v25 = vand.u32 2147483647, %v3269_v6 }
  0xde   : > { %v3278_v16 = vadd.f32 %v3272_v11, %v3265_v5  ;;  %2843 = vpow2.f32 %v750_v7  ;;  %v990_v19 = vpop.f32.mrf.mxu1  ;;  %vm763_vm3 = vweird.f32 %v3269_v6  ;;  %vm495_vm4 = vmor %vm493_vm1, %vm494_vm0  ;;  %v769_v35 = vand.u32 2147483648, %v3269_v6 }
  0xdf   : > { %v490_v20 = vsub.f32 1.0, %v489_v12  ;;  %2845 = vpow2.f32 %v754_v8  ;;  %v991_v28 = vadd.f32 %v990_v19, %v971_v18  ;;  %vm3298_vm5 = vcmp.eq.f32.partialorder %v767_v25, 8.507059e+37 }
  0xe0   : > { %2847 = vrcp.f32 %v3278_v16  ;;  %v512_v48 = vand.u32 2147483647, %v3278_v16  ;;  %v514_v59 = vand.u32 2147483648, %v3278_v16  ;;  %v1258_v47 = vadd.f32 %v1257_v15, %v1238_v14 }
  0xe1   : > { %v491_v24 = vmul.f32 %v2838_v9, %v490_v20  ;;  %v1002_v37 = vadd.f32 %v3255_v58, %v991_v28  ;;  %v770_v61 = vor.u32 1.1754944e-38, %v769_v35  ;;  %vm508_vm7 = vweird.f32 %v3278_v16 }
  0xe2   : > { %vm3319_vm8 = vcmp.eq.f32.partialorder %v512_v48, 8.507059e+37  ;;  %v515_v8 = vor.u32 1.1754944e-38, %v514_v59  ;;  %v3327_v12 = vadd.f32 %v3258_v62, %v1258_v47 }
  0xe3   : > { %v2842_v29 = vpop.eup %2841  ;;  %v492_v30 = vadd.f32 %v2838_v9, %v491_v24  ;;  %v1241_v49 = vpop.f32.mrf.mxu2  ;;  %v1006_v44 = vmul.f32 0.01, %v1002_v37 }
  0xe4   : > { %v3289_v33 = vpop.eup %2843  ;;  %v759_v34 = vmul.f32 %v2842_v29, %v3269_v6  ;;  %v1260_v50 = vpop.f32.mrf.mxu3  ;;  %vm764_vm6 = vweird.f32 %v2842_v29 }
  0xe5   : > { %v3296_v38 = vpop.eup %2845  ;;  %v496_v39 = vsel %vm495_vm4, %v2838_v9, %v492_v30  ;;  %v973_v45 = vpop.f32.mrf.mxu0  ;;  %v1010_v1 = vmax.f32 %v1002_v37, %v1006_v44  ;;  %vm765_vm9 = vmor %vm763_vm3, %vm764_vm6 }
  0xe6   : > { %v2848_v51 = vpop.eup %2847  ;;  %v501_v43 = vsel %vm3284_vm2, %v500_v32, %v496_v39  ;;  %v760_v53 = vsub.f32 1.0, %v759_v34  ;;  %v3309_v54 = vadd.f32 %v3296_v38, %v3289_v33  ;;  %v992_v55 = vpop.f32.mrf.mxu1 }
  0xe7   : > { %v502_v56 = vmul.f32 %v3244_v42, %v501_v43  ;;  %v518_v57 = vmul.f32 %v3248_v52, %v501_v43  ;;  %v504_v46 = vmul.f32 %v2848_v51, %v3278_v16  ;;  %v1261_v52 = vadd.f32 %v1260_v50, %v1241_v49 }
  0xe8   : > { %v761_v60 = vmul.f32 %v2842_v29, %v760_v53  ;;  %2849 = vrcp.f32 %v3309_v54  ;;  %v993_v4 = vadd.f32 %v992_v55, %v973_v45  ;;  %vm509_vm10 = vweird.f32 %v2848_v51 }
  0xe9   : > { %520 = vst [vmem:[%s3108_s6 + $0x20] sm:$0xff] %v502_v56  ;;  %v505_v0 = vsub.f32 1.0, %v504_v46  ;;  %v1012_v9 = vmax.f32 %v3282_v27, %v1010_v1  ;;  %v1272_v13 = vadd.f32 %v3258_v62, %v1261_v52  ;;  %vm510_vm11 = vmor %vm508_vm7, %vm509_vm10  ;;  %v782_v49 = vand.u32 2147483647, %v3309_v54 }
  0xea   : > { %522 = vst [vmem:[%s3108_s6 + $0x50] sm:$0xff] %v518_v57  ;;  %v762_v2 = vadd.f32 %v2842_v29, %v761_v60  ;;  %v1003_v14 = vadd.f32 %v3255_v58, %v993_v4  ;;  %v1275_v50 = vmul.f32 0.01, %v3327_v12  ;;  %vm778_vm13 = vweird.f32 %v3309_v54 }
  0xeb   : > { %v506_v7 = vmul.f32 %v2848_v51, %v505_v0  ;;  %v1014_v6 = vsub.f32 %v3282_v27, %v1012_v9  ;;  %v1016_v18 = vsub.f32 %v1010_v1, %v1012_v9  ;;  %v1243_v19 = vpop.f32.mrf.mxu2  ;;  %v1276_v58 = vmul.f32 0.01, %v1272_v13  ;;  %v3360_v0 = vld [vmem:[%s3004_s28 + $0x4] ss:$0 sm:$0xff] }
  0xec   : > { %v766_v10 = vsel %vm765_vm9, %v2842_v29, %v762_v2  ;;  %v1262_v20 = vpop.f32.mrf.mxu3  ;;  %v1007_v24 = vmul.f32 0.01, %v1003_v14  ;;  %v784_v29 = vand.u32 2147483648, %v3309_v54  ;;  %vm783_vm15 = vcmp.eq.f32.partialorder %v782_v49, 8.507059e+37 }
  0xed   : > { %v771_v15 = vsel %vm3298_vm5, %v770_v61, %v766_v10  ;;  %v507_v17 = vadd.f32 %v2848_v51, %v506_v7  ;;  %v1506_v25 = vpop.f32.mrf.mxu0  ;;  %v1018_v30 = vmul.f32 1.442695, %v1014_v6  ;;  %v1280_v31 = vmax.f32 %v1272_v13, %v1276_v58  ;;  %v3372_v10 = vld [vmem:[%s3004_s28 + $0x5] ss:$0 sm:$0xff] }
  0xee   : > { %v2850_v21 = vpop.eup %2849  ;;  %v772_v22 = vmul.f32 %v3260_v63, %v771_v15  ;;  %v788_v23 = vmul.f32 %v3262_v3, %v771_v15  ;;  %v1525_v26 = vpop.f32.mrf.mxu1  ;;  %v1022_v3 = vmul.f32 1.442695, %v1016_v18  ;;  %v1011_v16 = vmax.f32 %v1003_v14, %v1007_v24 }
  0xef   : > { %v511_v28 = vsel %vm510_vm11, %v2848_v51, %v507_v17  ;;  %v774_v27 = vmul.f32 %v2850_v21, %v3309_v54  ;;  %2851 = vpow2.f32 %v1018_v30  ;;  %v1282_v37 = vmax.f32 %v3293_v36, %v1280_v31 }
  0xf0   : > { %2168 = vst [vmem:[%s3108_s6 + $0x80] sm:$0xff] %v772_v22  ;;  %v516_v63 = vsel %vm3319_vm8, %v515_v8, %v511_v28  ;;  %2853 = vpow2.f32 %v1022_v3  ;;  %v1013_v39 = vmax.f32 %v3303_v41, %v1011_v16  ;;  %v1263_v40 = vadd.f32 %v1262_v20, %v1243_v19 }
  0xf1   : > { %2170 = vst [vmem:[%s3108_s6 + $0xb0] sm:$0xff] %v788_v23  ;;  %v517_v32 = vmul.f32 %v3265_v5, %v516_v63  ;;  %v519_v34 = vmul.f32 %v3272_v11, %v516_v63  ;;  %v775_v35 = vsub.f32 1.0, %v774_v27  ;;  %vm779_vm12 = vweird.f32 %v2850_v21 }
  0xf2   : > { %v1284_v5 = vsub.f32 %v3293_v36, %v1282_v37  ;;  %v1286_v51 = vsub.f32 %v1280_v31, %v1282_v37  ;;  %v1015_v11 = vsub.f32 %v3303_v41, %v1013_v39  ;;  %v1017_v43 = vsub.f32 %v1011_v16, %v1013_v39  ;;  %vm780_vm14 = vmor %vm778_vm13, %vm779_vm12 }
  0xf3   : > { %521 = vst [vmem:[%s3108_s6 + $0x28] sm:$0xff] %v517_v32  ;;  %v776_v48 = vmul.f32 %v2850_v21, %v775_v35  ;;  %v785_v44 = vor.u32 1.1754944e-38, %v784_v29  ;;  %v1273_v45 = vadd.f32 %v3258_v62, %v1263_v40  ;;  %v1776_v55 = vpop.f32.mrf.mxu2  ;;  %v1526_v54 = vadd.f32 %v1525_v26, %v1506_v25 }
  0xf4   : > { %523 = vst [vmem:[%s3108_s6 + $0x58] sm:$0xff] %v519_v34  ;;  %v1795_v56 = vpop.f32.mrf.mxu3  ;;  %v1288_v57 = vmul.f32 1.442695, %v1284_v5  ;;  %v1292_v46 = vmul.f32 1.442695, %v1286_v51  ;;  %v1279_v7 = vmax.f32 %v3327_v12, %v1275_v50 }
  0xf5   : > { %v777_v53 = vadd.f32 %v2850_v21, %v776_v48  ;;  %v1020_v59 = vmul.f32 1.442695, %v1015_v11  ;;  %v1508_v60 = vpop.f32.mrf.mxu0  ;;  %v3357_v36 = vpop.eup %2851  ;;  %v1277_v41 = vmul.f32 0.01, %v1273_v45  ;;  %v1024_v2 = vmul.f32 1.442695, %v1017_v43 }
  0xf6   : > { %v1527_v47 = vpop.f32.mrf.mxu1  ;;  %v3362_v1 = vpop.eup %2853  ;;  %2855 = vpow2.f32 %v1288_v57  ;;  %v1796_v9 = vadd.f32 %v1795_v56, %v1776_v55  ;;  %v1540_v13 = vadd.f32 %v3360_v0, %v1526_v54 }
  0xf7   : > { %v781_v61 = vsel %vm780_vm14, %v2850_v21, %v777_v53  ;;  %v3368_v4 = vadd.f32 %v3362_v1, %v3357_v36  ;;  %2857 = vpow2.f32 %v1292_v46  ;;  %v1281_v8 = vmax.f32 %v1273_v45, %v1277_v41 }
  0xf8   : > { %v786_v62 = vsel %vm783_vm15, %v785_v44, %v781_v61  ;;  %2859 = vpow2.f32 %v1020_v59  ;;  %v1810_v18 = vadd.f32 %v3372_v10, %v1796_v9  ;;  %v1544_v22 = vmul.f32 0.01, %v1540_v13 }
  0xf9   : > { %v787_v42 = vmul.f32 %v3289_v33, %v786_v62  ;;  %v789_v52 = vmul.f32 %v3296_v38, %v786_v62  ;;  %2861 = vrcp.f32 %v3368_v4  ;;  %v1283_v33 = vmax.f32 %v1279_v7, %v1281_v8 }
  0xfa   : > { %2863 = vpow2.f32 %v1024_v2  ;;  %v1528_v38 = vadd.f32 %v1527_v47, %v1508_v60  ;;  %v1037_v31 = vand.u32 2147483647, %v3368_v4  ;;  %v1814_v16 = vmul.f32 0.01, %v1810_v18 }
  0xfb   : > { %2169 = vst [vmem:[%s3108_s6 + $0x88] sm:$0xff] %v787_v42  ;;  %v1778_v14 = vpop.f32.mrf.mxu2  ;;  %v1285_v6 = vsub.f32 %v1279_v7, %v1283_v33  ;;  %v1287_v12 = vsub.f32 %v1281_v8, %v1283_v33  ;;  %v1039_v32 = vand.u32 2147483648, %v3368_v4  ;;  %v1548_v35 = vmax.f32 %v1540_v13, %v1544_v22 }
  0xfc   : > { %2171 = vst [vmem:[%s3108_s6 + $0xb8] sm:$0xff] %v789_v52  ;;  %v1797_v15 = vpop.f32.mrf.mxu3  ;;  %v3378_v17 = vpop.eup %2855  ;;  %v1541_v28 = vadd.f32 %v3360_v0, %v1528_v38  ;;  %vm1033_vm0 = vweird.f32 %v3368_v4  ;;  %vm3407_vm2 = vcmp.eq.f32.partialorder %v1037_v31, 8.507059e+37  ;;  %v3411_v43 = vmax.f32 %v1810_v18, %v1814_v16 }
  0xfd   : > { %v1511_v19 = vpop.f32.mrf.mxu0  ;;  %v3381_v21 = vpop.eup %2857  ;;  %v1290_v25 = vmul.f32 1.442695, %v1285_v6  ;;  %v1294_v26 = vmul.f32 1.442695, %v1287_v12  ;;  %v1798_v29 = vadd.f32 %v1797_v15, %v1778_v14  ;;  %v1040_v45 = vor.u32 1.1754944e-38, %v1039_v32 }
  0xfe   : > { %v1530_v20 = vpop.f32.mrf.mxu1  ;;  %v3383_v58 = vpop.eup %2859  ;;  %v3387_v24 = vadd.f32 %v3381_v21, %v3378_v17  ;;  %v1545_v39 = vmul.f32 0.01, %v1541_v28 }
  0xff   : > { %v1531_v23 = vadd.f32 %v1530_v20, %v1511_v19  ;;  %v2862_v27 = vpop.eup %2861  ;;  %v3405_v49 = vadd.f32 %v3372_v10, %v1798_v29 }
 0x100   : > { %v3391_v63 = vpop.eup %2863  ;;  %v1029_v3 = vmul.f32 %v2862_v27, %v3368_v4  ;;  %2865 = vrcp.f32 %v3387_v24  ;;  %v1307_v48 = vand.u32 2147483647, %v3387_v24  ;;  %vm1034_vm1 = vweird.f32 %v2862_v27 }
 0x101   : > { %v1542_v30 = vadd.f32 %v3360_v0, %v1531_v23  ;;  %v3399_v34 = vadd.f32 %v3391_v63, %v3383_v58  ;;  %2867 = vpow2.f32 %v1290_v25  ;;  %vm1303_vm3 = vweird.f32 %v3387_v24  ;;  %vm1035_vm4 = vmor %vm1033_vm0, %vm1034_vm1 }
 0x102   : > { %v1030_v37 = vsub.f32 1.0, %v1029_v3  ;;  %2869 = vpow2.f32 %v1294_v26  ;;  %v1309_v60 = vand.u32 2147483648, %v3387_v24  ;;  %v3415_v47 = vmax.f32 %v1541_v28, %v1545_v39 }
 0x103   : > { %v1546_v40 = vmul.f32 0.01, %v1542_v30  ;;  %2871 = vrcp.f32 %v3399_v34  ;;  %v1781_v50 = vpop.f32.mrf.mxu2  ;;  %vm3423_vm5 = vcmp.eq.f32.partialorder %v1307_v48, 8.507059e+37  ;;  %v3428_v62 = vmul.f32 0.01, %v3405_v49 }
 0x104   : > { %v1800_v5 = vpop.f32.mrf.mxu3  ;;  %v1031_v51 = vmul.f32 %v2862_v27, %v1030_v37  ;;  %v1052_v7 = vand.u32 2147483647, %v3399_v34  ;;  %v1310_v12 = vor.u32 1.1754944e-38, %v1309_v60  ;;  %vm1048_vm7 = vweird.f32 %v3399_v34 }
 0x105   : > { %v1513_v53 = vpop.f32.mrf.mxu0  ;;  %v1550_v55 = vmax.f32 %v1542_v30, %v1546_v40  ;;  %v1801_v56 = vadd.f32 %v1800_v5, %v1781_v50  ;;  %v1054_v20 = vand.u32 2147483648, %v3399_v34 }
 0x106   : > { %v1532_v44 = vpop.f32.mrf.mxu1  ;;  %v2866_v46 = vpop.eup %2865  ;;  %v1032_v59 = vadd.f32 %v2862_v27, %v1031_v51  ;;  %vm3449_vm8 = vcmp.eq.f32.partialorder %v1052_v7, 8.507059e+37 }
 0x107   : > { %v1533_v57 = vadd.f32 %v1532_v44, %v1513_v53  ;;  %v3417_v61 = vpop.eup %2867  ;;  %v1299_v41 = vmul.f32 %v2866_v46, %v3387_v24  ;;  %v1552_v2 = vmax.f32 %v1548_v35, %v1550_v55  ;;  %v1812_v8 = vadd.f32 %v3372_v10, %v1801_v56 }
 0x108   : > { %v3430_v42 = vpop.eup %2869  ;;  %v1036_v52 = vsel %vm1035_vm4, %v2862_v27, %v1032_v59  ;;  %vm1304_vm6 = vweird.f32 %v2866_v46  ;;  %v1055_v39 = vor.u32 1.1754944e-38, %v1054_v20 }
 0x109   : > { %v1543_v4 = vadd.f32 %v3360_v0, %v1533_v57  ;;  %v2872_v9 = vpop.eup %2871  ;;  %v1041_v13 = vsel %vm3407_vm2, %v1040_v45, %v1036_v52  ;;  %v1300_v33 = vsub.f32 1.0, %v1299_v41  ;;  %v3439_v38 = vadd.f32 %v3430_v42, %v3417_v61  ;;  %vm1305_vm9 = vmor %vm1303_vm3, %vm1304_vm6 }
 0x10a   : > { %v1554_v14 = vsub.f32 %v1548_v35, %v1552_v2  ;;  %v1042_v15 = vmul.f32 %v3357_v36, %v1041_v13  ;;  %v1058_v6 = vmul.f32 %v3362_v1, %v1041_v13  ;;  %v1044_v18 = vmul.f32 %v2872_v9, %v3399_v34 }
 0x10b   : > { %v1301_v19 = vmul.f32 %v2866_v46, %v1300_v33  ;;  %2873 = vrcp.f32 %v3439_v38  ;;  %v1556_v22 = vsub.f32 %v1550_v55, %v1552_v2  ;;  %v1783_v25 = vpop.f32.mrf.mxu2  ;;  %v1816_v28 = vmul.f32 0.01, %v1812_v8 }
 0x10c   : > { %2297 = vst [vmem:[%s3108_s6 + $0xe0] sm:$0xff] %v1042_v15  ;;  %v1045_v0 = vsub.f32 1.0, %v1044_v18  ;;  %v1558_v23 = vmul.f32 1.442695, %v1554_v14  ;;  %v1802_v26 = vpop.f32.mrf.mxu3  ;;  %v1547_v27 = vmul.f32 0.01, %v1543_v4  ;;  %vm1049_vm10 = vweird.f32 %v2872_v9 }
 0x10d   : > { %2299 = vst [vmem:[%s3108_s6 + $0x110] sm:$0xff] %v1058_v6  ;;  %v1302_v36 = vadd.f32 %v2866_v46, %v1301_v19  ;;  %v1562_v30 = vmul.f32 1.442695, %v1556_v22  ;;  %v1820_v31 = vmax.f32 %v1812_v8, %v1816_v28  ;;  %v1803_v32 = vadd.f32 %v1802_v26, %v1783_v25  ;;  %vm1050_vm11 = vmor %vm1048_vm7, %vm1049_vm10 }
 0x10e   : > { %v1046_v29 = vmul.f32 %v2872_v9, %v1045_v0  ;;  %2875 = vpow2.f32 %v1558_v23  ;;  %v1551_v16 = vmax.f32 %v1543_v4, %v1547_v27  ;;  %v1322_v53 = vand.u32 2147483647, %v3439_v38 }
 0x10f   : > { %v1306_v3 = vsel %vm1305_vm9, %v2866_v46, %v1302_v36  ;;  %2877 = vpow2.f32 %v1562_v30  ;;  %v1822_v50 = vmax.f32 %v3411_v43, %v1820_v31  ;;  %v1813_v44 = vadd.f32 %v3372_v10, %v1803_v32 }
 0x110   : > { %v1311_v35 = vsel %vm3423_vm5, %v1310_v12, %v1306_v3  ;;  %v1047_v37 = vadd.f32 %v2872_v9, %v1046_v29  ;;  %v1553_v5 = vmax.f32 %v3415_v47, %v1551_v16  ;;  %v1324_v59 = vand.u32 2147483648, %v3439_v38 }
 0x111   : > { %v2874_v40 = vpop.eup %2873  ;;  %v1312_v24 = vmul.f32 %v3378_v17, %v1311_v35  ;;  %v1328_v48 = vmul.f32 %v3381_v21, %v1311_v35  ;;  %v1824_v21 = vsub.f32 %v3411_v43, %v1822_v50  ;;  %v1826_v34 = vsub.f32 %v1820_v31, %v1822_v50 }
 0x112   : > { %v1051_v51 = vsel %vm1050_vm11, %v2872_v9, %v1047_v37  ;;  %v1314_v11 = vmul.f32 %v2874_v40, %v3439_v38  ;;  %v1555_v45 = vsub.f32 %v3415_v47, %v1553_v5  ;;  %v1557_v10 = vsub.f32 %v1551_v16, %v1553_v5 }
 0x113   : > { %2426 = vst [vmem:[%s3108_s6 + $0x140] sm:$0xff] %v1312_v24  ;;  %v1056_v17 = vsel %vm3449_vm8, %v1055_v39, %v1051_v51  ;;  %v1828_v60 = vmul.f32 1.442695, %v1824_v21  ;;  %v1832_v41 = vmul.f32 1.442695, %v1826_v34  ;;  %vm1319_vm12 = vweird.f32 %v2874_v40 }
 0x114   : > { %v3472_v55 = vpop.eup %2875  ;;  %2428 = vst [vmem:[%s3108_s6 + $0x170] sm:$0xff] %v1328_v48  ;;  %v1057_v56 = vmul.f32 %v3383_v58, %v1056_v17  ;;  %v1059_v57 = vmul.f32 %v3391_v63, %v1056_v17  ;;  %v1315_v46 = vsub.f32 1.0, %v1314_v11  ;;  %v1560_v47 = vmul.f32 1.442695, %v1555_v45 }
 0x115   : > { %v3478_v54 = vpop.eup %2877  ;;  %v1817_v2 = vmul.f32 0.01, %v1813_v44  ;;  %v1819_v52 = vmax.f32 %v3405_v49, %v3428_v62  ;;  %2879 = vpow2.f32 %v1828_v60  ;;  %v1564_v63 = vmul.f32 1.442695, %v1557_v10 }
 0x116   : > { %2298 = vst [vmem:[%s3108_s6 + $0xe8] sm:$0xff] %v1057_v56  ;;  %v1316_v43 = vmul.f32 %v2874_v40, %v1315_v46  ;;  %v1566_v58 = vadd.f32 %v3478_v54, %v3472_v55  ;;  %vm1318_vm13 = vweird.f32 %v3439_v38  ;;  %2881 = vpow2.f32 %v1832_v41 }
 0x117   : > { %2300 = vst [vmem:[%s3108_s6 + $0x118] sm:$0xff] %v1059_v57  ;;  %v1821_v8 = vmax.f32 %v1813_v44, %v1817_v2  ;;  %vm1320_vm14 = vmor %vm1318_vm13, %vm1319_vm12  ;;  %v1325_v4 = vor.u32 1.1754944e-38, %v1324_v59  ;;  %vm1323_vm15 = vcmp.eq.f32.partialorder %v1322_v53, 8.507059e+37 }
 0x118   : > { %v1317_v7 = vadd.f32 %v2874_v40, %v1316_v43  ;;  %2883 = vrcp.f32 %v1566_v58  ;;  %v1577_v36 = vand.u32 2147483647, %v1566_v58  ;;  %vm1573_vm1 = vweird.f32 %v1566_v58 }
 0x119   : > { %2885 = vpow2.f32 %v1560_v47  ;;  %v1823_v13 = vmax.f32 %v1819_v52, %v1821_v8 }
 0x11a   : > { %v1321_v9 = vsel %vm1320_vm14, %v2874_v40, %v1317_v7  ;;  %2887 = vpow2.f32 %v1564_v63  ;;  %vm1578_vm3 = vcmp.eq.f32.partialorder %v1577_v36, 8.507059e+37 }
 0x11b   : > { %v1326_v49 = vsel %vm1323_vm15, %v1325_v4, %v1321_v9  ;;  %v1825_v14 = vsub.f32 %v1819_v52, %v1823_v13  ;;  %v1827_v15 = vsub.f32 %v1821_v8, %v1823_v13  ;;  %v2880_v38 = vpop.eup %2879 }
 0x11c   : > { %v1327_v62 = vmul.f32 %v3417_v61, %v1326_v49  ;;  %v1329_v33 = vmul.f32 %v3430_v42, %v1326_v49  ;;  %v2882_v6 = vpop.eup %2881  ;;  %v1579_v42 = vand.u32 2147483648, %v1566_v58 }
 0x11d   : > { %v1830_v12 = vmul.f32 1.442695, %v1825_v14  ;;  %v1834_v18 = vmul.f32 1.442695, %v1827_v15  ;;  %v1836_v0 = vadd.f32 %v2882_v6, %v2880_v38 }
 0x11e   : > { %2427 = vst [vmem:[%s3108_s6 + $0x148] sm:$0xff] %v1327_v62  ;;  %v2884_v19 = vpop.eup %2883  ;;  %v1580_v29 = vor.u32 1.1754944e-38, %v1579_v42 }
 0x11f   : > { %2429 = vst [vmem:[%s3108_s6 + $0x178] sm:$0xff] %v1329_v33  ;;  %v3491_v20 = vpop.eup %2885  ;;  %v1569_v22 = vmul.f32 %v2884_v19, %v1566_v58  ;;  %2889 = vpow2.f32 %v1830_v12  ;;  %vm1574_vm0 = vweird.f32 %v2884_v19  ;;  %v1849_v24 = vand.u32 2147483648, %v1836_v0 }
 0x120   : > { %v2888_v23 = vpop.eup %2887  ;;  %2891 = vrcp.f32 %v1836_v0  ;;  %vm1575_vm2 = vmor %vm1573_vm1, %vm1574_vm0  ;;  %v1847_v5 = vand.u32 2147483647, %v1836_v0  ;;  %vm1843_vm5 = vweird.f32 %v1836_v0 }
 0x121   : > { %v1570_v25 = vsub.f32 1.0, %v1569_v22  ;;  %v1567_v61 = vadd.f32 %v2888_v23, %v3491_v20  ;;  %2893 = vpow2.f32 %v1834_v18  ;;  %v1850_v44 = vor.u32 1.1754944e-38, %v1849_v24 }
 0x122   : > { %vm1848_vm8 = vcmp.eq.f32.partialorder %v1847_v5, 8.507059e+37 }
 0x123   : > { %v1571_v26 = vmul.f32 %v2884_v19, %v1570_v25  ;;  %2895 = vrcp.f32 %v1567_v61  ;;  %v1594_v53 = vand.u32 2147483648, %v1567_v61  ;;  %v1592_v21 = vand.u32 2147483647, %v1567_v61 }
 0x124   : > { %vm1588_vm9 = vweird.f32 %v1567_v61 }
 0x125   : > { %v3494_v1 = vpop.eup %2889  ;;  %v1572_v28 = vadd.f32 %v2884_v19, %v1571_v26  ;;  %v1595_v10 = vor.u32 1.1754944e-38, %v1594_v53  ;;  %vm1593_vm11 = vcmp.eq.f32.partialorder %v1592_v21, 8.507059e+37 }
 0x126   : > { %v2892_v27 = vpop.eup %2891 }
 0x127   : > { %v2894_v30 = vpop.eup %2893  ;;  %v1576_v3 = vsel %vm1575_vm2, %v2884_v19, %v1572_v28  ;;  %v1839_v31 = vmul.f32 %v2892_v27, %v1836_v0  ;;  %vm1844_vm4 = vweird.f32 %v2892_v27 }
 0x128   : > { %v1581_v16 = vsel %vm1578_vm3, %v1580_v29, %v1576_v3  ;;  %v1837_v32 = vadd.f32 %v2894_v30, %v3494_v1  ;;  %vm1845_vm6 = vmor %vm1843_vm5, %vm1844_vm4 }
 0x129   : > { %v2896_v35 = vpop.eup %2895  ;;  %v1582_v37 = vmul.f32 %v3472_v55, %v1581_v16  ;;  %v1598_v39 = vmul.f32 %v3478_v54, %v1581_v16  ;;  %v1840_v40 = vsub.f32 1.0, %v1839_v31 }
 0x12a   : > { %v1584_v48 = vmul.f32 %v2896_v35, %v1567_v61  ;;  %2897 = vrcp.f32 %v1837_v32  ;;  %vm1589_vm7 = vweird.f32 %v2896_v35  ;;  %v1864_v2 = vand.u32 2147483648, %v1837_v32 }
 0x12b   : > { %2555 = vst [vmem:[%s3108_s6 + $0x1a0] sm:$0xff] %v1582_v37  ;;  %v1841_v50 = vmul.f32 %v2892_v27, %v1840_v40  ;;  %vm1590_vm10 = vmor %vm1588_vm9, %vm1589_vm7  ;;  %v1862_v58 = vand.u32 2147483647, %v1837_v32  ;;  %vm1858_vm13 = vweird.f32 %v1837_v32 }
 0x12c   : > { %2557 = vst [vmem:[%s3108_s6 + $0x1d0] sm:$0xff] %v1598_v39  ;;  %v1585_v51 = vsub.f32 1.0, %v1584_v48  ;;  %v1865_v7 = vor.u32 1.1754944e-38, %v1864_v2 }
 0x12d   : > { %v1842_v11 = vadd.f32 %v2892_v27, %v1841_v50  ;;  %vm1863_vm15 = vcmp.eq.f32.partialorder %v1862_v58, 8.507059e+37 }
 0x12e   : > { %v1586_v17 = vmul.f32 %v2896_v35, %v1585_v51 }
 0x12f   : > { %v1846_v34 = vsel %vm1845_vm6, %v2892_v27, %v1842_v11 }
 0x130   : > { %v2898_v45 = vpop.eup %2897  ;;  %v1851_v55 = vsel %vm1848_vm8, %v1850_v44, %v1846_v34  ;;  %v1587_v56 = vadd.f32 %v2896_v35, %v1586_v17 }
 0x131   : > { %v1852_v57 = vmul.f32 %v2880_v38, %v1851_v55  ;;  %v1868_v46 = vmul.f32 %v2882_v6, %v1851_v55  ;;  %v1854_v59 = vmul.f32 %v2898_v45, %v1837_v32  ;;  %vm1859_vm12 = vweird.f32 %v2898_v45 }
 0x132   : > { %v1591_v60 = vsel %vm1590_vm10, %v2896_v35, %v1587_v56  ;;  %vm1860_vm14 = vmor %vm1858_vm13, %vm1859_vm12 }
 0x133   : > { %2684 = vst [vmem:[%s3108_s6 + $0x200] sm:$0xff] %v1852_v57  ;;  %v1596_v41 = vsel %vm1593_vm11, %v1595_v10, %v1591_v60  ;;  %v1855_v54 = vsub.f32 1.0, %v1854_v59 }
 0x134   : > { %2686 = vst [vmem:[%s3108_s6 + $0x230] sm:$0xff] %v1868_v46  ;;  %v1597_v43 = vmul.f32 %v3491_v20, %v1596_v41  ;;  %v1599_v47 = vmul.f32 %v2888_v23, %v1596_v41 }
 0x135   : > { %v1856_v52 = vmul.f32 %v2898_v45, %v1855_v54 }
 0x136   : > { %2556 = vst [vmem:[%s3108_s6 + $0x1a8] sm:$0xff] %v1597_v43 }
 0x137   : > { %2558 = vst [vmem:[%s3108_s6 + $0x1d8] sm:$0xff] %v1599_v47  ;;  %v1857_v63 = vadd.f32 %v2898_v45, %v1856_v52 }
 0x139   : > { %v1861_v8 = vsel %vm1860_vm14, %v2898_v45, %v1857_v63 }
 0x13a   : > { %v1866_v4 = vsel %vm1863_vm15, %v1865_v7, %v1861_v8 }
 0x13b   : > { %v1867_v9 = vmul.f32 %v3494_v1, %v1866_v4  ;;  %v1869_v13 = vmul.f32 %v2894_v30, %v1866_v4 }
 0x13d   : > { %2685 = vst [vmem:[%s3108_s6 + $0x208] sm:$0xff] %v1867_v9 }
 0x13e   : > { %2687 = vst [vmem:[%s3108_s6 + $0x238] sm:$0xff] %v1869_v13 }
 0x13f PF: > { %s14_s15 = sadd.s32 1, %s2905_s15  }
 0x140   : > { %p11_p4 = scmp.ge.s32.totalorder %s14_s15, 4  }
 0x142   :  { %13 = sbr.rel (!%p11_p4) target bundleno = 1 (0x1), region = 92 }

</bundles_post_ra>
